<compile_context>
chip_gen: v6e
topology: v6e:2x2x1
jax: 0.10.0
libtpu: 0.0.40
codegen_flags: <defaults>
</compile_context>

<pallas_src>
import functools

import jax
import jax.numpy as jnp
from jax import lax
from jax.experimental import pallas as pl
from jax.experimental.pallas import tpu as pltpu


# -----------------------------------------------------------------------------
# Hardware-aware sizing
# -----------------------------------------------------------------------------
try:
    _VMEM_CAP = int(pltpu.get_tpu_info().vmem_capacity_bytes)
except Exception:  # conservative fallback (v7x-sized)
    _VMEM_CAP = 64 * 1024 * 1024

# ~96 MB on v5e/v6e, ~48 MB on v7x; leaves headroom for Mosaic-internal scratch.
_VMEM_LIMIT = int(min(_VMEM_CAP * 3 // 4, 112 * 1024 * 1024))


def _cparams():
    # Single N-tile grid axis everywhere -> 'parallel' so Mosaic can shard it
    # across the 2 TensorCores of a v7x chip (harmless on v5e/v6e).
    return pltpu.CompilerParams(dimension_semantics=("parallel",),
                                vmem_limit_bytes=_VMEM_LIMIT)


def _pick_tile(n, target):
    """Largest multiple-of-8 tile <= target that evenly divides n (else full n)."""
    if n <= target:
        return n
    t = (target // 8) * 8
    while t >= 8:
        if n % t == 0:
            return t
        t -= 8
    return n  # full-N fallback (see TODO on ragged grids)


def _knn_tile(n):
    """Row tile for the kNN kernel, bounded so the (tn, N) f32 top-k working set fits."""
    budget = max(_VMEM_CAP // 4, 4 * 1024 * 1024)
    target = budget // max(1, 16 * n)          # ~4 live (tn, N) f32 arrays
    target = max(8, min(1024, (target // 8) * 8))
    return _pick_tile(n, target)


# -----------------------------------------------------------------------------
# In-kernel dynamic row gather (feature-probed; falls back to an XLA gather)
# -----------------------------------------------------------------------------
def _gather_take(src, idx):
    return jnp.take(src, idx, axis=0, mode="clip")


def _gather_tala(src, idx):
    ib = jnp.broadcast_to(idx[:, None], (idx.shape[0], src.shape[1]))
    return jnp.take_along_axis(src, ib, axis=0, mode="clip")


def _gather_take_f32(src, idx):
    return jnp.take(src.astype(jnp.float32), idx, axis=0, mode="clip").astype(src.dtype)


_GATHER_IMPLS = {"take": _gather_take, "tala": _gather_tala, "take_f32": _gather_take_f32}


@functools.lru_cache(maxsize=1)
def _gather_mode():
    """First in-kernel row-gather formulation that compiles AND matches a reference."""
    n_src, m, c = 32, 16, 128
    src = (jnp.arange(n_src * c, dtype=jnp.float32) % 253.0).reshape(n_src, c)
    src = src.astype(jnp.bfloat16)
    idx = ((jnp.arange(m, dtype=jnp.int32) * 7 + 3) % n_src)[:, None]     # (m, 1)
    ref = jnp.take(src, idx[:, 0], axis=0)
    for mode in ("take", "tala", "take_f32"):
        g = _GATHER_IMPLS[mode]

        def kern(src_ref, idx_ref, o_ref, g=g):
            o_ref[...] = g(src_ref[...], idx_ref[...][:, 0])

        try:
            out = pl.pallas_call(
                kern, out_shape=jax.ShapeDtypeStruct((m, c), jnp.bfloat16))(src, idx)
            if bool(jnp.array_equal(jax.block_until_ready(out), ref)):
                return mode
        except Exception:
            pass
    return "none"   # fall back to the XLA gather feeding pre-gathered neighbor blocks


# -----------------------------------------------------------------------------
# Kernel helpers
# -----------------------------------------------------------------------------
def _neighbors(n_ref, idx_ref, k, gather_mode):
    """Return neighbor features (k, tn, cin) either by in-kernel gather or pre-gathered."""
    if gather_mode == "none":
        return n_ref[...]                                  # (k, tn, cin) pre-gathered
    src = n_ref[...]                                       # (N, cin) grid-invariant block
    idx = jnp.clip(idx_ref[...], 0, src.shape[0] - 1)      # (tn, k) int32
    gather = _GATHER_IMPLS[gather_mode]
    rows = [gather(src, idx[:, j]) for j in range(k)]      # k x (tn, cin)
    return jnp.stack(rows, axis=0)                         # (k, tn, cin)


def _edge_unit(x, nbr, w1, w2, bn):
    """max_j LeakyReLU(BN((nbr_j - x) @ W1 + x @ W2)) for one N tile.

    x: (tn, cin) bf16, nbr: (k, tn, cin) bf16, w1/w2: (cin, cout) bf16, bn: (2, cout) f32.
    """
    kk, tn, cin = nbr.shape
    base = jnp.dot(x, w2, preferred_element_type=jnp.float32)             # (tn, cout)
    diff = (nbr - x[None]).reshape(kk * tn, cin)
    z = jnp.dot(diff, w1, preferred_element_type=jnp.float32)             # (k*tn, cout)
    z = z.reshape(kk, tn, -1) + base[None]
    z = z * bn[0:1] + bn[1:2]                                             # folded BN (eval)
    z = jnp.where(z >= 0.0, z, 0.2 * z)                                   # LeakyReLU(0.2)
    return jnp.max(z, axis=0)                                             # (tn, cout) f32


def _aggr_bn_lrelu(parts, ws, bn):
    """1x1 Conv1d + folded BN1d + LeakyReLU; the torch channel-concat is a weight row-split."""
    z = jnp.dot(parts[0], ws[0], preferred_element_type=jnp.float32)
    for p, w in zip(parts[1:], ws[1:]):
        z = z + jnp.dot(p, w, preferred_element_type=jnp.float32)
    z = z * bn[0:1] + bn[1:2]
    return jnp.where(z >= 0.0, z, 0.2 * z)


# -----------------------------------------------------------------------------
# Kernels
# -----------------------------------------------------------------------------
def _knn_kernel(xr_ref, xat_ref, sqa_ref, idx_ref, *, k):
    """Fused pairwise-distance + top-k for one row tile.

    xr_ref : (tn, D)  row tile of points
    xat_ref: (D, N)   all points, pre-transposed (lane-dense, grid-invariant)
    sqa_ref: (1, N)   per-point squared norms (f32)
    idx_ref: (tn, k)  int32 neighbor indices
    """
    g = jnp.dot(xr_ref[...], xat_ref[...], preferred_element_type=jnp.float32)  # (tn, N) f32
    # Ranking score 2*x_i.x_j - |x_j|^2; dropping the per-row -|x_i|^2 constant
    # cannot change the top-k ordering.
    d = 2.0 * g - sqa_ref[...]
    ncols = d.shape[1]
    col_ids = lax.broadcasted_iota(jnp.int32, (1, ncols), 1)
    picked = []
    for _ in range(k):                    # k <= 5: fully unrolled
        m = jnp.max(d, axis=1, keepdims=True)
        sel = jnp.min(jnp.where(d == m, col_ids, ncols), axis=1, keepdims=True)
        sel = jnp.minimum(sel, ncols - 1)          # guard NaN / degenerate rows
        picked.append(sel)
        d = jnp.where(col_ids == sel, -jnp.inf, d)
    # Note: ties may be broken differently than torch.topk (acknowledged).
    idx_ref[...] = jnp.concatenate(picked, axis=1)


def _edge_pair_kernel(xa_ref, xb_ref, na_ref, nb_ref, ia_ref, ib_ref,
                      wa1_ref, wa2_ref, bna_ref, wb1_ref, wb2_ref, bnb_ref,
                      oa_ref, ob_ref, *, k, gather_mode):
    """Two EdgeConv blocks (semantic + centroid branch) in one launch."""
    nbr_a = _neighbors(na_ref, ia_ref, k, gather_mode)
    nbr_b = _neighbors(nb_ref, ib_ref, k, gather_mode)
    oa_ref[...] = _edge_unit(xa_ref[...], nbr_a, wa1_ref[...], wa2_ref[...],
                             bna_ref[...]).astype(oa_ref.dtype)
    ob_ref[...] = _edge_unit(xb_ref[...], nbr_b, wb1_ref[...], wb2_ref[...],
                             bnb_ref[...]).astype(ob_ref.dtype)


def _tail_kernel(s1_ref, s2_ref, c1_ref, c2_ref, ns_ref, nc_ref, is_ref, ic_ref,
                 w3s1_ref, w3s2_ref, bn3s_ref, w3c1_ref, w3c2_ref, bn3c_ref,
                 was_ref, bnas_ref, wac_ref, bnac_ref, wagg_ref, bnagg_ref,
                 o_ref, *, k, gather_mode):
    """conv3_s + conv3_c + conv_aggr_s + conv_aggr_c + conv_aggr, fully fused per N tile."""
    s1 = s1_ref[...]
    s2 = s2_ref[...]
    c1 = c1_ref[...]
    c2 = c2_ref[...]
    nbr_s = _neighbors(ns_ref, is_ref, k, gather_mode)
    nbr_c = _neighbors(nc_ref, ic_ref, k, gather_mode)

    s3 = _edge_unit(s2, nbr_s, w3s1_ref[...], w3s2_ref[...], bn3s_ref[...])   # (tn, 128) f32
    c3 = _edge_unit(c2, nbr_c, w3c1_ref[...], w3c2_ref[...], bn3c_ref[...])

    c64 = s1.shape[1]
    was = was_ref[...]
    wac = wac_ref[...]
    s_fin = _aggr_bn_lrelu((s1, s2, s3.astype(s1.dtype)),
                           (was[:c64], was[c64:2 * c64], was[2 * c64:]), bnas_ref[...])
    c_fin = _aggr_bn_lrelu((c1, c2, c3.astype(c1.dtype)),
                           (wac[:c64], wac[c64:2 * c64], wac[2 * c64:]), bnac_ref[...])

    wagg = wagg_ref[...]
    h = s_fin.shape[1]
    out = _aggr_bn_lrelu((s_fin.astype(s1.dtype), c_fin.astype(c1.dtype)),
                         (wagg[:h], wagg[h:]), bnagg_ref[...])
    o_ref[...] = out.astype(o_ref.dtype)


# -----------------------------------------------------------------------------
# Wrappers
# -----------------------------------------------------------------------------
def knn_idx(x_nc, k, tile_n):
    """k nearest neighbors per point.  x_nc: (N, D) -> (N, k) int32 indices."""
    n, d = x_nc.shape
    x32 = x_nc.astype(jnp.float32)
    sq = jnp.sum(x32 * x32, axis=1)[None, :]          # (1, N) f32
    xat = jnp.swapaxes(x_nc, 0, 1)                    # (D, N): lane-dense, grid-invariant
    return pl.pallas_call(
        functools.partial(_knn_kernel, k=k),
        grid=(n // tile_n,),
        in_specs=[
            pl.BlockSpec((tile_n, d), lambda i: (i, 0)),
            pl.BlockSpec((d, n), lambda i: (0, 0)),
            pl.BlockSpec((1, n), lambda i: (0, 0)),
        ],
        out_specs=pl.BlockSpec((tile_n, k), lambda i: (i, 0)),
        out_shape=jax.ShapeDtypeStruct((n, k), jnp.int32),
        compiler_params=_cparams(),
    )(x_nc, xat, sq)


def _neighbor_operand(x, idx, k, tile_n, gather_mode):
    """(operand, BlockSpec) for the neighbor source of one EdgeConv."""
    n, c = x.shape
    if gather_mode != "none":
        # Whole feature array as a grid-invariant VMEM block; gather happens in-kernel.
        return x, pl.BlockSpec((n, c), lambda i: (0, 0))
    # Fallback: pre-gathered (k, N, C) neighbor tensor built by XLA.
    nbr = jnp.take(x, idx.T, axis=0)
    return nbr, pl.BlockSpec((k, tile_n, c), lambda i: (0, i, 0))


def edge_conv_pair(xa, xb, idx_a, idx_b, par_a, par_b, *, k, tile_n, gather_mode):
    """Two DGCNN edge-conv blocks (one per branch) in a single pallas_call."""
    n, ca = xa.shape
    cb = xb.shape[1]
    wa, bna = par_a
    wb, bnb = par_b
    wa1, wa2 = wa[:ca], wa[ca:]           # torch channel order: cat((nbr - x, x))
    wb1, wb2 = wb[:cb], wb[cb:]
    couta, coutb = wa.shape[1], wb.shape[1]

    na_op, na_spec = _neighbor_operand(xa, idx_a, k, tile_n, gather_mode)
    nb_op, nb_spec = _neighbor_operand(xb, idx_b, k, tile_n, gather_mode)

    return pl.pallas_call(
        functools.partial(_edge_pair_kernel, k=k, gather_mode=gather_mode),
        grid=(n // tile_n,),
        in_specs=[
            pl.BlockSpec((tile_n, ca), lambda i: (i, 0)),
            pl.BlockSpec((tile_n, cb), lambda i: (i, 0)),
            na_spec,
            nb_spec,
            pl.BlockSpec((tile_n, k), lambda i: (i, 0)),
            pl.BlockSpec((tile_n, k), lambda i: (i, 0)),
            pl.BlockSpec(wa1.shape, lambda i: (0, 0)),
            pl.BlockSpec(wa2.shape, lambda i: (0, 0)),
            pl.BlockSpec(bna.shape, lambda i: (0, 0)),
            pl.BlockSpec(wb1.shape, lambda i: (0, 0)),
            pl.BlockSpec(wb2.shape, lambda i: (0, 0)),
            pl.BlockSpec(bnb.shape, lambda i: (0, 0)),
        ],
        out_specs=(
            pl.BlockSpec((tile_n, couta), lambda i: (i, 0)),
            pl.BlockSpec((tile_n, coutb), lambda i: (i, 0)),
        ),
        out_shape=(
            jax.ShapeDtypeStruct((n, couta), jnp.bfloat16),
            jax.ShapeDtypeStruct((n, coutb), jnp.bfloat16),
        ),
        compiler_params=_cparams(),
    )(xa, xb, na_op, nb_op, idx_a, idx_b, wa1, wa2, bna, wb1, wb2, bnb)


def tail_fused(s1, s2, c1, c2, idx_s, idx_c, p3s, p3c, pas, pac, pagg,
               *, k, tile_n, gather_mode):
    """conv3 (both branches) + per-branch aggregation + final aggregation in one call."""
    n, c64 = s1.shape
    w3s, bn3s = p3s
    w3c, bn3c = p3c
    was, bnas = pas
    wac, bnac = pac
    wagg, bnagg = pagg
    w3s1, w3s2 = w3s[:c64], w3s[c64:]
    w3c1, w3c2 = w3c[:c64], w3c[c64:]
    cout = wagg.shape[1]

    ns_op, ns_spec = _neighbor_operand(s2, idx_s, k, tile_n, gather_mode)
    nc_op, nc_spec = _neighbor_operand(c2, idx_c, k, tile_n, gather_mode)

    tile2d = lambda shape: pl.BlockSpec(shape, lambda i: (0, 0))

    return pl.pallas_call(
        functools.partial(_tail_kernel, k=k, gather_mode=gather_mode),
        grid=(n // tile_n,),
        in_specs=[
            pl.BlockSpec((tile_n, c64), lambda i: (i, 0)),   # s1
            pl.BlockSpec((tile_n, c64), lambda i: (i, 0)),   # s2
            pl.BlockSpec((tile_n, c64), lambda i: (i, 0)),   # c1
            pl.BlockSpec((tile_n, c64), lambda i: (i, 0)),   # c2
            ns_spec,
            nc_spec,
            pl.BlockSpec((tile_n, k), lambda i: (i, 0)),
            pl.BlockSpec((tile_n, k), lambda i: (i, 0)),
            tile2d(w3s1.shape), tile2d(w3s2.shape), tile2d(bn3s.shape),
            tile2d(w3c1.shape), tile2d(w3c2.shape), tile2d(bn3c.shape),
            tile2d(was.shape), tile2d(bnas.shape),
            tile2d(wac.shape), tile2d(bnac.shape),
            tile2d(wagg.shape), tile2d(bnagg.shape),
        ],
        out_specs=pl.BlockSpec((tile_n, cout), lambda i: (i, 0)),
        out_shape=jax.ShapeDtypeStruct((n, cout), jnp.float32),
        compiler_params=_cparams(),
    )(s1, s2, c1, c2, ns_op, nc_op, idx_s, idx_c,
      w3s1, w3s2, bn3s, w3c1, w3c2, bn3c, was, bnas, wac, bnac, wagg, bnagg)


# -----------------------------------------------------------------------------
# Parameters (deterministic, synthetic; BN folded to scale/shift, eval mode)
# -----------------------------------------------------------------------------
def make_conv_bn(key, cin, cout):
    kw, kg, kb, km, kv = jax.random.split(key, 5)
    w = jax.random.normal(kw, (cin, cout), jnp.float32) / jnp.sqrt(float(cin))
    gamma = 1.0 + 0.1 * jax.random.normal(kg, (cout,), jnp.float32)
    beta = 0.1 * jax.random.normal(kb, (cout,), jnp.float32)
    rmean = 0.05 * jax.random.normal(km, (cout,), jnp.float32)
    rvar = 1.0 + 0.1 * jax.random.uniform(kv, (cout,), jnp.float32)
    eps = 1e-5
    scale = gamma / jnp.sqrt(rvar + eps)
    shift = beta - rmean * scale
    bn = jnp.stack([scale, shift], axis=0)          # (2, cout) f32
    return (w.astype(jnp.bfloat16), bn)


def init_sgnet_params(key):
    names_shapes = [
        ("conv1_semantic", 10 * 2, 64),
        ("conv2_semantic", 64 * 2, 64),
        ("conv3_semantic", 64 * 2, 128),
        ("conv1_centroid", 3 * 2, 64),
        ("conv2_centroid", 64 * 2, 64),
        ("conv3_centroid", 64 * 2, 128),
        ("conv_aggr_s", 256, 128),
        ("conv_aggr_c", 256, 128),
        ("conv_aggr", 256, 256),
    ]
    keys = jax.random.split(key, len(names_shapes))
    return {name: make_conv_bn(kk, cin, cout)
            for kk, (name, cin, cout) in zip(keys, names_shapes)}


# -----------------------------------------------------------------------------
# SGNet forward (use_att_fusion=False path)
# -----------------------------------------------------------------------------
@functools.partial(jax.jit, static_argnames=("k", "gather_mode"))
def _sgnet_forward(x, params, *, k, gather_mode):
    n = x.shape[0]
    k = min(k, n)
    tile_conv = _pick_tile(n, 1024)
    tile_knn = _knn_tile(n)

    x_bf = x.astype(jnp.bfloat16)
    semantic0 = x_bf[:, :10]                 # (N, 10) bf16 (conv input)
    centroid0 = x_bf[:, 13:16]               # (N, 3)  bf16 (conv input)
    centroid0_f32 = x[:, 13:16]              # f32 for the first kNN (torch parity)

    # Both branches' first layer use kNN on the centroid xyz -> compute once, reuse.
    idx0 = knn_idx(centroid0_f32, k, tile_knn)

    # ---- layer 1 (both branches, shared idx0) ----
    s1, c1 = edge_conv_pair(semantic0, centroid0, idx0, idx0,
                            params["conv1_semantic"], params["conv1_centroid"],
                            k=k, tile_n=tile_conv, gather_mode=gather_mode)

    # ---- layer 2 (both branches) ----
    idx_s1 = knn_idx(s1, k, tile_knn)
    idx_c1 = knn_idx(c1, k, tile_knn)
    s2, c2 = edge_conv_pair(s1, c1, idx_s1, idx_c1,
                            params["conv2_semantic"], params["conv2_centroid"],
                            k=k, tile_n=tile_conv, gather_mode=gather_mode)

    # ---- layer 3 + per-branch aggregation + final aggregation, fully fused ----
    idx_s2 = knn_idx(s2, k, tile_knn)
    idx_c2 = knn_idx(c2, k, tile_knn)
    out = tail_fused(s1, s2, c1, c2, idx_s2, idx_c2,
                     params["conv3_semantic"], params["conv3_centroid"],
                     params["conv_aggr_s"], params["conv_aggr_c"], params["conv_aggr"],
                     k=k, tile_n=tile_conv, gather_mode=gather_mode)
    return out                                                    # (N, 256) f32


def sgnet_forward(x, params, k=5):
    """x: (N, C_feat) with C_feat >= 16.  Returns (N, 256), matching the torch module."""
    return _sgnet_forward(x, params, k=k, gather_mode=_gather_mode())


# -----------------------------------------------------------------------------
# Main
# -----------------------------------------------------------------------------
if __name__ == "__main__":
    key = jax.random.PRNGKey(0)
    k_inp, k_par = jax.random.split(key)

    num_points = 16
    feat_dim = 16     # must be >= 16 (channels 13:16 are the centroid xyz)
    x = jax.random.normal(k_inp, (num_points, feat_dim), jnp.float32)

    params = init_sgnet_params(k_par)

    out = sgnet_forward(x, params, k=5)
    out = jax.block_until_ready(out)

    assert out.shape == (num_points, 256), out.shape
    assert bool(jnp.all(jnp.isfinite(out)))
    print("KERNEL_OK")
</pallas_src>

<mosaic_0001>
module attributes {stable_mosaic.version = 11 : i64} {
  func.func @_knn_kernel(%arg0: i32, %arg1: memref<16x3xf32, #tpu.memory_space<vmem>>, %arg2: memref<3x16xf32, #tpu.memory_space<vmem>>, %arg3: memref<1x16xf32, #tpu.memory_space<vmem>>, %arg4: memref<16x5xi32, #tpu.memory_space<vmem>>) attributes {dimension_semantics = [#tpu.dimension_semantics<parallel>], iteration_bounds = array<i64: 1>, scalar_prefetch = 0 : i64, scratch_operands = 0 : i64, tpu.core_type = #tpu.core_type<tc>, window_params = [{transform_indices = @transform_0, window_bounds = array<i64: 16, 3>}, {pipeline_mode = #tpu.pipeline_mode<synchronous>, transform_indices = @transform_1, window_bounds = array<i64: 3, 16>}, {pipeline_mode = #tpu.pipeline_mode<synchronous>, transform_indices = @transform_2, window_bounds = array<i64: 1, 16>}, {transform_indices = @transform_3, window_bounds = array<i64: 16, 5>}]} {
    %c0 = arith.constant 0 : index
    %c0_0 = arith.constant 0 : index
    %0 = vector.load %arg1[%c0, %c0_0] : memref<16x3xf32, #tpu.memory_space<vmem>>, vector<16x3xf32>
    %c0_1 = arith.constant 0 : index
    %c0_2 = arith.constant 0 : index
    %1 = vector.load %arg2[%c0_1, %c0_2] : memref<3x16xf32, #tpu.memory_space<vmem>>, vector<3x16xf32>
    %cst = arith.constant dense<0.000000e+00> : vector<16x16xf32>
    %2 = tpu.matmul %0, %1, %cst {dimension_numbers = #tpu.dot_dimension_numbers<[1], [0], [0], [1], [0, 0, 1, 1], [], []>} : vector<16x3xf32>, vector<3x16xf32>, vector<16x16xf32> -> vector<16x16xf32>
    %cst_3 = arith.constant 2.000000e+00 : f32
    %3 = vector.broadcast %cst_3 : f32 to vector<16x16xf32>
    %4 = arith.mulf %3, %2 : vector<16x16xf32>
    %c0_4 = arith.constant 0 : index
    %c0_5 = arith.constant 0 : index
    %5 = vector.load %arg3[%c0_4, %c0_5] : memref<1x16xf32, #tpu.memory_space<vmem>>, vector<1x16xf32>
    %6 = vector.broadcast %5 : vector<1x16xf32> to vector<16x16xf32>
    %7 = arith.subf %4, %6 : vector<16x16xf32>
    %8 = tpu.iota {dimensions = array<i32: 1>} : vector<1x16xi32>
    %cst_6 = arith.constant dense<0xFF800000> : vector<16xf32>
    %9 = vector.multi_reduction <maximumf>, %7, %cst_6 [1] : vector<16x16xf32> to vector<16xf32>
    %10 = vector.shape_cast %9 : vector<16xf32> to vector<16x1xf32>
    %11 = vector.broadcast %10 : vector<16x1xf32> to vector<16x16xf32>
    %12 = arith.cmpf oeq, %7, %11 : vector<16x16xf32>
    %c16_i32 = arith.constant 16 : i32
    %13 = vector.shape_cast %8 : vector<1x16xi32> to vector<1x16xi32>
    %14 = vector.broadcast %13 : vector<1x16xi32> to vector<16x16xi32>
    %15 = vector.broadcast %c16_i32 : i32 to vector<16x16xi32>
    %16 = arith.select %12, %14, %15 : vector<16x16xi1>, vector<16x16xi32>
    %cst_7 = arith.constant dense<2147483647> : vector<16xi32>
    %17 = vector.multi_reduction <minsi>, %16, %cst_7 [1] : vector<16x16xi32> to vector<16xi32>
    %18 = vector.shape_cast %17 : vector<16xi32> to vector<16x1xi32>
    %c15_i32 = arith.constant 15 : i32
    %19 = vector.broadcast %c15_i32 : i32 to vector<16x1xi32>
    %20 = arith.minsi %18, %19 : vector<16x1xi32>
    %21 = vector.broadcast %8 : vector<1x16xi32> to vector<16x16xi32>
    %22 = vector.broadcast %20 : vector<16x1xi32> to vector<16x16xi32>
    %23 = arith.cmpi eq, %21, %22 : vector<16x16xi32>
    %cst_8 = arith.constant 0xFF800000 : f32
    %24 = vector.broadcast %cst_8 : f32 to vector<16x16xf32>
    %25 = arith.select %23, %24, %7 : vector<16x16xi1>, vector<16x16xf32>
    %cst_9 = arith.constant dense<0xFF800000> : vector<16xf32>
    %26 = vector.multi_reduction <maximumf>, %25, %cst_9 [1] : vector<16x16xf32> to vector<16xf32>
    %27 = vector.shape_cast %26 : vector<16xf32> to vector<16x1xf32>
    %28 = vector.broadcast %27 : vector<16x1xf32> to vector<16x16xf32>
    %29 = arith.cmpf oeq, %25, %28 : vector<16x16xf32>
    %c16_i32_10 = arith.constant 16 : i32
    %30 = vector.shape_cast %8 : vector<1x16xi32> to vector<1x16xi32>
    %31 = vector.broadcast %30 : vector<1x16xi32> to vector<16x16xi32>
    %32 = vector.broadcast %c16_i32_10 : i32 to vector<16x16xi32>
    %33 = arith.select %29, %31, %32 : vector<16x16xi1>, vector<16x16xi32>
    %cst_11 = arith.constant dense<2147483647> : vector<16xi32>
    %34 = vector.multi_reduction <minsi>, %33, %cst_11 [1] : vector<16x16xi32> to vector<16xi32>
    %35 = vector.shape_cast %34 : vector<16xi32> to vector<16x1xi32>
    %c15_i32_12 = arith.constant 15 : i32
    %36 = vector.broadcast %c15_i32_12 : i32 to vector<16x1xi32>
    %37 = arith.minsi %35, %36 : vector<16x1xi32>
    %38 = vector.broadcast %8 : vector<1x16xi32> to vector<16x16xi32>
    %39 = vector.broadcast %37 : vector<16x1xi32> to vector<16x16xi32>
    %40 = arith.cmpi eq, %38, %39 : vector<16x16xi32>
    %cst_13 = arith.constant 0xFF800000 : f32
    %41 = vector.broadcast %cst_13 : f32 to vector<16x16xf32>
    %42 = arith.select %40, %41, %25 : vector<16x16xi1>, vector<16x16xf32>
    %cst_14 = arith.constant dense<0xFF800000> : vector<16xf32>
    %43 = vector.multi_reduction <maximumf>, %42, %cst_14 [1] : vector<16x16xf32> to vector<16xf32>
    %44 = vector.shape_cast %43 : vector<16xf32> to vector<16x1xf32>
    %45 = vector.broadcast %44 : vector<16x1xf32> to vector<16x16xf32>
    %46 = arith.cmpf oeq, %42, %45 : vector<16x16xf32>
    %c16_i32_15 = arith.constant 16 : i32
    %47 = vector.shape_cast %8 : vector<1x16xi32> to vector<1x16xi32>
    %48 = vector.broadcast %47 : vector<1x16xi32> to vector<16x16xi32>
    %49 = vector.broadcast %c16_i32_15 : i32 to vector<16x16xi32>
    %50 = arith.select %46, %48, %49 : vector<16x16xi1>, vector<16x16xi32>
    %cst_16 = arith.constant dense<2147483647> : vector<16xi32>
    %51 = vector.multi_reduction <minsi>, %50, %cst_16 [1] : vector<16x16xi32> to vector<16xi32>
    %52 = vector.shape_cast %51 : vector<16xi32> to vector<16x1xi32>
    %c15_i32_17 = arith.constant 15 : i32
    %53 = vector.broadcast %c15_i32_17 : i32 to vector<16x1xi32>
    %54 = arith.minsi %52, %53 : vector<16x1xi32>
    %55 = vector.broadcast %8 : vector<1x16xi32> to vector<16x16xi32>
    %56 = vector.broadcast %54 : vector<16x1xi32> to vector<16x16xi32>
    %57 = arith.cmpi eq, %55, %56 : vector<16x16xi32>
    %cst_18 = arith.constant 0xFF800000 : f32
    %58 = vector.broadcast %cst_18 : f32 to vector<16x16xf32>
    %59 = arith.select %57, %58, %42 : vector<16x16xi1>, vector<16x16xf32>
    %cst_19 = arith.constant dense<0xFF800000> : vector<16xf32>
    %60 = vector.multi_reduction <maximumf>, %59, %cst_19 [1] : vector<16x16xf32> to vector<16xf32>
    %61 = vector.shape_cast %60 : vector<16xf32> to vector<16x1xf32>
    %62 = vector.broadcast %61 : vector<16x1xf32> to vector<16x16xf32>
    %63 = arith.cmpf oeq, %59, %62 : vector<16x16xf32>
    %c16_i32_20 = arith.constant 16 : i32
    %64 = vector.shape_cast %8 : vector<1x16xi32> to vector<1x16xi32>
    %65 = vector.broadcast %64 : vector<1x16xi32> to vector<16x16xi32>
    %66 = vector.broadcast %c16_i32_20 : i32 to vector<16x16xi32>
    %67 = arith.select %63, %65, %66 : vector<16x16xi1>, vector<16x16xi32>
    %cst_21 = arith.constant dense<2147483647> : vector<16xi32>
    %68 = vector.multi_reduction <minsi>, %67, %cst_21 [1] : vector<16x16xi32> to vector<16xi32>
    %69 = vector.shape_cast %68 : vector<16xi32> to vector<16x1xi32>
    %c15_i32_22 = arith.constant 15 : i32
    %70 = vector.broadcast %c15_i32_22 : i32 to vector<16x1xi32>
    %71 = arith.minsi %69, %70 : vector<16x1xi32>
    %72 = vector.broadcast %8 : vector<1x16xi32> to vector<16x16xi32>
    %73 = vector.broadcast %71 : vector<16x1xi32> to vector<16x16xi32>
    %74 = arith.cmpi eq, %72, %73 : vector<16x16xi32>
    %cst_23 = arith.constant 0xFF800000 : f32
    %75 = vector.broadcast %cst_23 : f32 to vector<16x16xf32>
    %76 = arith.select %74, %75, %59 : vector<16x16xi1>, vector<16x16xf32>
    %cst_24 = arith.constant dense<0xFF800000> : vector<16xf32>
    %77 = vector.multi_reduction <maximumf>, %76, %cst_24 [1] : vector<16x16xf32> to vector<16xf32>
    %78 = vector.shape_cast %77 : vector<16xf32> to vector<16x1xf32>
    %79 = vector.broadcast %78 : vector<16x1xf32> to vector<16x16xf32>
    %80 = arith.cmpf oeq, %76, %79 : vector<16x16xf32>
    %c16_i32_25 = arith.constant 16 : i32
    %81 = vector.shape_cast %8 : vector<1x16xi32> to vector<1x16xi32>
    %82 = vector.broadcast %81 : vector<1x16xi32> to vector<16x16xi32>
    %83 = vector.broadcast %c16_i32_25 : i32 to vector<16x16xi32>
    %84 = arith.select %80, %82, %83 : vector<16x16xi1>, vector<16x16xi32>
    %cst_26 = arith.constant dense<2147483647> : vector<16xi32>
    %85 = vector.multi_reduction <minsi>, %84, %cst_26 [1] : vector<16x16xi32> to vector<16xi32>
    %86 = vector.shape_cast %85 : vector<16xi32> to vector<16x1xi32>
    %c15_i32_27 = arith.constant 15 : i32
    %87 = vector.broadcast %c15_i32_27 : i32 to vector<16x1xi32>
    %88 = arith.minsi %86, %87 : vector<16x1xi32>
    %89 = tpu.concatenate %20, %37, %54, %71, %88 in 1 : vector<16x1xi32>, vector<16x1xi32>, vector<16x1xi32>, vector<16x1xi32>, vector<16x1xi32> -> vector<16x5xi32>
    %c0_28 = arith.constant 0 : index
    %c0_29 = arith.constant 0 : index
    %90 = vector.load %arg4[%c0_28, %c0_29] : memref<16x5xi32, #tpu.memory_space<vmem>>, vector<16x5xi32>
    tpu.vector_store %arg4[%c0_28, %c0_29], %89 {strides = array<i32>} : memref<16x5xi32, #tpu.memory_space<vmem>>, vector<16x5xi32>,
    return
  }
  func.func @transform_0(%arg0: i32) -> (i32, i32) {
    %c0_i32 = arith.constant 0 : i32
    %c0_i32_0 = arith.constant 0 : i32
    return %arg0, %c0_i32 : i32, i32
  }
  func.func @transform_1(%arg0: i32) -> (i32, i32) {
    %c0_i32 = arith.constant 0 : i32
    %c0_i32_0 = arith.constant 0 : i32
    %c0_i32_1 = arith.constant 0 : i32
    return %c0_i32, %c0_i32_0 : i32, i32
  }
  func.func @transform_2(%arg0: i32) -> (i32, i32) {
    %c0_i32 = arith.constant 0 : i32
    %c0_i32_0 = arith.constant 0 : i32
    %c0_i32_1 = arith.constant 0 : i32
    return %c0_i32, %c0_i32_0 : i32, i32
  }
  func.func @transform_3(%arg0: i32) -> (i32, i32) {
    %c0_i32 = arith.constant 0 : i32
    %c0_i32_0 = arith.constant 0 : i32
    return %arg0, %c0_i32 : i32, i32
  }
}

module attributes {stable_mosaic.version = 11 : i64} {
  func.func @_edge_pair_kernel(%arg0: i32, %arg1: memref<16x10xbf16, #tpu.memory_space<vmem>>, %arg2: memref<16x3xbf16, #tpu.memory_space<vmem>>, %arg3: memref<5x16x10xbf16, #tpu.memory_space<vmem>>, %arg4: memref<5x16x3xbf16, #tpu.memory_space<vmem>>, %arg5: memref<16x5xi32, #tpu.memory_space<vmem>>, %arg6: memref<16x5xi32, #tpu.memory_space<vmem>>, %arg7: memref<10x64xbf16, #tpu.memory_space<vmem>>, %arg8: memref<10x64xbf16, #tpu.memory_space<vmem>>, %arg9: memref<2x64xf32, #tpu.memory_space<vmem>>, %arg10: memref<3x64xbf16, #tpu.memory_space<vmem>>, %arg11: memref<3x64xbf16, #tpu.memory_space<vmem>>, %arg12: memref<2x64xf32, #tpu.memory_space<vmem>>, %arg13: memref<16x64xbf16, #tpu.memory_space<vmem>>, %arg14: memref<16x64xbf16, #tpu.memory_space<vmem>>) attributes {dimension_semantics = [#tpu.dimension_semantics<parallel>], iteration_bounds = array<i64: 1>, scalar_prefetch = 0 : i64, scratch_operands = 0 : i64, tpu.core_type = #tpu.core_type<tc>, window_params = [{transform_indices = @transform_0, window_bounds = array<i64: 16, 10>}, {transform_indices = @transform_1, window_bounds = array<i64: 16, 3>}, {transform_indices = @transform_2, window_bounds = array<i64: 5, 16, 10>}, {transform_indices = @transform_3, window_bounds = array<i64: 5, 16, 3>}, {transform_indices = @transform_4, window_bounds = array<i64: 16, 5>}, {transform_indices = @transform_5, window_bounds = array<i64: 16, 5>}, {pipeline_mode = #tpu.pipeline_mode<synchronous>, transform_indices = @transform_6, window_bounds = array<i64: 10, 64>}, {pipeline_mode = #tpu.pipeline_mode<synchronous>, transform_indices = @transform_7, window_bounds = array<i64: 10, 64>}, {pipeline_mode = #tpu.pipeline_mode<synchronous>, transform_indices = @transform_8, window_bounds = array<i64: 2, 64>}, {pipeline_mode = #tpu.pipeline_mode<synchronous>, transform_indices = @transform_9, window_bounds = array<i64: 3, 64>}, {pipeline_mode = #tpu.pipeline_mode<synchronous>, transform_indices = @transform_10, window_bounds = array<i64: 3, 64>}, {pipeline_mode = #tpu.pipeline_mode<synchronous>, transform_indices = @transform_11, window_bounds = array<i64: 2, 64>}, {transform_indices = @transform_12, window_bounds = array<i64: 16, 64>}, {transform_indices = @transform_13, window_bounds = array<i64: 16, 64>}]} {
    %c0 = arith.constant 0 : index
    %c0_0 = arith.constant 0 : index
    %c0_1 = arith.constant 0 : index
    %0 = vector.load %arg3[%c0, %c0_0, %c0_1] : memref<5x16x10xbf16, #tpu.memory_space<vmem>>, vector<5x16x10xbf16>
    %c0_2 = arith.constant 0 : index
    %c0_3 = arith.constant 0 : index
    %c0_4 = arith.constant 0 : index
    %1 = vector.load %arg4[%c0_2, %c0_3, %c0_4] : memref<5x16x3xbf16, #tpu.memory_space<vmem>>, vector<5x16x3xbf16>
    %c0_5 = arith.constant 0 : index
    %c0_6 = arith.constant 0 : index
    %2 = vector.load %arg1[%c0_5, %c0_6] : memref<16x10xbf16, #tpu.memory_space<vmem>>, vector<16x10xbf16>
    %c0_7 = arith.constant 0 : index
    %c0_8 = arith.constant 0 : index
    %3 = vector.load %arg7[%c0_7, %c0_8] : memref<10x64xbf16, #tpu.memory_space<vmem>>, vector<10x64xbf16>
    %c0_9 = arith.constant 0 : index
    %c0_10 = arith.constant 0 : index
    %4 = vector.load %arg8[%c0_9, %c0_10] : memref<10x64xbf16, #tpu.memory_space<vmem>>, vector<10x64xbf16>
    %c0_11 = arith.constant 0 : index
    %c0_12 = arith.constant 0 : index
    %5 = vector.load %arg9[%c0_11, %c0_12] : memref<2x64xf32, #tpu.memory_space<vmem>>, vector<2x64xf32>
    %cst = arith.constant dense<0.000000e+00> : vector<16x64xf32>
    %6 = tpu.matmul %2, %4, %cst {dimension_numbers = #tpu.dot_dimension_numbers<[1], [0], [0], [1], [0, 0, 1, 1], [], []>} : vector<16x10xbf16>, vector<10x64xbf16>, vector<16x64xf32> -> vector<16x64xf32>
    %7 = vector.shape_cast %2 : vector<16x10xbf16> to vector<1x16x10xbf16>
    %8 = vector.broadcast %7 : vector<1x16x10xbf16> to vector<5x16x10xbf16>
    %9 = arith.subf %0, %8 : vector<5x16x10xbf16>
    %10 = vector.shape_cast %9 : vector<5x16x10xbf16> to vector<80x10xbf16>
    %cst_13 = arith.constant dense<0.000000e+00> : vector<80x64xf32>
    %11 = tpu.matmul %10, %3, %cst_13 {dimension_numbers = #tpu.dot_dimension_numbers<[1], [0], [0], [1], [0, 0, 1, 1], [], []>} : vector<80x10xbf16>, vector<10x64xbf16>, vector<80x64xf32> -> vector<80x64xf32>
    %12 = vector.shape_cast %11 : vector<80x64xf32> to vector<5x16x64xf32>
    %13 = vector.shape_cast %6 : vector<16x64xf32> to vector<1x16x64xf32>
    %14 = vector.broadcast %13 : vector<1x16x64xf32> to vector<5x16x64xf32>
    %15 = arith.addf %12, %14 : vector<5x16x64xf32>
    %16 = vector.extract_strided_slice %5 {offsets = [0, 0], sizes = [1, 64], strides = [1, 1]} : vector<2x64xf32> to vector<1x64xf32>
    %17 = vector.shape_cast %16 : vector<1x64xf32> to vector<1x1x64xf32>
    %18 = vector.broadcast %17 : vector<1x1x64xf32> to vector<5x16x64xf32>
    %19 = arith.mulf %15, %18 : vector<5x16x64xf32>
    %20 = vector.extract_strided_slice %5 {offsets = [1, 0], sizes = [1, 64], strides = [1, 1]} : vector<2x64xf32> to vector<1x64xf32>
    %21 = vector.shape_cast %20 : vector<1x64xf32> to vector<1x1x64xf32>
    %22 = vector.broadcast %21 : vector<1x1x64xf32> to vector<5x16x64xf32>
    %23 = arith.addf %19, %22 : vector<5x16x64xf32>
    %cst_14 = arith.constant 0.000000e+00 : f32
    %24 = vector.broadcast %cst_14 : f32 to vector<5x16x64xf32>
    %25 = arith.cmpf oge, %23, %24 : vector<5x16x64xf32>
    %cst_15 = arith.constant 2.000000e-01 : f32
    %26 = vector.broadcast %cst_15 : f32 to vector<5x16x64xf32>
    %27 = arith.mulf %26, %23 : vector<5x16x64xf32>
    %28 = arith.select %25, %23, %27 : vector<5x16x64xi1>, vector<5x16x64xf32>
    %cst_16 = arith.constant dense<0xFF800000> : vector<16x64xf32>
    %29 = vector.multi_reduction <maximumf>, %28, %cst_16 [0] : vector<5x16x64xf32> to vector<16x64xf32>
    %30 = arith.truncf %29 : vector<16x64xf32> to vector<16x64xbf16>
    %c0_17 = arith.constant 0 : index
    %c0_18 = arith.constant 0 : index
    %31 = vector.load %arg13[%c0_17, %c0_18] : memref<16x64xbf16, #tpu.memory_space<vmem>>, vector<16x64xbf16>
    tpu.vector_store %arg13[%c0_17, %c0_18], %30 {strides = array<i32>} : memref<16x64xbf16, #tpu.memory_space<vmem>>, vector<16x64xbf16>,
    %c0_19 = arith.constant 0 : index
    %c0_20 = arith.constant 0 : index
    %32 = vector.load %arg2[%c0_19, %c0_20] : memref<16x3xbf16, #tpu.memory_space<vmem>>, vector<16x3xbf16>
    %c0_21 = arith.constant 0 : index
    %c0_22 = arith.constant 0 : index
    %33 = vector.load %arg10[%c0_21, %c0_22] : memref<3x64xbf16, #tpu.memory_space<vmem>>, vector<3x64xbf16>
    %c0_23 = arith.constant 0 : index
    %c0_24 = arith.constant 0 : index
    %34 = vector.load %arg11[%c0_23, %c0_24] : memref<3x64xbf16, #tpu.memory_space<vmem>>, vector<3x64xbf16>
    %c0_25 = arith.constant 0 : index
    %c0_26 = arith.constant 0 : index
    %35 = vector.load %arg12[%c0_25, %c0_26] : memref<2x64xf32, #tpu.memory_space<vmem>>, vector<2x64xf32>
    %cst_27 = arith.constant dense<0.000000e+00> : vector<16x64xf32>
    %36 = tpu.matmul %32, %34, %cst_27 {dimension_numbers = #tpu.dot_dimension_numbers<[1], [0], [0], [1], [0, 0, 1, 1], [], []>} : vector<16x3xbf16>, vector<3x64xbf16>, vector<16x64xf32> -> vector<16x64xf32>
    %37 = vector.shape_cast %32 : vector<16x3xbf16> to vector<1x16x3xbf16>
    %38 = vector.broadcast %37 : vector<1x16x3xbf16> to vector<5x16x3xbf16>
    %39 = arith.subf %1, %38 : vector<5x16x3xbf16>
    %40 = vector.shape_cast %39 : vector<5x16x3xbf16> to vector<80x3xbf16>
    %cst_28 = arith.constant dense<0.000000e+00> : vector<80x64xf32>
    %41 = tpu.matmul %40, %33, %cst_28 {dimension_numbers = #tpu.dot_dimension_numbers<[1], [0], [0], [1], [0, 0, 1, 1], [], []>} : vector<80x3xbf16>, vector<3x64xbf16>, vector<80x64xf32> -> vector<80x64xf32>
    %42 = vector.shape_cast %41 : vector<80x64xf32> to vector<5x16x64xf32>
    %43 = vector.shape_cast %36 : vector<16x64xf32> to vector<1x16x64xf32>
    %44 = vector.broadcast %43 : vector<1x16x64xf32> to vector<5x16x64xf32>
    %45 = arith.addf %42, %44 : vector<5x16x64xf32>
    %46 = vector.extract_strided_slice %35 {offsets = [0, 0], sizes = [1, 64], strides = [1, 1]} : vector<2x64xf32> to vector<1x64xf32>
    %47 = vector.shape_cast %46 : vector<1x64xf32> to vector<1x1x64xf32>
    %48 = vector.broadcast %47 : vector<1x1x64xf32> to vector<5x16x64xf32>
    %49 = arith.mulf %45, %48 : vector<5x16x64xf32>
    %50 = vector.extract_strided_slice %35 {offsets = [1, 0], sizes = [1, 64], strides = [1, 1]} : vector<2x64xf32> to vector<1x64xf32>
    %51 = vector.shape_cast %50 : vector<1x64xf32> to vector<1x1x64xf32>
    %52 = vector.broadcast %51 : vector<1x1x64xf32> to vector<5x16x64xf32>
    %53 = arith.addf %49, %52 : vector<5x16x64xf32>
    %cst_29 = arith.constant 0.000000e+00 : f32
    %54 = vector.broadcast %cst_29 : f32 to vector<5x16x64xf32>
    %55 = arith.cmpf oge, %53, %54 : vector<5x16x64xf32>
    %cst_30 = arith.constant 2.000000e-01 : f32
    %56 = vector.broadcast %cst_30 : f32 to vector<5x16x64xf32>
    %57 = arith.mulf %56, %53 : vector<5x16x64xf32>
    %58 = arith.select %55, %53, %57 : vector<5x16x64xi1>, vector<5x16x64xf32>
    %cst_31 = arith.constant dense<0xFF800000> : vector<16x64xf32>
    %59 = vector.multi_reduction <maximumf>, %58, %cst_31 [0] : vector<5x16x64xf32> to vector<16x64xf32>
    %60 = arith.truncf %59 : vector<16x64xf32> to vector<16x64xbf16>
    %c0_32 = arith.constant 0 : index
    %c0_33 = arith.constant 0 : index
    %61 = vector.load %arg14[%c0_32, %c0_33] : memref<16x64xbf16, #tpu.memory_space<vmem>>, vector<16x64xbf16>
    tpu.vector_store %arg14[%c0_32, %c0_33], %60 {strides = array<i32>} : memref<16x64xbf16, #tpu.memory_space<vmem>>, vector<16x64xbf16>,
    return
  }
  func.func @transform_0(%arg0: i32) -> (i32, i32) {
    %c0_i32 = arith.constant 0 : i32
    %c0_i32_0 = arith.constant 0 : i32
    return %arg0, %c0_i32 : i32, i32
  }
  func.func @transform_1(%arg0: i32) -> (i32, i32) {
    %c0_i32 = arith.constant 0 : i32
    %c0_i32_0 = arith.constant 0 : i32
    return %arg0, %c0_i32 : i32, i32
  }
  func.func @transform_2(%arg0: i32) -> (i32, i32, i32) {
    %c0_i32 = arith.constant 0 : i32
    %c0_i32_0 = arith.constant 0 : i32
    %c0_i32_1 = arith.constant 0 : i32
    return %c0_i32, %arg0, %c0_i32_0 : i32, i32, i32
  }
  func.func @transform_3(%arg0: i32) -> (i32, i32, i32) {
    %c0_i32 = arith.constant 0 : i32
    %c0_i32_0 = arith.constant 0 : i32
    %c0_i32_1 = arith.constant 0 : i32
    return %c0_i32, %arg0, %c0_i32_0 : i32, i32, i32
  }
  func.func @transform_4(%arg0: i32) -> (i32, i32) {
    %c0_i32 = arith.constant 0 : i32
    %c0_i32_0 = arith.constant 0 : i32
    return %arg0, %c0_i32 : i32, i32
  }
  func.func @transform_5(%arg0: i32) -> (i32, i32) {
    %c0_i32 = arith.constant 0 : i32
    %c0_i32_0 = arith.constant 0 : i32
    return %arg0, %c0_i32 : i32, i32
  }
  func.func @transform_6(%arg0: i32) -> (i32, i32) {
    %c0_i32 = arith.constant 0 : i32
    %c0_i32_0 = arith.constant 0 : i32
    %c0_i32_1 = arith.constant 0 : i32
    return %c0_i32, %c0_i32_0 : i32, i32
  }
  func.func @transform_7(%arg0: i32) -> (i32, i32) {
    %c0_i32 = arith.constant 0 : i32
    %c0_i32_0 = arith.constant 0 : i32
    %c0_i32_1 = arith.constant 0 : i32
    return %c0_i32, %c0_i32_0 : i32, i32
  }
  func.func @transform_8(%arg0: i32) -> (i32, i32) {
    %c0_i32 = arith.constant 0 : i32
    %c0_i32_0 = arith.constant 0 : i32
    %c0_i32_1 = arith.constant 0 : i32
    return %c0_i32, %c0_i32_0 : i32, i32
  }
  func.func @transform_9(%arg0: i32) -> (i32, i32) {
    %c0_i32 = arith.constant 0 : i32
    %c0_i32_0 = arith.constant 0 : i32
    %c0_i32_1 = arith.constant 0 : i32
    return %c0_i32, %c0_i32_0 : i32, i32
  }
  func.func @transform_10(%arg0: i32) -> (i32, i32) {
    %c0_i32 = arith.constant 0 : i32
    %c0_i32_0 = arith.constant 0 : i32
    %c0_i32_1 = arith.constant 0 : i32
    return %c0_i32, %c0_i32_0 : i32, i32
  }
  func.func @transform_11(%arg0: i32) -> (i32, i32) {
    %c0_i32 = arith.constant 0 : i32
    %c0_i32_0 = arith.constant 0 : i32
    %c0_i32_1 = arith.constant 0 : i32
    return %c0_i32, %c0_i32_0 : i32, i32
  }
  func.func @transform_12(%arg0: i32) -> (i32, i32) {
    %c0_i32 = arith.constant 0 : i32
    %c0_i32_0 = arith.constant 0 : i32
    return %arg0, %c0_i32 : i32, i32
  }
  func.func @transform_13(%arg0: i32) -> (i32, i32) {
    %c0_i32 = arith.constant 0 : i32
    %c0_i32_0 = arith.constant 0 : i32
    return %arg0, %c0_i32 : i32, i32
  }
}

module attributes {stable_mosaic.version = 11 : i64} {
  func.func @_knn_kernel(%arg0: i32, %arg1: memref<16x64xbf16, #tpu.memory_space<vmem>>, %arg2: memref<64x16xbf16, #tpu.memory_space<vmem>>, %arg3: memref<1x16xf32, #tpu.memory_space<vmem>>, %arg4: memref<16x5xi32, #tpu.memory_space<vmem>>) attributes {dimension_semantics = [#tpu.dimension_semantics<parallel>], iteration_bounds = array<i64: 1>, scalar_prefetch = 0 : i64, scratch_operands = 0 : i64, tpu.core_type = #tpu.core_type<tc>, window_params = [{transform_indices = @transform_0, window_bounds = array<i64: 16, 64>}, {pipeline_mode = #tpu.pipeline_mode<synchronous>, transform_indices = @transform_1, window_bounds = array<i64: 64, 16>}, {pipeline_mode = #tpu.pipeline_mode<synchronous>, transform_indices = @transform_2, window_bounds = array<i64: 1, 16>}, {transform_indices = @transform_3, window_bounds = array<i64: 16, 5>}]} {
    %c0 = arith.constant 0 : index
    %c0_0 = arith.constant 0 : index
    %0 = vector.load %arg1[%c0, %c0_0] : memref<16x64xbf16, #tpu.memory_space<vmem>>, vector<16x64xbf16>
    %c0_1 = arith.constant 0 : index
    %c0_2 = arith.constant 0 : index
    %1 = vector.load %arg2[%c0_1, %c0_2] : memref<64x16xbf16, #tpu.memory_space<vmem>>, vector<64x16xbf16>
    %cst = arith.constant dense<0.000000e+00> : vector<16x16xf32>
    %2 = tpu.matmul %0, %1, %cst {dimension_numbers = #tpu.dot_dimension_numbers<[1], [0], [0], [1], [0, 0, 1, 1], [], []>} : vector<16x64xbf16>, vector<64x16xbf16>, vector<16x16xf32> -> vector<16x16xf32>
    %cst_3 = arith.constant 2.000000e+00 : f32
    %3 = vector.broadcast %cst_3 : f32 to vector<16x16xf32>
    %4 = arith.mulf %3, %2 : vector<16x16xf32>
    %c0_4 = arith.constant 0 : index
    %c0_5 = arith.constant 0 : index
    %5 = vector.load %arg3[%c0_4, %c0_5] : memref<1x16xf32, #tpu.memory_space<vmem>>, vector<1x16xf32>
    %6 = vector.broadcast %5 : vector<1x16xf32> to vector<16x16xf32>
    %7 = arith.subf %4, %6 : vector<16x16xf32>
    %8 = tpu.iota {dimensions = array<i32: 1>} : vector<1x16xi32>
    %cst_6 = arith.constant dense<0xFF800000> : vector<16xf32>
    %9 = vector.multi_reduction <maximumf>, %7, %cst_6 [1] : vector<16x16xf32> to vector<16xf32>
    %10 = vector.shape_cast %9 : vector<16xf32> to vector<16x1xf32>
    %11 = vector.broadcast %10 : vector<16x1xf32> to vector<16x16xf32>
    %12 = arith.cmpf oeq, %7, %11 : vector<16x16xf32>
    %c16_i32 = arith.constant 16 : i32
    %13 = vector.shape_cast %8 : vector<1x16xi32> to vector<1x16xi32>
    %14 = vector.broadcast %13 : vector<1x16xi32> to vector<16x16xi32>
    %15 = vector.broadcast %c16_i32 : i32 to vector<16x16xi32>
    %16 = arith.select %12, %14, %15 : vector<16x16xi1>, vector<16x16xi32>
    %cst_7 = arith.constant dense<2147483647> : vector<16xi32>
    %17 = vector.multi_reduction <minsi>, %16, %cst_7 [1] : vector<16x16xi32> to vector<16xi32>
    %18 = vector.shape_cast %17 : vector<16xi32> to vector<16x1xi32>
    %c15_i32 = arith.constant 15 : i32
    %19 = vector.broadcast %c15_i32 : i32 to vector<16x1xi32>
    %20 = arith.minsi %18, %19 : vector<16x1xi32>
    %21 = vector.broadcast %8 : vector<1x16xi32> to vector<16x16xi32>
    %22 = vector.broadcast %20 : vector<16x1xi32> to vector<16x16xi32>
    %23 = arith.cmpi eq, %21, %22 : vector<16x16xi32>
    %cst_8 = arith.constant 0xFF800000 : f32
    %24 = vector.broadcast %cst_8 : f32 to vector<16x16xf32>
    %25 = arith.select %23, %24, %7 : vector<16x16xi1>, vector<16x16xf32>
    %cst_9 = arith.constant dense<0xFF800000> : vector<16xf32>
    %26 = vector.multi_reduction <maximumf>, %25, %cst_9 [1] : vector<16x16xf32> to vector<16xf32>
    %27 = vector.shape_cast %26 : vector<16xf32> to vector<16x1xf32>
    %28 = vector.broadcast %27 : vector<16x1xf32> to vector<16x16xf32>
    %29 = arith.cmpf oeq, %25, %28 : vector<16x16xf32>
    %c16_i32_10 = arith.constant 16 : i32
    %30 = vector.shape_cast %8 : vector<1x16xi32> to vector<1x16xi32>
    %31 = vector.broadcast %30 : vector<1x16xi32> to vector<16x16xi32>
    %32 = vector.broadcast %c16_i32_10 : i32 to vector<16x16xi32>
    %33 = arith.select %29, %31, %32 : vector<16x16xi1>, vector<16x16xi32>
    %cst_11 = arith.constant dense<2147483647> : vector<16xi32>
    %34 = vector.multi_reduction <minsi>, %33, %cst_11 [1] : vector<16x16xi32> to vector<16xi32>
    %35 = vector.shape_cast %34 : vector<16xi32> to vector<16x1xi32>
    %c15_i32_12 = arith.constant 15 : i32
    %36 = vector.broadcast %c15_i32_12 : i32 to vector<16x1xi32>
    %37 = arith.minsi %35, %36 : vector<16x1xi32>
    %38 = vector.broadcast %8 : vector<1x16xi32> to vector<16x16xi32>
    %39 = vector.broadcast %37 : vector<16x1xi32> to vector<16x16xi32>
    %40 = arith.cmpi eq, %38, %39 : vector<16x16xi32>
    %cst_13 = arith.constant 0xFF800000 : f32
    %41 = vector.broadcast %cst_13 : f32 to vector<16x16xf32>
    %42 = arith.select %40, %41, %25 : vector<16x16xi1>, vector<16x16xf32>
    %cst_14 = arith.constant dense<0xFF800000> : vector<16xf32>
    %43 = vector.multi_reduction <maximumf>, %42, %cst_14 [1] : vector<16x16xf32> to vector<16xf32>
    %44 = vector.shape_cast %43 : vector<16xf32> to vector<16x1xf32>
    %45 = vector.broadcast %44 : vector<16x1xf32> to vector<16x16xf32>
    %46 = arith.cmpf oeq, %42, %45 : vector<16x16xf32>
    %c16_i32_15 = arith.constant 16 : i32
    %47 = vector.shape_cast %8 : vector<1x16xi32> to vector<1x16xi32>
    %48 = vector.broadcast %47 : vector<1x16xi32> to vector<16x16xi32>
    %49 = vector.broadcast %c16_i32_15 : i32 to vector<16x16xi32>
    %50 = arith.select %46, %48, %49 : vector<16x16xi1>, vector<16x16xi32>
    %cst_16 = arith.constant dense<2147483647> : vector<16xi32>
    %51 = vector.multi_reduction <minsi>, %50, %cst_16 [1] : vector<16x16xi32> to vector<16xi32>
    %52 = vector.shape_cast %51 : vector<16xi32> to vector<16x1xi32>
    %c15_i32_17 = arith.constant 15 : i32
    %53 = vector.broadcast %c15_i32_17 : i32 to vector<16x1xi32>
    %54 = arith.minsi %52, %53 : vector<16x1xi32>
    %55 = vector.broadcast %8 : vector<1x16xi32> to vector<16x16xi32>
    %56 = vector.broadcast %54 : vector<16x1xi32> to vector<16x16xi32>
    %57 = arith.cmpi eq, %55, %56 : vector<16x16xi32>
    %cst_18 = arith.constant 0xFF800000 : f32
    %58 = vector.broadcast %cst_18 : f32 to vector<16x16xf32>
    %59 = arith.select %57, %58, %42 : vector<16x16xi1>, vector<16x16xf32>
    %cst_19 = arith.constant dense<0xFF800000> : vector<16xf32>
    %60 = vector.multi_reduction <maximumf>, %59, %cst_19 [1] : vector<16x16xf32> to vector<16xf32>
    %61 = vector.shape_cast %60 : vector<16xf32> to vector<16x1xf32>
    %62 = vector.broadcast %61 : vector<16x1xf32> to vector<16x16xf32>
    %63 = arith.cmpf oeq, %59, %62 : vector<16x16xf32>
    %c16_i32_20 = arith.constant 16 : i32
    %64 = vector.shape_cast %8 : vector<1x16xi32> to vector<1x16xi32>
    %65 = vector.broadcast %64 : vector<1x16xi32> to vector<16x16xi32>
    %66 = vector.broadcast %c16_i32_20 : i32 to vector<16x16xi32>
    %67 = arith.select %63, %65, %66 : vector<16x16xi1>, vector<16x16xi32>
    %cst_21 = arith.constant dense<2147483647> : vector<16xi32>
    %68 = vector.multi_reduction <minsi>, %67, %cst_21 [1] : vector<16x16xi32> to vector<16xi32>
    %69 = vector.shape_cast %68 : vector<16xi32> to vector<16x1xi32>
    %c15_i32_22 = arith.constant 15 : i32
    %70 = vector.broadcast %c15_i32_22 : i32 to vector<16x1xi32>
    %71 = arith.minsi %69, %70 : vector<16x1xi32>
    %72 = vector.broadcast %8 : vector<1x16xi32> to vector<16x16xi32>
    %73 = vector.broadcast %71 : vector<16x1xi32> to vector<16x16xi32>
    %74 = arith.cmpi eq, %72, %73 : vector<16x16xi32>
    %cst_23 = arith.constant 0xFF800000 : f32
    %75 = vector.broadcast %cst_23 : f32 to vector<16x16xf32>
    %76 = arith.select %74, %75, %59 : vector<16x16xi1>, vector<16x16xf32>
    %cst_24 = arith.constant dense<0xFF800000> : vector<16xf32>
    %77 = vector.multi_reduction <maximumf>, %76, %cst_24 [1] : vector<16x16xf32> to vector<16xf32>
    %78 = vector.shape_cast %77 : vector<16xf32> to vector<16x1xf32>
    %79 = vector.broadcast %78 : vector<16x1xf32> to vector<16x16xf32>
    %80 = arith.cmpf oeq, %76, %79 : vector<16x16xf32>
    %c16_i32_25 = arith.constant 16 : i32
    %81 = vector.shape_cast %8 : vector<1x16xi32> to vector<1x16xi32>
    %82 = vector.broadcast %81 : vector<1x16xi32> to vector<16x16xi32>
    %83 = vector.broadcast %c16_i32_25 : i32 to vector<16x16xi32>
    %84 = arith.select %80, %82, %83 : vector<16x16xi1>, vector<16x16xi32>
    %cst_26 = arith.constant dense<2147483647> : vector<16xi32>
    %85 = vector.multi_reduction <minsi>, %84, %cst_26 [1] : vector<16x16xi32> to vector<16xi32>
    %86 = vector.shape_cast %85 : vector<16xi32> to vector<16x1xi32>
    %c15_i32_27 = arith.constant 15 : i32
    %87 = vector.broadcast %c15_i32_27 : i32 to vector<16x1xi32>
    %88 = arith.minsi %86, %87 : vector<16x1xi32>
    %89 = tpu.concatenate %20, %37, %54, %71, %88 in 1 : vector<16x1xi32>, vector<16x1xi32>, vector<16x1xi32>, vector<16x1xi32>, vector<16x1xi32> -> vector<16x5xi32>
    %c0_28 = arith.constant 0 : index
    %c0_29 = arith.constant 0 : index
    %90 = vector.load %arg4[%c0_28, %c0_29] : memref<16x5xi32, #tpu.memory_space<vmem>>, vector<16x5xi32>
    tpu.vector_store %arg4[%c0_28, %c0_29], %89 {strides = array<i32>} : memref<16x5xi32, #tpu.memory_space<vmem>>, vector<16x5xi32>,
    return
  }
  func.func @transform_0(%arg0: i32) -> (i32, i32) {
    %c0_i32 = arith.constant 0 : i32
    %c0_i32_0 = arith.constant 0 : i32
    return %arg0, %c0_i32 : i32, i32
  }
  func.func @transform_1(%arg0: i32) -> (i32, i32) {
    %c0_i32 = arith.constant 0 : i32
    %c0_i32_0 = arith.constant 0 : i32
    %c0_i32_1 = arith.constant 0 : i32
    return %c0_i32, %c0_i32_0 : i32, i32
  }
  func.func @transform_2(%arg0: i32) -> (i32, i32) {
    %c0_i32 = arith.constant 0 : i32
    %c0_i32_0 = arith.constant 0 : i32
    %c0_i32_1 = arith.constant 0 : i32
    return %c0_i32, %c0_i32_0 : i32, i32
  }
  func.func @transform_3(%arg0: i32) -> (i32, i32) {
    %c0_i32 = arith.constant 0 : i32
    %c0_i32_0 = arith.constant 0 : i32
    return %arg0, %c0_i32 : i32, i32
  }
}

module attributes {stable_mosaic.version = 11 : i64} {
  func.func @_edge_pair_kernel(%arg0: i32, %arg1: memref<16x64xbf16, #tpu.memory_space<vmem>>, %arg2: memref<16x64xbf16, #tpu.memory_space<vmem>>, %arg3: memref<5x16x64xbf16, #tpu.memory_space<vmem>>, %arg4: memref<5x16x64xbf16, #tpu.memory_space<vmem>>, %arg5: memref<16x5xi32, #tpu.memory_space<vmem>>, %arg6: memref<16x5xi32, #tpu.memory_space<vmem>>, %arg7: memref<64x64xbf16, #tpu.memory_space<vmem>>, %arg8: memref<64x64xbf16, #tpu.memory_space<vmem>>, %arg9: memref<2x64xf32, #tpu.memory_space<vmem>>, %arg10: memref<64x64xbf16, #tpu.memory_space<vmem>>, %arg11: memref<64x64xbf16, #tpu.memory_space<vmem>>, %arg12: memref<2x64xf32, #tpu.memory_space<vmem>>, %arg13: memref<16x64xbf16, #tpu.memory_space<vmem>>, %arg14: memref<16x64xbf16, #tpu.memory_space<vmem>>) attributes {dimension_semantics = [#tpu.dimension_semantics<parallel>], iteration_bounds = array<i64: 1>, scalar_prefetch = 0 : i64, scratch_operands = 0 : i64, tpu.core_type = #tpu.core_type<tc>, window_params = [{transform_indices = @transform_0, window_bounds = array<i64: 16, 64>}, {transform_indices = @transform_1, window_bounds = array<i64: 16, 64>}, {transform_indices = @transform_2, window_bounds = array<i64: 5, 16, 64>}, {transform_indices = @transform_3, window_bounds = array<i64: 5, 16, 64>}, {transform_indices = @transform_4, window_bounds = array<i64: 16, 5>}, {transform_indices = @transform_5, window_bounds = array<i64: 16, 5>}, {pipeline_mode = #tpu.pipeline_mode<synchronous>, transform_indices = @transform_6, window_bounds = array<i64: 64, 64>}, {pipeline_mode = #tpu.pipeline_mode<synchronous>, transform_indices = @transform_7, window_bounds = array<i64: 64, 64>}, {pipeline_mode = #tpu.pipeline_mode<synchronous>, transform_indices = @transform_8, window_bounds = array<i64: 2, 64>}, {pipeline_mode = #tpu.pipeline_mode<synchronous>, transform_indices = @transform_9, window_bounds = array<i64: 64, 64>}, {pipeline_mode = #tpu.pipeline_mode<synchronous>, transform_indices = @transform_10, window_bounds = array<i64: 64, 64>}, {pipeline_mode = #tpu.pipeline_mode<synchronous>, transform_indices = @transform_11, window_bounds = array<i64: 2, 64>}, {transform_indices = @transform_12, window_bounds = array<i64: 16, 64>}, {transform_indices = @transform_13, window_bounds = array<i64: 16, 64>}]} {
    %c0 = arith.constant 0 : index
    %c0_0 = arith.constant 0 : index
    %c0_1 = arith.constant 0 : index
    %0 = vector.load %arg3[%c0, %c0_0, %c0_1] : memref<5x16x64xbf16, #tpu.memory_space<vmem>>, vector<5x16x64xbf16>
    %c0_2 = arith.constant 0 : index
    %c0_3 = arith.constant 0 : index
    %c0_4 = arith.constant 0 : index
    %1 = vector.load %arg4[%c0_2, %c0_3, %c0_4] : memref<5x16x64xbf16, #tpu.memory_space<vmem>>, vector<5x16x64xbf16>
    %c0_5 = arith.constant 0 : index
    %c0_6 = arith.constant 0 : index
    %2 = vector.load %arg1[%c0_5, %c0_6] : memref<16x64xbf16, #tpu.memory_space<vmem>>, vector<16x64xbf16>
    %c0_7 = arith.constant 0 : index
    %c0_8 = arith.constant 0 : index
    %3 = vector.load %arg7[%c0_7, %c0_8] : memref<64x64xbf16, #tpu.memory_space<vmem>>, vector<64x64xbf16>
    %c0_9 = arith.constant 0 : index
    %c0_10 = arith.constant 0 : index
    %4 = vector.load %arg8[%c0_9, %c0_10] : memref<64x64xbf16, #tpu.memory_space<vmem>>, vector<64x64xbf16>
    %c0_11 = arith.constant 0 : index
    %c0_12 = arith.constant 0 : index
    %5 = vector.load %arg9[%c0_11, %c0_12] : memref<2x64xf32, #tpu.memory_space<vmem>>, vector<2x64xf32>
    %cst = arith.constant dense<0.000000e+00> : vector<16x64xf32>
    %6 = tpu.matmul %2, %4, %cst {dimension_numbers = #tpu.dot_dimension_numbers<[1], [0], [0], [1], [0, 0, 1, 1], [], []>} : vector<16x64xbf16>, vector<64x64xbf16>, vector<16x64xf32> -> vector<16x64xf32>
    %7 = vector.shape_cast %2 : vector<16x64xbf16> to vector<1x16x64xbf16>
    %8 = vector.broadcast %7 : vector<1x16x64xbf16> to vector<5x16x64xbf16>
    %9 = arith.subf %0, %8 : vector<5x16x64xbf16>
    %10 = vector.shape_cast %9 : vector<5x16x64xbf16> to vector<80x64xbf16>
    %cst_13 = arith.constant dense<0.000000e+00> : vector<80x64xf32>
    %11 = tpu.matmul %10, %3, %cst_13 {dimension_numbers = #tpu.dot_dimension_numbers<[1], [0], [0], [1], [0, 0, 1, 1], [], []>} : vector<80x64xbf16>, vector<64x64xbf16>, vector<80x64xf32> -> vector<80x64xf32>
    %12 = vector.shape_cast %11 : vector<80x64xf32> to vector<5x16x64xf32>
    %13 = vector.shape_cast %6 : vector<16x64xf32> to vector<1x16x64xf32>
    %14 = vector.broadcast %13 : vector<1x16x64xf32> to vector<5x16x64xf32>
    %15 = arith.addf %12, %14 : vector<5x16x64xf32>
    %16 = vector.extract_strided_slice %5 {offsets = [0, 0], sizes = [1, 64], strides = [1, 1]} : vector<2x64xf32> to vector<1x64xf32>
    %17 = vector.shape_cast %16 : vector<1x64xf32> to vector<1x1x64xf32>
    %18 = vector.broadcast %17 : vector<1x1x64xf32> to vector<5x16x64xf32>
    %19 = arith.mulf %15, %18 : vector<5x16x64xf32>
    %20 = vector.extract_strided_slice %5 {offsets = [1, 0], sizes = [1, 64], strides = [1, 1]} : vector<2x64xf32> to vector<1x64xf32>
    %21 = vector.shape_cast %20 : vector<1x64xf32> to vector<1x1x64xf32>
    %22 = vector.broadcast %21 : vector<1x1x64xf32> to vector<5x16x64xf32>
    %23 = arith.addf %19, %22 : vector<5x16x64xf32>
    %cst_14 = arith.constant 0.000000e+00 : f32
    %24 = vector.broadcast %cst_14 : f32 to vector<5x16x64xf32>
    %25 = arith.cmpf oge, %23, %24 : vector<5x16x64xf32>
    %cst_15 = arith.constant 2.000000e-01 : f32
    %26 = vector.broadcast %cst_15 : f32 to vector<5x16x64xf32>
    %27 = arith.mulf %26, %23 : vector<5x16x64xf32>
    %28 = arith.select %25, %23, %27 : vector<5x16x64xi1>, vector<5x16x64xf32>
    %cst_16 = arith.constant dense<0xFF800000> : vector<16x64xf32>
    %29 = vector.multi_reduction <maximumf>, %28, %cst_16 [0] : vector<5x16x64xf32> to vector<16x64xf32>
    %30 = arith.truncf %29 : vector<16x64xf32> to vector<16x64xbf16>
    %c0_17 = arith.constant 0 : index
    %c0_18 = arith.constant 0 : index
    %31 = vector.load %arg13[%c0_17, %c0_18] : memref<16x64xbf16, #tpu.memory_space<vmem>>, vector<16x64xbf16>
    tpu.vector_store %arg13[%c0_17, %c0_18], %30 {strides = array<i32>} : memref<16x64xbf16, #tpu.memory_space<vmem>>, vector<16x64xbf16>,
    %c0_19 = arith.constant 0 : index
    %c0_20 = arith.constant 0 : index
    %32 = vector.load %arg2[%c0_19, %c0_20] : memref<16x64xbf16, #tpu.memory_space<vmem>>, vector<16x64xbf16>
    %c0_21 = arith.constant 0 : index
    %c0_22 = arith.constant 0 : index
    %33 = vector.load %arg10[%c0_21, %c0_22] : memref<64x64xbf16, #tpu.memory_space<vmem>>, vector<64x64xbf16>
    %c0_23 = arith.constant 0 : index
    %c0_24 = arith.constant 0 : index
    %34 = vector.load %arg11[%c0_23, %c0_24] : memref<64x64xbf16, #tpu.memory_space<vmem>>, vector<64x64xbf16>
    %c0_25 = arith.constant 0 : index
    %c0_26 = arith.constant 0 : index
    %35 = vector.load %arg12[%c0_25, %c0_26] : memref<2x64xf32, #tpu.memory_space<vmem>>, vector<2x64xf32>
    %cst_27 = arith.constant dense<0.000000e+00> : vector<16x64xf32>
    %36 = tpu.matmul %32, %34, %cst_27 {dimension_numbers = #tpu.dot_dimension_numbers<[1], [0], [0], [1], [0, 0, 1, 1], [], []>} : vector<16x64xbf16>, vector<64x64xbf16>, vector<16x64xf32> -> vector<16x64xf32>
    %37 = vector.shape_cast %32 : vector<16x64xbf16> to vector<1x16x64xbf16>
    %38 = vector.broadcast %37 : vector<1x16x64xbf16> to vector<5x16x64xbf16>
    %39 = arith.subf %1, %38 : vector<5x16x64xbf16>
    %40 = vector.shape_cast %39 : vector<5x16x64xbf16> to vector<80x64xbf16>
    %cst_28 = arith.constant dense<0.000000e+00> : vector<80x64xf32>
    %41 = tpu.matmul %40, %33, %cst_28 {dimension_numbers = #tpu.dot_dimension_numbers<[1], [0], [0], [1], [0, 0, 1, 1], [], []>} : vector<80x64xbf16>, vector<64x64xbf16>, vector<80x64xf32> -> vector<80x64xf32>
    %42 = vector.shape_cast %41 : vector<80x64xf32> to vector<5x16x64xf32>
    %43 = vector.shape_cast %36 : vector<16x64xf32> to vector<1x16x64xf32>
    %44 = vector.broadcast %43 : vector<1x16x64xf32> to vector<5x16x64xf32>
    %45 = arith.addf %42, %44 : vector<5x16x64xf32>
    %46 = vector.extract_strided_slice %35 {offsets = [0, 0], sizes = [1, 64], strides = [1, 1]} : vector<2x64xf32> to vector<1x64xf32>
    %47 = vector.shape_cast %46 : vector<1x64xf32> to vector<1x1x64xf32>
    %48 = vector.broadcast %47 : vector<1x1x64xf32> to vector<5x16x64xf32>
    %49 = arith.mulf %45, %48 : vector<5x16x64xf32>
    %50 = vector.extract_strided_slice %35 {offsets = [1, 0], sizes = [1, 64], strides = [1, 1]} : vector<2x64xf32> to vector<1x64xf32>
    %51 = vector.shape_cast %50 : vector<1x64xf32> to vector<1x1x64xf32>
    %52 = vector.broadcast %51 : vector<1x1x64xf32> to vector<5x16x64xf32>
    %53 = arith.addf %49, %52 : vector<5x16x64xf32>
    %cst_29 = arith.constant 0.000000e+00 : f32
    %54 = vector.broadcast %cst_29 : f32 to vector<5x16x64xf32>
    %55 = arith.cmpf oge, %53, %54 : vector<5x16x64xf32>
    %cst_30 = arith.constant 2.000000e-01 : f32
    %56 = vector.broadcast %cst_30 : f32 to vector<5x16x64xf32>
    %57 = arith.mulf %56, %53 : vector<5x16x64xf32>
    %58 = arith.select %55, %53, %57 : vector<5x16x64xi1>, vector<5x16x64xf32>
    %cst_31 = arith.constant dense<0xFF800000> : vector<16x64xf32>
    %59 = vector.multi_reduction <maximumf>, %58, %cst_31 [0] : vector<5x16x64xf32> to vector<16x64xf32>
    %60 = arith.truncf %59 : vector<16x64xf32> to vector<16x64xbf16>
    %c0_32 = arith.constant 0 : index
    %c0_33 = arith.constant 0 : index
    %61 = vector.load %arg14[%c0_32, %c0_33] : memref<16x64xbf16, #tpu.memory_space<vmem>>, vector<16x64xbf16>
    tpu.vector_store %arg14[%c0_32, %c0_33], %60 {strides = array<i32>} : memref<16x64xbf16, #tpu.memory_space<vmem>>, vector<16x64xbf16>,
    return
  }
  func.func @transform_0(%arg0: i32) -> (i32, i32) {
    %c0_i32 = arith.constant 0 : i32
    %c0_i32_0 = arith.constant 0 : i32
    return %arg0, %c0_i32 : i32, i32
  }
  func.func @transform_1(%arg0: i32) -> (i32, i32) {
    %c0_i32 = arith.constant 0 : i32
    %c0_i32_0 = arith.constant 0 : i32
    return %arg0, %c0_i32 : i32, i32
  }
  func.func @transform_2(%arg0: i32) -> (i32, i32, i32) {
    %c0_i32 = arith.constant 0 : i32
    %c0_i32_0 = arith.constant 0 : i32
    %c0_i32_1 = arith.constant 0 : i32
    return %c0_i32, %arg0, %c0_i32_0 : i32, i32, i32
  }
  func.func @transform_3(%arg0: i32) -> (i32, i32, i32) {
    %c0_i32 = arith.constant 0 : i32
    %c0_i32_0 = arith.constant 0 : i32
    %c0_i32_1 = arith.constant 0 : i32
    return %c0_i32, %arg0, %c0_i32_0 : i32, i32, i32
  }
  func.func @transform_4(%arg0: i32) -> (i32, i32) {
    %c0_i32 = arith.constant 0 : i32
    %c0_i32_0 = arith.constant 0 : i32
    return %arg0, %c0_i32 : i32, i32
  }
  func.func @transform_5(%arg0: i32) -> (i32, i32) {
    %c0_i32 = arith.constant 0 : i32
    %c0_i32_0 = arith.constant 0 : i32
    return %arg0, %c0_i32 : i32, i32
  }
  func.func @transform_6(%arg0: i32) -> (i32, i32) {
    %c0_i32 = arith.constant 0 : i32
    %c0_i32_0 = arith.constant 0 : i32
    %c0_i32_1 = arith.constant 0 : i32
    return %c0_i32, %c0_i32_0 : i32, i32
  }
  func.func @transform_7(%arg0: i32) -> (i32, i32) {
    %c0_i32 = arith.constant 0 : i32
    %c0_i32_0 = arith.constant 0 : i32
    %c0_i32_1 = arith.constant 0 : i32
    return %c0_i32, %c0_i32_0 : i32, i32
  }
  func.func @transform_8(%arg0: i32) -> (i32, i32) {
    %c0_i32 = arith.constant 0 : i32
    %c0_i32_0 = arith.constant 0 : i32
    %c0_i32_1 = arith.constant 0 : i32
    return %c0_i32, %c0_i32_0 : i32, i32
  }
  func.func @transform_9(%arg0: i32) -> (i32, i32) {
    %c0_i32 = arith.constant 0 : i32
    %c0_i32_0 = arith.constant 0 : i32
    %c0_i32_1 = arith.constant 0 : i32
    return %c0_i32, %c0_i32_0 : i32, i32
  }
  func.func @transform_10(%arg0: i32) -> (i32, i32) {
    %c0_i32 = arith.constant 0 : i32
    %c0_i32_0 = arith.constant 0 : i32
    %c0_i32_1 = arith.constant 0 : i32
    return %c0_i32, %c0_i32_0 : i32, i32
  }
  func.func @transform_11(%arg0: i32) -> (i32, i32) {
    %c0_i32 = arith.constant 0 : i32
    %c0_i32_0 = arith.constant 0 : i32
    %c0_i32_1 = arith.constant 0 : i32
    return %c0_i32, %c0_i32_0 : i32, i32
  }
  func.func @transform_12(%arg0: i32) -> (i32, i32) {
    %c0_i32 = arith.constant 0 : i32
    %c0_i32_0 = arith.constant 0 : i32
    return %arg0, %c0_i32 : i32, i32
  }
  func.func @transform_13(%arg0: i32) -> (i32, i32) {
    %c0_i32 = arith.constant 0 : i32
    %c0_i32_0 = arith.constant 0 : i32
    return %arg0, %c0_i32 : i32, i32
  }
}

module attributes {stable_mosaic.version = 11 : i64} {
  func.func @_tail_kernel(%arg0: i32, %arg1: memref<16x64xbf16, #tpu.memory_space<vmem>>, %arg2: memref<16x64xbf16, #tpu.memory_space<vmem>>, %arg3: memref<16x64xbf16, #tpu.memory_space<vmem>>, %arg4: memref<16x64xbf16, #tpu.memory_space<vmem>>, %arg5: memref<5x16x64xbf16, #tpu.memory_space<vmem>>, %arg6: memref<5x16x64xbf16, #tpu.memory_space<vmem>>, %arg7: memref<16x5xi32, #tpu.memory_space<vmem>>, %arg8: memref<16x5xi32, #tpu.memory_space<vmem>>, %arg9: memref<64x128xbf16, #tpu.memory_space<vmem>>, %arg10: memref<64x128xbf16, #tpu.memory_space<vmem>>, %arg11: memref<2x128xf32, #tpu.memory_space<vmem>>, %arg12: memref<64x128xbf16, #tpu.memory_space<vmem>>, %arg13: memref<64x128xbf16, #tpu.memory_space<vmem>>, %arg14: memref<2x128xf32, #tpu.memory_space<vmem>>, %arg15: memref<256x128xbf16, #tpu.memory_space<vmem>>, %arg16: memref<2x128xf32, #tpu.memory_space<vmem>>, %arg17: memref<256x128xbf16, #tpu.memory_space<vmem>>, %arg18: memref<2x128xf32, #tpu.memory_space<vmem>>, %arg19: memref<256x256xbf16, #tpu.memory_space<vmem>>, %arg20: memref<2x256xf32, #tpu.memory_space<vmem>>, %arg21: memref<16x256xf32, #tpu.memory_space<vmem>>) attributes {dimension_semantics = [#tpu.dimension_semantics<parallel>], iteration_bounds = array<i64: 1>, scalar_prefetch = 0 : i64, scratch_operands = 0 : i64, tpu.core_type = #tpu.core_type<tc>, window_params = [{transform_indices = @transform_0, window_bounds = array<i64: 16, 64>}, {transform_indices = @transform_1, window_bounds = array<i64: 16, 64>}, {transform_indices = @transform_2, window_bounds = array<i64: 16, 64>}, {transform_indices = @transform_3, window_bounds = array<i64: 16, 64>}, {transform_indices = @transform_4, window_bounds = array<i64: 5, 16, 64>}, {transform_indices = @transform_5, window_bounds = array<i64: 5, 16, 64>}, {transform_indices = @transform_6, window_bounds = array<i64: 16, 5>}, {transform_indices = @transform_7, window_bounds = array<i64: 16, 5>}, {pipeline_mode = #tpu.pipeline_mode<synchronous>, transform_indices = @transform_8, window_bounds = array<i64: 64, 128>}, {pipeline_mode = #tpu.pipeline_mode<synchronous>, transform_indices = @transform_9, window_bounds = array<i64: 64, 128>}, {pipeline_mode = #tpu.pipeline_mode<synchronous>, transform_indices = @transform_10, window_bounds = array<i64: 2, 128>}, {pipeline_mode = #tpu.pipeline_mode<synchronous>, transform_indices = @transform_11, window_bounds = array<i64: 64, 128>}, {pipeline_mode = #tpu.pipeline_mode<synchronous>, transform_indices = @transform_12, window_bounds = array<i64: 64, 128>}, {pipeline_mode = #tpu.pipeline_mode<synchronous>, transform_indices = @transform_13, window_bounds = array<i64: 2, 128>}, {pipeline_mode = #tpu.pipeline_mode<synchronous>, transform_indices = @transform_14, window_bounds = array<i64: 256, 128>}, {pipeline_mode = #tpu.pipeline_mode<synchronous>, transform_indices = @transform_15, window_bounds = array<i64: 2, 128>}, {pipeline_mode = #tpu.pipeline_mode<synchronous>, transform_indices = @transform_16, window_bounds = array<i64: 256, 128>}, {pipeline_mode = #tpu.pipeline_mode<synchronous>, transform_indices = @transform_17, window_bounds = array<i64: 2, 128>}, {pipeline_mode = #tpu.pipeline_mode<synchronous>, transform_indices = @transform_18, window_bounds = array<i64: 256, 256>}, {pipeline_mode = #tpu.pipeline_mode<synchronous>, transform_indices = @transform_19, window_bounds = array<i64: 2, 256>}, {transform_indices = @transform_20, window_bounds = array<i64: 16, 256>}]} {
    %c0 = arith.constant 0 : index
    %c0_0 = arith.constant 0 : index
    %0 = vector.load %arg1[%c0, %c0_0] : memref<16x64xbf16, #tpu.memory_space<vmem>>, vector<16x64xbf16>
    %c0_1 = arith.constant 0 : index
    %c0_2 = arith.constant 0 : index
    %1 = vector.load %arg2[%c0_1, %c0_2] : memref<16x64xbf16, #tpu.memory_space<vmem>>, vector<16x64xbf16>
    %c0_3 = arith.constant 0 : index
    %c0_4 = arith.constant 0 : index
    %2 = vector.load %arg3[%c0_3, %c0_4] : memref<16x64xbf16, #tpu.memory_space<vmem>>, vector<16x64xbf16>
    %c0_5 = arith.constant 0 : index
    %c0_6 = arith.constant 0 : index
    %3 = vector.load %arg4[%c0_5, %c0_6] : memref<16x64xbf16, #tpu.memory_space<vmem>>, vector<16x64xbf16>
    %c0_7 = arith.constant 0 : index
    %c0_8 = arith.constant 0 : index
    %c0_9 = arith.constant 0 : index
    %4 = vector.load %arg5[%c0_7, %c0_8, %c0_9] : memref<5x16x64xbf16, #tpu.memory_space<vmem>>, vector<5x16x64xbf16>
    %c0_10 = arith.constant 0 : index
    %c0_11 = arith.constant 0 : index
    %c0_12 = arith.constant 0 : index
    %5 = vector.load %arg6[%c0_10, %c0_11, %c0_12] : memref<5x16x64xbf16, #tpu.memory_space<vmem>>, vector<5x16x64xbf16>
    %c0_13 = arith.constant 0 : index
    %c0_14 = arith.constant 0 : index
    %6 = vector.load %arg9[%c0_13, %c0_14] : memref<64x128xbf16, #tpu.memory_space<vmem>>, vector<64x128xbf16>
    %c0_15 = arith.constant 0 : index
    %c0_16 = arith.constant 0 : index
    %7 = vector.load %arg10[%c0_15, %c0_16] : memref<64x128xbf16, #tpu.memory_space<vmem>>, vector<64x128xbf16>
    %c0_17 = arith.constant 0 : index
    %c0_18 = arith.constant 0 : index
    %8 = vector.load %arg11[%c0_17, %c0_18] : memref<2x128xf32, #tpu.memory_space<vmem>>, vector<2x128xf32>
    %cst = arith.constant dense<0.000000e+00> : vector<16x128xf32>
    %9 = tpu.matmul %1, %7, %cst {dimension_numbers = #tpu.dot_dimension_numbers<[1], [0], [0], [1], [0, 0, 1, 1], [], []>} : vector<16x64xbf16>, vector<64x128xbf16>, vector<16x128xf32> -> vector<16x128xf32>
    %10 = vector.shape_cast %1 : vector<16x64xbf16> to vector<1x16x64xbf16>
    %11 = vector.broadcast %10 : vector<1x16x64xbf16> to vector<5x16x64xbf16>
    %12 = arith.subf %4, %11 : vector<5x16x64xbf16>
    %13 = vector.shape_cast %12 : vector<5x16x64xbf16> to vector<80x64xbf16>
    %cst_19 = arith.constant dense<0.000000e+00> : vector<80x128xf32>
    %14 = tpu.matmul %13, %6, %cst_19 {dimension_numbers = #tpu.dot_dimension_numbers<[1], [0], [0], [1], [0, 0, 1, 1], [], []>} : vector<80x64xbf16>, vector<64x128xbf16>, vector<80x128xf32> -> vector<80x128xf32>
    %15 = vector.shape_cast %14 : vector<80x128xf32> to vector<5x16x128xf32>
    %16 = vector.shape_cast %9 : vector<16x128xf32> to vector<1x16x128xf32>
    %17 = vector.broadcast %16 : vector<1x16x128xf32> to vector<5x16x128xf32>
    %18 = arith.addf %15, %17 : vector<5x16x128xf32>
    %19 = vector.extract_strided_slice %8 {offsets = [0, 0], sizes = [1, 128], strides = [1, 1]} : vector<2x128xf32> to vector<1x128xf32>
    %20 = vector.shape_cast %19 : vector<1x128xf32> to vector<1x1x128xf32>
    %21 = vector.broadcast %20 : vector<1x1x128xf32> to vector<5x16x128xf32>
    %22 = arith.mulf %18, %21 : vector<5x16x128xf32>
    %23 = vector.extract_strided_slice %8 {offsets = [1, 0], sizes = [1, 128], strides = [1, 1]} : vector<2x128xf32> to vector<1x128xf32>
    %24 = vector.shape_cast %23 : vector<1x128xf32> to vector<1x1x128xf32>
    %25 = vector.broadcast %24 : vector<1x1x128xf32> to vector<5x16x128xf32>
    %26 = arith.addf %22, %25 : vector<5x16x128xf32>
    %cst_20 = arith.constant 0.000000e+00 : f32
    %27 = vector.broadcast %cst_20 : f32 to vector<5x16x128xf32>
    %28 = arith.cmpf oge, %26, %27 : vector<5x16x128xf32>
    %cst_21 = arith.constant 2.000000e-01 : f32
    %29 = vector.broadcast %cst_21 : f32 to vector<5x16x128xf32>
    %30 = arith.mulf %29, %26 : vector<5x16x128xf32>
    %31 = arith.select %28, %26, %30 : vector<5x16x128xi1>, vector<5x16x128xf32>
    %cst_22 = arith.constant dense<0xFF800000> : vector<16x128xf32>
    %32 = vector.multi_reduction <maximumf>, %31, %cst_22 [0] : vector<5x16x128xf32> to vector<16x128xf32>
    %c0_23 = arith.constant 0 : index
    %c0_24 = arith.constant 0 : index
    %33 = vector.load %arg12[%c0_23, %c0_24] : memref<64x128xbf16, #tpu.memory_space<vmem>>, vector<64x128xbf16>
    %c0_25 = arith.constant 0 : index
    %c0_26 = arith.constant 0 : index
    %34 = vector.load %arg13[%c0_25, %c0_26] : memref<64x128xbf16, #tpu.memory_space<vmem>>, vector<64x128xbf16>
    %c0_27 = arith.constant 0 : index
    %c0_28 = arith.constant 0 : index
    %35 = vector.load %arg14[%c0_27, %c0_28] : memref<2x128xf32, #tpu.memory_space<vmem>>, vector<2x128xf32>
    %cst_29 = arith.constant dense<0.000000e+00> : vector<16x128xf32>
    %36 = tpu.matmul %3, %34, %cst_29 {dimension_numbers = #tpu.dot_dimension_numbers<[1], [0], [0], [1], [0, 0, 1, 1], [], []>} : vector<16x64xbf16>, vector<64x128xbf16>, vector<16x128xf32> -> vector<16x128xf32>
    %37 = vector.shape_cast %3 : vector<16x64xbf16> to vector<1x16x64xbf16>
    %38 = vector.broadcast %37 : vector<1x16x64xbf16> to vector<5x16x64xbf16>
    %39 = arith.subf %5, %38 : vector<5x16x64xbf16>
    %40 = vector.shape_cast %39 : vector<5x16x64xbf16> to vector<80x64xbf16>
    %cst_30 = arith.constant dense<0.000000e+00> : vector<80x128xf32>
    %41 = tpu.matmul %40, %33, %cst_30 {dimension_numbers = #tpu.dot_dimension_numbers<[1], [0], [0], [1], [0, 0, 1, 1], [], []>} : vector<80x64xbf16>, vector<64x128xbf16>, vector<80x128xf32> -> vector<80x128xf32>
    %42 = vector.shape_cast %41 : vector<80x128xf32> to vector<5x16x128xf32>
    %43 = vector.shape_cast %36 : vector<16x128xf32> to vector<1x16x128xf32>
    %44 = vector.broadcast %43 : vector<1x16x128xf32> to vector<5x16x128xf32>
    %45 = arith.addf %42, %44 : vector<5x16x128xf32>
    %46 = vector.extract_strided_slice %35 {offsets = [0, 0], sizes = [1, 128], strides = [1, 1]} : vector<2x128xf32> to vector<1x128xf32>
    %47 = vector.shape_cast %46 : vector<1x128xf32> to vector<1x1x128xf32>
    %48 = vector.broadcast %47 : vector<1x1x128xf32> to vector<5x16x128xf32>
    %49 = arith.mulf %45, %48 : vector<5x16x128xf32>
    %50 = vector.extract_strided_slice %35 {offsets = [1, 0], sizes = [1, 128], strides = [1, 1]} : vector<2x128xf32> to vector<1x128xf32>
    %51 = vector.shape_cast %50 : vector<1x128xf32> to vector<1x1x128xf32>
    %52 = vector.broadcast %51 : vector<1x1x128xf32> to vector<5x16x128xf32>
    %53 = arith.addf %49, %52 : vector<5x16x128xf32>
    %cst_31 = arith.constant 0.000000e+00 : f32
    %54 = vector.broadcast %cst_31 : f32 to vector<5x16x128xf32>
    %55 = arith.cmpf oge, %53, %54 : vector<5x16x128xf32>
    %cst_32 = arith.constant 2.000000e-01 : f32
    %56 = vector.broadcast %cst_32 : f32 to vector<5x16x128xf32>
    %57 = arith.mulf %56, %53 : vector<5x16x128xf32>
    %58 = arith.select %55, %53, %57 : vector<5x16x128xi1>, vector<5x16x128xf32>
    %cst_33 = arith.constant dense<0xFF800000> : vector<16x128xf32>
    %59 = vector.multi_reduction <maximumf>, %58, %cst_33 [0] : vector<5x16x128xf32> to vector<16x128xf32>
    %c0_34 = arith.constant 0 : index
    %c0_35 = arith.constant 0 : index
    %60 = vector.load %arg15[%c0_34, %c0_35] : memref<256x128xbf16, #tpu.memory_space<vmem>>, vector<256x128xbf16>
    %c0_36 = arith.constant 0 : index
    %c0_37 = arith.constant 0 : index
    %61 = vector.load %arg17[%c0_36, %c0_37] : memref<256x128xbf16, #tpu.memory_space<vmem>>, vector<256x128xbf16>
    %62 = arith.truncf %32 : vector<16x128xf32> to vector<16x128xbf16>
    %63 = vector.extract_strided_slice %60 {offsets = [0, 0], sizes = [64, 128], strides = [1, 1]} : vector<256x128xbf16> to vector<64x128xbf16>
    %64 = vector.extract_strided_slice %60 {offsets = [64, 0], sizes = [64, 128], strides = [1, 1]} : vector<256x128xbf16> to vector<64x128xbf16>
    %65 = vector.extract_strided_slice %60 {offsets = [128, 0], sizes = [128, 128], strides = [1, 1]} : vector<256x128xbf16> to vector<128x128xbf16>
    %c0_38 = arith.constant 0 : index
    %c0_39 = arith.constant 0 : index
    %66 = vector.load %arg16[%c0_38, %c0_39] : memref<2x128xf32, #tpu.memory_space<vmem>>, vector<2x128xf32>
    %cst_40 = arith.constant dense<0.000000e+00> : vector<16x128xf32>
    %67 = tpu.matmul %0, %63, %cst_40 {dimension_numbers = #tpu.dot_dimension_numbers<[1], [0], [0], [1], [0, 0, 1, 1], [], []>} : vector<16x64xbf16>, vector<64x128xbf16>, vector<16x128xf32> -> vector<16x128xf32>
    %cst_41 = arith.constant dense<0.000000e+00> : vector<16x128xf32>
    %68 = tpu.matmul %1, %64, %cst_41 {dimension_numbers = #tpu.dot_dimension_numbers<[1], [0], [0], [1], [0, 0, 1, 1], [], []>} : vector<16x64xbf16>, vector<64x128xbf16>, vector<16x128xf32> -> vector<16x128xf32>
    %69 = arith.addf %67, %68 : vector<16x128xf32>
    %cst_42 = arith.constant dense<0.000000e+00> : vector<16x128xf32>
    %70 = tpu.matmul %62, %65, %cst_42 {dimension_numbers = #tpu.dot_dimension_numbers<[1], [0], [0], [1], [0, 0, 1, 1], [], []>} : vector<16x128xbf16>, vector<128x128xbf16>, vector<16x128xf32> -> vector<16x128xf32>
    %71 = arith.addf %69, %70 : vector<16x128xf32>
    %72 = vector.extract_strided_slice %66 {offsets = [0, 0], sizes = [1, 128], strides = [1, 1]} : vector<2x128xf32> to vector<1x128xf32>
    %73 = vector.broadcast %72 : vector<1x128xf32> to vector<16x128xf32>
    %74 = arith.mulf %71, %73 : vector<16x128xf32>
    %75 = vector.extract_strided_slice %66 {offsets = [1, 0], sizes = [1, 128], strides = [1, 1]} : vector<2x128xf32> to vector<1x128xf32>
    %76 = vector.broadcast %75 : vector<1x128xf32> to vector<16x128xf32>
    %77 = arith.addf %74, %76 : vector<16x128xf32>
    %cst_43 = arith.constant 0.000000e+00 : f32
    %78 = vector.broadcast %cst_43 : f32 to vector<16x128xf32>
    %79 = arith.cmpf oge, %77, %78 : vector<16x128xf32>
    %cst_44 = arith.constant 2.000000e-01 : f32
    %80 = vector.broadcast %cst_44 : f32 to vector<16x128xf32>
    %81 = arith.mulf %80, %77 : vector<16x128xf32>
    %82 = arith.select %79, %77, %81 : vector<16x128xi1>, vector<16x128xf32>
    %83 = arith.truncf %59 : vector<16x128xf32> to vector<16x128xbf16>
    %84 = vector.extract_strided_slice %61 {offsets = [0, 0], sizes = [64, 128], strides = [1, 1]} : vector<256x128xbf16> to vector<64x128xbf16>
    %85 = vector.extract_strided_slice %61 {offsets = [64, 0], sizes = [64, 128], strides = [1, 1]} : vector<256x128xbf16> to vector<64x128xbf16>
    %86 = vector.extract_strided_slice %61 {offsets = [128, 0], sizes = [128, 128], strides = [1, 1]} : vector<256x128xbf16> to vector<128x128xbf16>
    %c0_45 = arith.constant 0 : index
    %c0_46 = arith.constant 0 : index
    %87 = vector.load %arg18[%c0_45, %c0_46] : memref<2x128xf32, #tpu.memory_space<vmem>>, vector<2x128xf32>
    %cst_47 = arith.constant dense<0.000000e+00> : vector<16x128xf32>
    %88 = tpu.matmul %2, %84, %cst_47 {dimension_numbers = #tpu.dot_dimension_numbers<[1], [0], [0], [1], [0, 0, 1, 1], [], []>} : vector<16x64xbf16>, vector<64x128xbf16>, vector<16x128xf32> -> vector<16x128xf32>
    %cst_48 = arith.constant dense<0.000000e+00> : vector<16x128xf32>
    %89 = tpu.matmul %3, %85, %cst_48 {dimension_numbers = #tpu.dot_dimension_numbers<[1], [0], [0], [1], [0, 0, 1, 1], [], []>} : vector<16x64xbf16>, vector<64x128xbf16>, vector<16x128xf32> -> vector<16x128xf32>
    %90 = arith.addf %88, %89 : vector<16x128xf32>
    %cst_49 = arith.constant dense<0.000000e+00> : vector<16x128xf32>
    %91 = tpu.matmul %83, %86, %cst_49 {dimension_numbers = #tpu.dot_dimension_numbers<[1], [0], [0], [1], [0, 0, 1, 1], [], []>} : vector<16x128xbf16>, vector<128x128xbf16>, vector<16x128xf32> -> vector<16x128xf32>
    %92 = arith.addf %90, %91 : vector<16x128xf32>
    %93 = vector.extract_strided_slice %87 {offsets = [0, 0], sizes = [1, 128], strides = [1, 1]} : vector<2x128xf32> to vector<1x128xf32>
    %94 = vector.broadcast %93 : vector<1x128xf32> to vector<16x128xf32>
    %95 = arith.mulf %92, %94 : vector<16x128xf32>
    %96 = vector.extract_strided_slice %87 {offsets = [1, 0], sizes = [1, 128], strides = [1, 1]} : vector<2x128xf32> to vector<1x128xf32>
    %97 = vector.broadcast %96 : vector<1x128xf32> to vector<16x128xf32>
    %98 = arith.addf %95, %97 : vector<16x128xf32>
    %cst_50 = arith.constant 0.000000e+00 : f32
    %99 = vector.broadcast %cst_50 : f32 to vector<16x128xf32>
    %100 = arith.cmpf oge, %98, %99 : vector<16x128xf32>
    %cst_51 = arith.constant 2.000000e-01 : f32
    %101 = vector.broadcast %cst_51 : f32 to vector<16x128xf32>
    %102 = arith.mulf %101, %98 : vector<16x128xf32>
    %103 = arith.select %100, %98, %102 : vector<16x128xi1>, vector<16x128xf32>
    %c0_52 = arith.constant 0 : index
    %c0_53 = arith.constant 0 : index
    %104 = vector.load %arg19[%c0_52, %c0_53] : memref<256x256xbf16, #tpu.memory_space<vmem>>, vector<256x256xbf16>
    %105 = arith.truncf %82 : vector<16x128xf32> to vector<16x128xbf16>
    %106 = arith.truncf %103 : vector<16x128xf32> to vector<16x128xbf16>
    %107 = vector.extract_strided_slice %104 {offsets = [0, 0], sizes = [128, 256], strides = [1, 1]} : vector<256x256xbf16> to vector<128x256xbf16>
    %108 = vector.extract_strided_slice %104 {offsets = [128, 0], sizes = [128, 256], strides = [1, 1]} : vector<256x256xbf16> to vector<128x256xbf16>
    %c0_54 = arith.constant 0 : index
    %c0_55 = arith.constant 0 : index
    %109 = vector.load %arg20[%c0_54, %c0_55] : memref<2x256xf32, #tpu.memory_space<vmem>>, vector<2x256xf32>
    %cst_56 = arith.constant dense<0.000000e+00> : vector<16x256xf32>
    %110 = tpu.matmul %105, %107, %cst_56 {dimension_numbers = #tpu.dot_dimension_numbers<[1], [0], [0], [1], [0, 0, 1, 1], [], []>} : vector<16x128xbf16>, vector<128x256xbf16>, vector<16x256xf32> -> vector<16x256xf32>
    %cst_57 = arith.constant dense<0.000000e+00> : vector<16x256xf32>
    %111 = tpu.matmul %106, %108, %cst_57 {dimension_numbers = #tpu.dot_dimension_numbers<[1], [0], [0], [1], [0, 0, 1, 1], [], []>} : vector<16x128xbf16>, vector<128x256xbf16>, vector<16x256xf32> -> vector<16x256xf32>
    %112 = arith.addf %110, %111 : vector<16x256xf32>
    %113 = vector.extract_strided_slice %109 {offsets = [0, 0], sizes = [1, 256], strides = [1, 1]} : vector<2x256xf32> to vector<1x256xf32>
    %114 = vector.broadcast %113 : vector<1x256xf32> to vector<16x256xf32>
    %115 = arith.mulf %112, %114 : vector<16x256xf32>
    %116 = vector.extract_strided_slice %109 {offsets = [1, 0], sizes = [1, 256], strides = [1, 1]} : vector<2x256xf32> to vector<1x256xf32>
    %117 = vector.broadcast %116 : vector<1x256xf32> to vector<16x256xf32>
    %118 = arith.addf %115, %117 : vector<16x256xf32>
    %cst_58 = arith.constant 0.000000e+00 : f32
    %119 = vector.broadcast %cst_58 : f32 to vector<16x256xf32>
    %120 = arith.cmpf oge, %118, %119 : vector<16x256xf32>
    %cst_59 = arith.constant 2.000000e-01 : f32
    %121 = vector.broadcast %cst_59 : f32 to vector<16x256xf32>
    %122 = arith.mulf %121, %118 : vector<16x256xf32>
    %123 = arith.select %120, %118, %122 : vector<16x256xi1>, vector<16x256xf32>
    %c0_60 = arith.constant 0 : index
    %c0_61 = arith.constant 0 : index
    %124 = vector.load %arg21[%c0_60, %c0_61] : memref<16x256xf32, #tpu.memory_space<vmem>>, vector<16x256xf32>
    tpu.vector_store %arg21[%c0_60, %c0_61], %123 {strides = array<i32>} : memref<16x256xf32, #tpu.memory_space<vmem>>, vector<16x256xf32>,
    return
  }
  func.func @transform_0(%arg0: i32) -> (i32, i32) {
    %c0_i32 = arith.constant 0 : i32
    %c0_i32_0 = arith.constant 0 : i32
    return %arg0, %c0_i32 : i32, i32
  }
  func.func @transform_1(%arg0: i32) -> (i32, i32) {
    %c0_i32 = arith.constant 0 : i32
    %c0_i32_0 = arith.constant 0 : i32
    return %arg0, %c0_i32 : i32, i32
  }
  func.func @transform_2(%arg0: i32) -> (i32, i32) {
    %c0_i32 = arith.constant 0 : i32
    %c0_i32_0 = arith.constant 0 : i32
    return %arg0, %c0_i32 : i32, i32
  }
  func.func @transform_3(%arg0: i32) -> (i32, i32) {
    %c0_i32 = arith.constant 0 : i32
    %c0_i32_0 = arith.constant 0 : i32
    return %arg0, %c0_i32 : i32, i32
  }
  func.func @transform_4(%arg0: i32) -> (i32, i32, i32) {
    %c0_i32 = arith.constant 0 : i32
    %c0_i32_0 = arith.constant 0 : i32
    %c0_i32_1 = arith.constant 0 : i32
    return %c0_i32, %arg0, %c0_i32_0 : i32, i32, i32
  }
  func.func @transform_5(%arg0: i32) -> (i32, i32, i32) {
    %c0_i32 = arith.constant 0 : i32
    %c0_i32_0 = arith.constant 0 : i32
    %c0_i32_1 = arith.constant 0 : i32
    return %c0_i32, %arg0, %c0_i32_0 : i32, i32, i32
  }
  func.func @transform_6(%arg0: i32) -> (i32, i32) {
    %c0_i32 = arith.constant 0 : i32
    %c0_i32_0 = arith.constant 0 : i32
    return %arg0, %c0_i32 : i32, i32
  }
  func.func @transform_7(%arg0: i32) -> (i32, i32) {
    %c0_i32 = arith.constant 0 : i32
    %c0_i32_0 = arith.constant 0 : i32
    return %arg0, %c0_i32 : i32, i32
  }
  func.func @transform_8(%arg0: i32) -> (i32, i32) {
    %c0_i32 = arith.constant 0 : i32
    %c0_i32_0 = arith.constant 0 : i32
    %c0_i32_1 = arith.constant 0 : i32
    return %c0_i32, %c0_i32_0 : i32, i32
  }
  func.func @transform_9(%arg0: i32) -> (i32, i32) {
    %c0_i32 = arith.constant 0 : i32
    %c0_i32_0 = arith.constant 0 : i32
    %c0_i32_1 = arith.constant 0 : i32
    return %c0_i32, %c0_i32_0 : i32, i32
  }
  func.func @transform_10(%arg0: i32) -> (i32, i32) {
    %c0_i32 = arith.constant 0 : i32
    %c0_i32_0 = arith.constant 0 : i32
    %c0_i32_1 = arith.constant 0 : i32
    return %c0_i32, %c0_i32_0 : i32, i32
  }
  func.func @transform_11(%arg0: i32) -> (i32, i32) {
    %c0_i32 = arith.constant 0 : i32
    %c0_i32_0 = arith.constant 0 : i32
    %c0_i32_1 = arith.constant 0 : i32
    return %c0_i32, %c0_i32_0 : i32, i32
  }
  func.func @transform_12(%arg0: i32) -> (i32, i32) {
    %c0_i32 = arith.constant 0 : i32
    %c0_i32_0 = arith.constant 0 : i32
    %c0_i32_1 = arith.constant 0 : i32
    return %c0_i32, %c0_i32_0 : i32, i32
  }
  func.func @transform_13(%arg0: i32) -> (i32, i32) {
    %c0_i32 = arith.constant 0 : i32
    %c0_i32_0 = arith.constant 0 : i32
    %c0_i32_1 = arith.constant 0 : i32
    return %c0_i32, %c0_i32_0 : i32, i32
  }
  func.func @transform_14(%arg0: i32) -> (i32, i32) {
    %c0_i32 = arith.constant 0 : i32
    %c0_i32_0 = arith.constant 0 : i32
    %c0_i32_1 = arith.constant 0 : i32
    return %c0_i32, %c0_i32_0 : i32, i32
  }
  func.func @transform_15(%arg0: i32) -> (i32, i32) {
    %c0_i32 = arith.constant 0 : i32
    %c0_i32_0 = arith.constant 0 : i32
    %c0_i32_1 = arith.constant 0 : i32
    return %c0_i32, %c0_i32_0 : i32, i32
  }
  func.func @transform_16(%arg0: i32) -> (i32, i32) {
    %c0_i32 = arith.constant 0 : i32
    %c0_i32_0 = arith.constant 0 : i32
    %c0_i32_1 = arith.constant 0 : i32
    return %c0_i32, %c0_i32_0 : i32, i32
  }
  func.func @transform_17(%arg0: i32) -> (i32, i32) {
    %c0_i32 = arith.constant 0 : i32
    %c0_i32_0 = arith.constant 0 : i32
    %c0_i32_1 = arith.constant 0 : i32
    return %c0_i32, %c0_i32_0 : i32, i32
  }
  func.func @transform_18(%arg0: i32) -> (i32, i32) {
    %c0_i32 = arith.constant 0 : i32
    %c0_i32_0 = arith.constant 0 : i32
    %c0_i32_1 = arith.constant 0 : i32
    return %c0_i32, %c0_i32_0 : i32, i32
  }
  func.func @transform_19(%arg0: i32) -> (i32, i32) {
    %c0_i32 = arith.constant 0 : i32
    %c0_i32_0 = arith.constant 0 : i32
    %c0_i32_1 = arith.constant 0 : i32
    return %c0_i32, %c0_i32_0 : i32, i32
  }
  func.func @transform_20(%arg0: i32) -> (i32, i32) {
    %c0_i32 = arith.constant 0 : i32
    %c0_i32_0 = arith.constant 0 : i32
    return %arg0, %c0_i32 : i32, i32
  }
}

</mosaic_0001>

<bundles_post_ra>
// kernel: _sgnet_forward.8
= control target key start
LH: loop header
LB: loop body
LE: loop exit
PB: predicated region body
PF: predicated region fallthrough
CT: control target
= control target key end

     0   :  { %vm24_vm0 = vcmask 1042432   ;;  %vm17_vm1 = vcmask 23552   ;;  %vm116_vm2 = vcmask 130048   ;;  %v114_v12 = vlaneseq  ;;  %s475_s1 = inlined_call_operand.vmem [shape: f32[3,16], index: 1, kind: input, shape index: {}]   ;;  %s476_s0 = inlined_call_operand.vmem [shape: f32[16,3], index: 0, kind: input, shape index: {}]   ;;  %s477_s2 = inlined_call_operand.vmem [shape: f32[1,16], index: 2, kind: input, shape index: {}]   ;;  %s478_s3 = inlined_call_operand.vmem [shape: s32[16,5], index: 3, kind: output, shape index: {}]  }
   0x1   :  { %v16_v0 = vld [vmem:[%s475_s1] sm:$0x7]  ;;  %v15_v2 = vld [vmem:[%s476_s0 + $0x8] sm:$0xff] }
   0x2   :  { %v14_v1 = vld [vmem:[%s476_s0] sm:$0xff]  ;;  %378 = vmatprep.subr.msk.mxu0 %vm24_vm0, %v16_v0  ;;  %v419_v13 = vand.u32 127, %v114_v12 }
   0x3   :  { %380 = vmatprep.mubr.msk.f32.mxu0 %vm17_vm1, %v14_v1  ;;  %379 = vmatpush3.msk.msra.mxu0 %vm24_vm0, %v16_v0  ;;  %v374_v7 = vld [vmem:[%s477_s2] ss:$0 sm:$0xff] }
   0x4   :  { %381 = vmatmul.mubr.msk.f32.vlgmr.msra.gmra.mxu0 %vm17_vm1, %v15_v2 }
  0xc4   :  { %v382_v3 = vpop.f32.mrf.mxu0 }
  0xc5   :  { %v104_v5 = vmul.f32 2.0, %v382_v3 }
  0xc6   :  { %v94_v4 = vpop.f32.mrf.mxu0 }
  0xc7   :  { %v103_v6 = vmul.f32 2.0, %v94_v4  ;;  %v113_v9 = vsub.f32 %v104_v5, %v374_v7 }
  0xc9   :  { %v112_v8 = vsub.f32 %v103_v6, %v374_v7  ;;  %v120_v11 = vsel %vm116_vm2, %v113_v9, -inf }
  0xcb   :  { %v117_v10 = vsel %vm116_vm2, %v112_v8, -inf }
  0xcc   :  { %118 = vmax.xlane.f32.xlu0 %v117_v10 }
  0xd0   :  { %121 = vmax.xlane.f32.xlu0 %v120_v11 }
 0x155   :  { %v119_v14 = vpop.xlane.xlu0 %118 }
 0x156   :  { %vm123_vm3 = vcmp.eq.f32.partialorder %v112_v8, %v119_v14 }
 0x157   :  { %v125_v15 = vsel %vm123_vm3, %v419_v13, 16 }
 0x158   :  { %v127_v16 = vsel %vm116_vm2, %v125_v15, 2147483647 }
 0x159   :  { %v122_v17 = vpop.xlane.xlu0 %121  ;;  %v129_v18 = vshra.s32 %v127_v16, 16  ;;  %v128_v24 = vand.u32 65535, %v127_v16 }
 0x15a   :  { %vm124_vm4 = vcmp.eq.f32.partialorder %v113_v9, %v122_v17 }
 0x15b   :  { %v126_v19 = vsel %vm124_vm4, %v419_v13, 16  ;;  %v131_v20 = vcvt.s32.f32 %v129_v18  ;;  %v130_v26 = vcvt.s32.f32 %v128_v24 }
 0x15c   :  { %v142_v21 = vsel %vm116_vm2, %v126_v19, 2147483647 }
 0x15d   :  { %132 = vmin.xlane.f32.xlu1 %v131_v20  ;;  %v144_v22 = vshra.s32 %v142_v21, 16  ;;  %v143_v27 = vand.u32 65535, %v142_v21 }
 0x15f   :  { %v146_v23 = vcvt.s32.f32 %v144_v22  ;;  %v145_v30 = vcvt.s32.f32 %v143_v27 }
 0x161   :  { %147 = vmin.xlane.f32.xlu1 %v146_v23 }
 0x1e6   :  { %v133_v25 = vpop.xlane.xlu1 %132 }
 0x1e7   :  { %vm134_vm5 = vcmp.eq.f32.partialorder %v131_v20, %v133_v25  ;;  %v139_v32 = vcvt.f32.s32 %v133_v25 }
 0x1e8   :  { %v135_v28 = vsel %vm134_vm5, %v130_v26, inf }
 0x1e9   :  { %136 = vmin.xlane.f32.xlu0 %v135_v28  ;;  %v140_v34 = vshll.u32 %v139_v32, 16 }
 0x1ea   :  { %v148_v29 = vpop.xlane.xlu1 %147 }
 0x1eb   :  { %vm149_vm6 = vcmp.eq.f32.partialorder %v146_v23, %v148_v29  ;;  %v154_v35 = vcvt.f32.s32 %v148_v29 }
 0x1ec   :  { %v150_v31 = vsel %vm149_vm6, %v145_v30, inf }
 0x1ed   :  { %151 = vmin.xlane.f32.xlu1 %v150_v31  ;;  %v155_v39 = vshll.u32 %v154_v35, 16 }
 0x272   :  { %v137_v33 = vpop.xlane.xlu0 %136 }
 0x273   :  { %v138_v36 = vcvt.f32.s32 %v137_v33 }
 0x275   :  { %v141_v37 = vadd.s32 %v140_v34, %v138_v36 }
 0x276   :  { %v152_v38 = vpop.xlane.xlu1 %151 }
 0x277   :  { %vm157_vm7 = vcmp.lt.s32.totalorder %v141_v37, 15  ;;  %v153_v40 = vcvt.f32.s32 %v152_v38 }
 0x278   :  { %v425_v41 = vsel %vm157_vm7, %v141_v37, 15 }
 0x279   :  { %v156_v42 = vadd.s32 %v155_v39, %v153_v40  ;;  %vm161_vm8 = vcmp.eq.s32.totalorder %v419_v13, %v425_v41 }
 0x27a   :  { %v163_v43 = vsel %vm161_vm8, -inf, %v112_v8 }
 0x27b   :  { %vm159_vm9 = vcmp.lt.s32.totalorder %v156_v42, 15  ;;  %v165_v44 = vsel %vm116_vm2, %v163_v43, -inf }
 0x27c   :  { %v430_v45 = vsel %vm159_vm9, %v156_v42, 15  ;;  %166 = vmax.xlane.f32.xlu0 %v165_v44  ;;  %vm353_vm9 = vcmask 7168  }
 0x27d   :  { %vm162_vm10 = vcmp.eq.s32.totalorder %v419_v13, %v430_v45 }
 0x27e   :  { %v164_v46 = vsel %vm162_vm10, -inf, %v113_v9  ;;  %vm356_vm10 = vcmask 15360  }
 0x27f   :  { %v168_v47 = vsel %vm116_vm2, %v164_v46, -inf }
 0x280   :  { %169 = vmax.xlane.f32.xlu1 %v168_v47 }
 0x305   :  { %v167_v48 = vpop.xlane.xlu0 %166 }
 0x306   :  { %vm171_vm11 = vcmp.eq.f32.partialorder %v163_v43, %v167_v48 }
 0x307   :  { %v173_v49 = vsel %vm171_vm11, %v419_v13, 16 }
 0x308   :  { %v175_v50 = vsel %vm116_vm2, %v173_v49, 2147483647 }
 0x309   :  { %v170_v51 = vpop.xlane.xlu1 %169  ;;  %v177_v52 = vshra.s32 %v175_v50, 16  ;;  %v176_v58 = vand.u32 65535, %v175_v50 }
 0x30a   :  { %vm172_vm12 = vcmp.eq.f32.partialorder %v164_v46, %v170_v51 }
 0x30b   :  { %v174_v53 = vsel %vm172_vm12, %v419_v13, 16  ;;  %v179_v54 = vcvt.s32.f32 %v177_v52  ;;  %v178_v60 = vcvt.s32.f32 %v176_v58 }
 0x30c   :  { %v190_v55 = vsel %vm116_vm2, %v174_v53, 2147483647 }
 0x30d   :  { %180 = vmin.xlane.f32.xlu0 %v179_v54  ;;  %v192_v56 = vshra.s32 %v190_v55, 16  ;;  %v191_v61 = vand.u32 65535, %v190_v55 }
 0x30f   :  { %v194_v57 = vcvt.s32.f32 %v192_v56  ;;  %v193_v0 = vcvt.s32.f32 %v191_v61 }
 0x311   :  { %195 = vmin.xlane.f32.xlu1 %v194_v57 }
 0x396   :  { %v181_v59 = vpop.xlane.xlu0 %180 }
 0x397   :  { %vm182_vm13 = vcmp.eq.f32.partialorder %v179_v54, %v181_v59  ;;  %v187_v2 = vcvt.f32.s32 %v181_v59 }
 0x398   :  { %v183_v62 = vsel %vm182_vm13, %v178_v60, inf }
 0x399   :  { %184 = vmin.xlane.f32.xlu0 %v183_v62  ;;  %v188_v4 = vshll.u32 %v187_v2, 16 }
 0x39a   :  { %v196_v63 = vpop.xlane.xlu1 %195 }
 0x39b   :  { %vm197_vm14 = vcmp.eq.f32.partialorder %v194_v57, %v196_v63  ;;  %v202_v5 = vcvt.f32.s32 %v196_v63 }
 0x39c   :  { %v198_v1 = vsel %vm197_vm14, %v193_v0, inf }
 0x39d   :  { %199 = vmin.xlane.f32.xlu1 %v198_v1  ;;  %v203_v9 = vshll.u32 %v202_v5, 16 }
 0x422   :  { %v185_v3 = vpop.xlane.xlu0 %184 }
 0x423   :  { %v186_v6 = vcvt.f32.s32 %v185_v3 }
 0x425   :  { %v189_v7 = vadd.s32 %v188_v4, %v186_v6 }
 0x426   :  { %v200_v8 = vpop.xlane.xlu1 %199 }
 0x427   :  { %vm205_vm15 = vcmp.lt.s32.totalorder %v189_v7, 15  ;;  %v201_v10 = vcvt.f32.s32 %v200_v8 }
 0x428   :  { %v206_v11 = vsel %vm205_vm15, %v189_v7, 15 }
 0x429   :  { %v204_v12 = vadd.s32 %v203_v9, %v201_v10  ;;  %vm209_vm0 = vcmp.eq.s32.totalorder %v419_v13, %v206_v11  ;;  %v354_v48 = vsel %vm353_vm9, %v425_v41, %v206_v11 }
 0x42a   :  { %v211_v14 = vsel %vm209_vm0, -inf, %v163_v43 }
 0x42b   :  { %vm207_vm3 = vcmp.lt.s32.totalorder %v204_v12, 15  ;;  %v213_v15 = vsel %vm116_vm2, %v211_v14, -inf }
 0x42c   :  { %v208_v16 = vsel %vm207_vm3, %v204_v12, 15  ;;  %214 = vmax.xlane.f32.xlu0 %v213_v15 }
 0x42d   :  { %vm210_vm4 = vcmp.eq.s32.totalorder %v419_v13, %v208_v16  ;;  %v355_v54 = vsel %vm353_vm9, %v430_v45, %v208_v16 }
 0x42e   :  { %v212_v17 = vsel %vm210_vm4, -inf, %v164_v46 }
 0x42f   :  { %v216_v18 = vsel %vm116_vm2, %v212_v17, -inf }
 0x430   :  { %217 = vmax.xlane.f32.xlu1 %v216_v18 }
 0x4b5   :  { %v215_v19 = vpop.xlane.xlu0 %214 }
 0x4b6   :  { %vm219_vm5 = vcmp.eq.f32.partialorder %v211_v14, %v215_v19 }
 0x4b7   :  { %v221_v20 = vsel %vm219_vm5, %v419_v13, 16 }
 0x4b8   :  { %v223_v21 = vsel %vm116_vm2, %v221_v20, 2147483647 }
 0x4b9   :  { %v218_v22 = vpop.xlane.xlu1 %217  ;;  %v225_v23 = vshra.s32 %v223_v21, 16  ;;  %v224_v29 = vand.u32 65535, %v223_v21 }
 0x4ba   :  { %vm220_vm6 = vcmp.eq.f32.partialorder %v212_v17, %v218_v22 }
 0x4bb   :  { %v222_v24 = vsel %vm220_vm6, %v419_v13, 16  ;;  %v227_v25 = vcvt.s32.f32 %v225_v23  ;;  %v226_v31 = vcvt.s32.f32 %v224_v29 }
 0x4bc   :  { %v238_v26 = vsel %vm116_vm2, %v222_v24, 2147483647 }
 0x4bd   :  { %228 = vmin.xlane.f32.xlu0 %v227_v25  ;;  %v240_v27 = vshra.s32 %v238_v26, 16  ;;  %v239_v32 = vand.u32 65535, %v238_v26 }
 0x4bf   :  { %v242_v28 = vcvt.s32.f32 %v240_v27  ;;  %v241_v35 = vcvt.s32.f32 %v239_v32 }
 0x4c1   :  { %243 = vmin.xlane.f32.xlu1 %v242_v28 }
 0x546   :  { %v229_v30 = vpop.xlane.xlu0 %228 }
 0x547   :  { %vm230_vm7 = vcmp.eq.f32.partialorder %v227_v25, %v229_v30  ;;  %v235_v37 = vcvt.f32.s32 %v229_v30 }
 0x548   :  { %v231_v33 = vsel %vm230_vm7, %v226_v31, inf }
 0x549   :  { %232 = vmin.xlane.f32.xlu0 %v231_v33  ;;  %v236_v39 = vshll.u32 %v235_v37, 16 }
 0x54a   :  { %v244_v34 = vpop.xlane.xlu1 %243 }
 0x54b   :  { %vm245_vm8 = vcmp.eq.f32.partialorder %v242_v28, %v244_v34  ;;  %v250_v40 = vcvt.f32.s32 %v244_v34 }
 0x54c   :  { %v246_v36 = vsel %vm245_vm8, %v241_v35, inf }
 0x54d   :  { %247 = vmin.xlane.f32.xlu1 %v246_v36  ;;  %v251_v46 = vshll.u32 %v250_v40, 16 }
 0x5d2   :  { %v233_v38 = vpop.xlane.xlu0 %232 }
 0x5d3   :  { %v234_v42 = vcvt.f32.s32 %v233_v38 }
 0x5d5   :  { %v237_v43 = vadd.s32 %v236_v39, %v234_v42 }
 0x5d6   :  { %v248_v44 = vpop.xlane.xlu1 %247 }
 0x5d7   :  { %vm253_vm11 = vcmp.lt.s32.totalorder %v237_v43, 15  ;;  %v249_v47 = vcvt.f32.s32 %v248_v44 }
 0x5d8   :  { %v254_v49 = vsel %vm253_vm11, %v237_v43, 15 }
 0x5d9   :  { %v357_v50 = vsel %vm356_vm10, %v354_v48, %v254_v49  ;;  %v252_v51 = vadd.s32 %v251_v46, %v249_v47  ;;  %vm257_vm12 = vcmp.eq.s32.totalorder %v419_v13, %v254_v49 }
 0x5da   :  { %v259_v52 = vsel %vm257_vm12, -inf, %v211_v14  ;;  %vm364_vm12 = vcmask 39936  }
 0x5db   :  { %vm255_vm13 = vcmp.lt.s32.totalorder %v252_v51, 15  ;;  %v261_v53 = vsel %vm116_vm2, %v259_v52, -inf }
 0x5dc   :  { %v256_v55 = vsel %vm255_vm13, %v252_v51, 15  ;;  %262 = vmax.xlane.f32.xlu0 %v261_v53 }
 0x5dd   :  { %v358_v56 = vsel %vm356_vm10, %v355_v54, %v256_v55  ;;  %vm258_vm14 = vcmp.eq.s32.totalorder %v419_v13, %v256_v55 }
 0x5de   :  { %v260_v57 = vsel %vm258_vm14, -inf, %v212_v17 }
 0x5df   :  { %v264_v41 = vsel %vm116_vm2, %v260_v57, -inf }
 0x5e0   :  { %265 = vmax.xlane.f32.xlu1 %v264_v41 }
 0x665   :  { %v263_v58 = vpop.xlane.xlu0 %262 }
 0x666   :  { %vm267_vm15 = vcmp.eq.f32.partialorder %v259_v52, %v263_v58 }
 0x667   :  { %v269_v59 = vsel %vm267_vm15, %v419_v13, 16 }
 0x668   :  { %v271_v60 = vsel %vm116_vm2, %v269_v59, 2147483647 }
 0x669   :  { %v266_v61 = vpop.xlane.xlu1 %265  ;;  %v273_v62 = vshra.s32 %v271_v60, 16  ;;  %v272_v3 = vand.u32 65535, %v271_v60 }
 0x66a   :  { %vm268_vm0 = vcmp.eq.f32.partialorder %v260_v57, %v266_v61 }
 0x66b   :  { %v270_v45 = vsel %vm268_vm0, %v419_v13, 16  ;;  %v275_v63 = vcvt.s32.f32 %v273_v62  ;;  %v274_v5 = vcvt.s32.f32 %v272_v3 }
 0x66c   :  { %v286_v0 = vsel %vm116_vm2, %v270_v45, 2147483647 }
 0x66d   :  { %276 = vmin.xlane.f32.xlu0 %v275_v63  ;;  %v288_v1 = vshra.s32 %v286_v0, 16  ;;  %v287_v6 = vand.u32 65535, %v286_v0 }
 0x66f   :  { %v290_v2 = vcvt.s32.f32 %v288_v1  ;;  %v289_v9 = vcvt.s32.f32 %v287_v6 }
 0x671   :  { %291 = vmin.xlane.f32.xlu1 %v290_v2 }
 0x6f6   :  { %v277_v4 = vpop.xlane.xlu0 %276 }
 0x6f7   :  { %vm278_vm3 = vcmp.eq.f32.partialorder %v275_v63, %v277_v4  ;;  %v283_v11 = vcvt.f32.s32 %v277_v4 }
 0x6f8   :  { %v279_v7 = vsel %vm278_vm3, %v274_v5, inf }
 0x6f9   :  { %280 = vmin.xlane.f32.xlu0 %v279_v7  ;;  %v284_v14 = vshll.u32 %v283_v11, 16 }
 0x6fa   :  { %v292_v8 = vpop.xlane.xlu1 %291 }
 0x6fb   :  { %vm293_vm4 = vcmp.eq.f32.partialorder %v290_v2, %v292_v8  ;;  %v298_v15 = vcvt.f32.s32 %v292_v8 }
 0x6fc   :  { %v294_v10 = vsel %vm293_vm4, %v289_v9, inf }
 0x6fd   :  { %295 = vmin.xlane.f32.xlu1 %v294_v10  ;;  %v299_v19 = vshll.u32 %v298_v15, 16 }
 0x782   :  { %v281_v12 = vpop.xlane.xlu0 %280 }
 0x783   :  { %v282_v16 = vcvt.f32.s32 %v281_v12 }
 0x785   :  { %v285_v17 = vadd.s32 %v284_v14, %v282_v16 }
 0x786   :  { %v296_v18 = vpop.xlane.xlu1 %295 }
 0x787   :  { %v297_v20 = vcvt.f32.s32 %v296_v18  ;;  %vm301_vm5 = vcmp.lt.s32.totalorder %v285_v17, 15 }
 0x788   :  { %v302_v21 = vsel %vm301_vm5, %v285_v17, 15 }
 0x789   :  { %v300_v22 = vadd.s32 %v299_v19, %v297_v20  ;;  %vm305_vm6 = vcmp.eq.s32.totalorder %v419_v13, %v302_v21  ;;  %v359_v23 = vsel %vm17_vm1, %v357_v50, %v302_v21 }
 0x78a   :  { %v307_v24 = vsel %vm305_vm6, -inf, %v259_v52 }
 0x78b   :  { %v309_v25 = vsel %vm116_vm2, %v307_v24, -inf  ;;  %vm303_vm7 = vcmp.lt.s32.totalorder %v300_v22, 15 }
 0x78c   :  { %310 = vmax.xlane.f32.xlu0 %v309_v25  ;;  %v304_v26 = vsel %vm303_vm7, %v300_v22, 15 }
 0x78d   :  { %vm306_vm8 = vcmp.eq.s32.totalorder %v419_v13, %v304_v26  ;;  %v360_v27 = vsel %vm17_vm1, %v358_v56, %v304_v26 }
 0x78e   :  { %v308_v28 = vsel %vm306_vm8, -inf, %v260_v57 }
 0x78f   :  { %v312_v29 = vsel %vm116_vm2, %v308_v28, -inf }
 0x790   :  { %313 = vmax.xlane.f32.xlu1 %v312_v29 }
 0x815   :  { %v311_v30 = vpop.xlane.xlu0 %310 }
 0x816   :  { %vm315_vm9 = vcmp.eq.f32.partialorder %v307_v24, %v311_v30 }
 0x817   :  { %v317_v31 = vsel %vm315_vm9, %v419_v13, 16 }
 0x818   :  { %v319_v32 = vsel %vm116_vm2, %v317_v31, 2147483647 }
 0x819   :  { %v314_v33 = vpop.xlane.xlu1 %313  ;;  %v321_v34 = vshra.s32 %v319_v32, 16  ;;  %v320_v40 = vand.u32 65535, %v319_v32 }
 0x81a   :  { %vm316_vm10 = vcmp.eq.f32.partialorder %v308_v28, %v314_v33 }
 0x81b   :  { %v318_v35 = vsel %vm316_vm10, %v419_v13, 16  ;;  %v323_v36 = vcvt.s32.f32 %v321_v34  ;;  %v322_v43 = vcvt.s32.f32 %v320_v40 }
 0x81c   :  { %v334_v37 = vsel %vm116_vm2, %v318_v35, 2147483647  ;;  %vm361_vm2 = vcmask 31744  }
 0x81d   :  { %324 = vmin.xlane.f32.xlu0 %v323_v36  ;;  %v336_v38 = vshra.s32 %v334_v37, 16  ;;  %v335_v44 = vand.u32 65535, %v334_v37 }
 0x81f   :  { %v338_v39 = vcvt.s32.f32 %v336_v38  ;;  %v337_v48 = vcvt.s32.f32 %v335_v44 }
 0x821   :  { %339 = vmin.xlane.f32.xlu1 %v338_v39 }
 0x8a6   :  { %v325_v42 = vpop.xlane.xlu0 %324 }
 0x8a7   :  { %vm326_vm1 = vcmp.eq.f32.partialorder %v323_v36, %v325_v42  ;;  %v331_v13 = vcvt.f32.s32 %v325_v42 }
 0x8a8   :  { %v327_v46 = vsel %vm326_vm1, %v322_v43, inf }
 0x8a9   :  { %328 = vmin.xlane.f32.xlu0 %v327_v46  ;;  %v332_v51 = vshll.u32 %v331_v13, 16 }
 0x8aa   :  { %v340_v47 = vpop.xlane.xlu1 %339 }
 0x8ab   :  { %vm341_vm11 = vcmp.eq.f32.partialorder %v338_v39, %v340_v47  ;;  %v346_v52 = vcvt.f32.s32 %v340_v47 }
 0x8ac   :  { %v342_v49 = vsel %vm341_vm11, %v337_v48, inf }
 0x8ad   :  { %343 = vmin.xlane.f32.xlu1 %v342_v49  ;;  %v347_v56 = vshll.u32 %v346_v52, 16 }
 0x932   :  { %v329_v50 = vpop.xlane.xlu0 %328 }
 0x933   :  { %v330_v53 = vcvt.f32.s32 %v329_v50 }
 0x935   :  { %v333_v54 = vadd.s32 %v332_v51, %v330_v53 }
 0x936   :  { %v344_v55 = vpop.xlane.xlu1 %343 }
 0x937   :  { %vm349_vm13 = vcmp.lt.s32.totalorder %v333_v54, 15  ;;  %v345_v57 = vcvt.f32.s32 %v344_v55 }
 0x938   :  { %v350_v41 = vsel %vm349_vm13, %v333_v54, 15 }
 0x939   :  { %v362_v58 = vsel %vm361_vm2, %v359_v23, %v350_v41  ;;  %v348_v59 = vadd.s32 %v347_v56, %v345_v57 }
 0x93a   :  { %365 = vst.msk [vmem:[%s478_s3] sm:$0xff] %vm364_vm12, %v362_v58 }
 0x93b   :  { %vm351_vm14 = vcmp.lt.s32.totalorder %v348_v59, 15 }
 0x93c   :  { %v352_v60 = vsel %vm351_vm14, %v348_v59, 15 }
 0x93d   :  { %v363_v61 = vsel %vm361_vm2, %v360_v27, %v352_v60 }
 0x93e   :  { %366 = vst.msk [vmem:[%s478_s3 + $0x8] sm:$0xff] %vm364_vm12, %v363_v61 }

// kernel: _sgnet_forward.10
= control target key start
LH: loop header
LB: loop body
LE: loop exit
PB: predicated region body
PF: predicated region fallthrough
CT: control target
= control target key end

     0   :  { %v399_v0 = vmov 0.0   ;;  %vm400_vm0 = vmmov 0   ;;  %vm54_vm1 = vcmask 523264   ;;  %vm112_vm2 = vcmask 130048   ;;  %s495_s1 = inlined_call_operand.vmem [shape: bf16[64,16], index: 1, kind: input, shape index: {}]   ;;  %s496_s0 = inlined_call_operand.vmem [shape: bf16[16,64], index: 0, kind: input, shape index: {}]   ;;  %s497_s2 = inlined_call_operand.vmem [shape: f32[1,16], index: 2, kind: input, shape index: {}]   ;;  %s498_s3 = inlined_call_operand.vmem [shape: s32[16,5], index: 3, kind: output, shape index: {}]  }
   0x1   :  { %380 = vmatprep.subr.bf16.mxu0 %v399_v0  ;;  %v394_v1 = vld [vmem:[%s495_s1 + $0x18] sm:$0xff]   ;;  %388 = vmatprep.mubr.msk.bf16.mxu0 %vm400_vm0, %v399_v0  ;;  %v395_v2 = vld [vmem:[%s495_s1 + $0x10] sm:$0xff]   ;;  %v396_v3 = vld [vmem:[%s495_s1 + $0x8] sm:$0xff]   ;;  %v110_v17 = vlaneseq }
   0x2   :  { %381 = vmatpush3.bf16.msra.mxu0 %v394_v1  ;;  %v397_v4 = vld [vmem:[%s495_s1] sm:$0xff]  }
   0x3   :  { %382 = vmatprep.subr.bf16.mxu0 %v399_v0  ;;  %v398_v5 = vld [vmem:[%s496_s0] sm:$0xff]   ;;  %v441_v18 = vand.u32 127, %v110_v17 }
   0x4   :  { %v374_v7 = vld [vmem:[%s497_s2] ss:$0 sm:$0xff] }
   0x6   :  { %383 = vmatpush3.bf16.msra.mxu0 %v395_v2 }
   0x7   :  { %384 = vmatprep.subr.bf16.mxu0 %v399_v0 }
   0xa   :  { %385 = vmatpush3.bf16.msra.mxu0 %v396_v3 }
   0xb   :  { %386 = vmatprep.subr.bf16.mxu0 %v399_v0 }
   0xe   :  { %387 = vmatpush3.bf16.msra.mxu0 %v397_v4 }
  0x11   :  { %389 = vmatmul.mubr.msk.bf16.vlgmr.msra.gmra.mxu0 %vm54_vm1, %v398_v5 }
  0xd1   :  { %v92_v6 = vpop.f32.mrf.mxu0 }
  0xd2   :  { %v99_v8 = vmul.f32 2.0, %v92_v6 }
  0xd3   :  { %v390_v9 = vpop.f32.mrf.mxu0 }
  0xd4   :  { %v108_v10 = vsub.f32 %v99_v8, %v374_v7 }
  0xd5   :  { %v95_v11 = vpop.f32.mrf.mxu0 }
  0xd6   :  { %v100_v12 = vmul.f32 2.0, %v95_v11  ;;  %v113_v13 = vsel %vm112_vm2, %v108_v10, -inf }
  0xd7   :  { %114 = vmax.xlane.f32.xlu0 %v113_v13  ;;  %v391_v14 = vpop.f32.mrf.mxu0 }
  0xd8   :  { %v109_v15 = vsub.f32 %v100_v12, %v374_v7 }
  0xda   :  { %v116_v16 = vsel %vm112_vm2, %v109_v15, -inf }
  0xdb   :  { %117 = vmax.xlane.f32.xlu0 %v116_v16 }
 0x160   :  { %v115_v19 = vpop.xlane.xlu0 %114 }
 0x161   :  { %vm119_vm3 = vcmp.eq.f32.partialorder %v108_v10, %v115_v19 }
 0x162   :  { %v121_v20 = vsel %vm119_vm3, %v441_v18, 16 }
 0x163   :  { %v123_v21 = vsel %vm112_vm2, %v121_v20, 2147483647 }
 0x164   :  { %v118_v22 = vpop.xlane.xlu0 %117  ;;  %v125_v23 = vshra.s32 %v123_v21, 16  ;;  %v124_v29 = vand.u32 65535, %v123_v21 }
 0x165   :  { %vm120_vm4 = vcmp.eq.f32.partialorder %v109_v15, %v118_v22 }
 0x166   :  { %v122_v24 = vsel %vm120_vm4, %v441_v18, 16  ;;  %v127_v25 = vcvt.s32.f32 %v125_v23  ;;  %v126_v31 = vcvt.s32.f32 %v124_v29 }
 0x167   :  { %v138_v26 = vsel %vm112_vm2, %v122_v24, 2147483647 }
 0x168   :  { %128 = vmin.xlane.f32.xlu1 %v127_v25  ;;  %v140_v27 = vshra.s32 %v138_v26, 16  ;;  %v139_v32 = vand.u32 65535, %v138_v26 }
 0x16a   :  { %v142_v28 = vcvt.s32.f32 %v140_v27  ;;  %v141_v35 = vcvt.s32.f32 %v139_v32 }
 0x16c   :  { %143 = vmin.xlane.f32.xlu1 %v142_v28 }
 0x1f1   :  { %v129_v30 = vpop.xlane.xlu1 %128 }
 0x1f2   :  { %vm130_vm5 = vcmp.eq.f32.partialorder %v127_v25, %v129_v30  ;;  %v135_v37 = vcvt.f32.s32 %v129_v30 }
 0x1f3   :  { %v131_v33 = vsel %vm130_vm5, %v126_v31, inf }
 0x1f4   :  { %132 = vmin.xlane.f32.xlu0 %v131_v33  ;;  %v136_v39 = vshll.u32 %v135_v37, 16 }
 0x1f5   :  { %v144_v34 = vpop.xlane.xlu1 %143 }
 0x1f6   :  { %vm145_vm6 = vcmp.eq.f32.partialorder %v142_v28, %v144_v34  ;;  %v150_v40 = vcvt.f32.s32 %v144_v34 }
 0x1f7   :  { %v146_v36 = vsel %vm145_vm6, %v141_v35, inf }
 0x1f8   :  { %147 = vmin.xlane.f32.xlu1 %v146_v36  ;;  %v151_v44 = vshll.u32 %v150_v40, 16 }
 0x27d   :  { %v133_v38 = vpop.xlane.xlu0 %132 }
 0x27e   :  { %v134_v41 = vcvt.f32.s32 %v133_v38 }
 0x280   :  { %v137_v42 = vadd.s32 %v136_v39, %v134_v41 }
 0x281   :  { %v148_v43 = vpop.xlane.xlu1 %147 }
 0x282   :  { %vm153_vm7 = vcmp.lt.s32.totalorder %v137_v42, 15  ;;  %v149_v45 = vcvt.f32.s32 %v148_v43 }
 0x283   :  { %v447_v46 = vsel %vm153_vm7, %v137_v42, 15 }
 0x284   :  { %v152_v47 = vadd.s32 %v151_v44, %v149_v45  ;;  %vm157_vm8 = vcmp.eq.s32.totalorder %v441_v18, %v447_v46 }
 0x285   :  { %v159_v48 = vsel %vm157_vm8, -inf, %v108_v10  ;;  %vm349_vm8 = vcmask 7168  }
 0x286   :  { %vm155_vm9 = vcmp.lt.s32.totalorder %v152_v47, 15  ;;  %v161_v49 = vsel %vm112_vm2, %v159_v48, -inf }
 0x287   :  { %v452_v50 = vsel %vm155_vm9, %v152_v47, 15  ;;  %162 = vmax.xlane.f32.xlu0 %v161_v49  ;;  %vm352_vm9 = vcmask 15360  }
 0x288   :  { %vm158_vm10 = vcmp.eq.s32.totalorder %v441_v18, %v452_v50 }
 0x289   :  { %v160_v51 = vsel %vm158_vm10, -inf, %v109_v15 }
 0x28a   :  { %v164_v52 = vsel %vm112_vm2, %v160_v51, -inf }
 0x28b   :  { %165 = vmax.xlane.f32.xlu1 %v164_v52 }
 0x310   :  { %v163_v53 = vpop.xlane.xlu0 %162 }
 0x311   :  { %vm167_vm11 = vcmp.eq.f32.partialorder %v159_v48, %v163_v53 }
 0x312   :  { %v169_v54 = vsel %vm167_vm11, %v441_v18, 16 }
 0x313   :  { %v171_v55 = vsel %vm112_vm2, %v169_v54, 2147483647 }
 0x314   :  { %v166_v56 = vpop.xlane.xlu1 %165  ;;  %v173_v57 = vshra.s32 %v171_v55, 16  ;;  %v172_v63 = vand.u32 65535, %v171_v55 }
 0x315   :  { %vm168_vm12 = vcmp.eq.f32.partialorder %v160_v51, %v166_v56 }
 0x316   :  { %v170_v58 = vsel %vm168_vm12, %v441_v18, 16  ;;  %v175_v59 = vcvt.s32.f32 %v173_v57  ;;  %v174_v1 = vcvt.s32.f32 %v172_v63 }
 0x317   :  { %v186_v60 = vsel %vm112_vm2, %v170_v58, 2147483647 }
 0x318   :  { %176 = vmin.xlane.f32.xlu0 %v175_v59  ;;  %v188_v61 = vshra.s32 %v186_v60, 16  ;;  %v187_v2 = vand.u32 65535, %v186_v60 }
 0x31a   :  { %v190_v62 = vcvt.s32.f32 %v188_v61  ;;  %v189_v5 = vcvt.s32.f32 %v187_v2 }
 0x31c   :  { %191 = vmin.xlane.f32.xlu1 %v190_v62 }
 0x3a1   :  { %v177_v0 = vpop.xlane.xlu0 %176 }
 0x3a2   :  { %vm178_vm13 = vcmp.eq.f32.partialorder %v175_v59, %v177_v0  ;;  %v183_v7 = vcvt.f32.s32 %v177_v0 }
 0x3a3   :  { %v179_v3 = vsel %vm178_vm13, %v174_v1, inf }
 0x3a4   :  { %180 = vmin.xlane.f32.xlu0 %v179_v3  ;;  %v184_v9 = vshll.u32 %v183_v7, 16 }
 0x3a5   :  { %v192_v4 = vpop.xlane.xlu1 %191 }
 0x3a6   :  { %vm193_vm14 = vcmp.eq.f32.partialorder %v190_v62, %v192_v4  ;;  %v198_v10 = vcvt.f32.s32 %v192_v4 }
 0x3a7   :  { %v194_v6 = vsel %vm193_vm14, %v189_v5, inf }
 0x3a8   :  { %195 = vmin.xlane.f32.xlu1 %v194_v6  ;;  %v199_v14 = vshll.u32 %v198_v10, 16 }
 0x42d   :  { %v181_v8 = vpop.xlane.xlu0 %180 }
 0x42e   :  { %v182_v11 = vcvt.f32.s32 %v181_v8 }
 0x430   :  { %v185_v12 = vadd.s32 %v184_v9, %v182_v11 }
 0x431   :  { %v196_v13 = vpop.xlane.xlu1 %195 }
 0x432   :  { %vm201_vm15 = vcmp.lt.s32.totalorder %v185_v12, 15  ;;  %v197_v15 = vcvt.f32.s32 %v196_v13 }
 0x433   :  { %v202_v16 = vsel %vm201_vm15, %v185_v12, 15 }
 0x434   :  { %v200_v17 = vadd.s32 %v199_v14, %v197_v15  ;;  %vm205_vm0 = vcmp.eq.s32.totalorder %v441_v18, %v202_v16  ;;  %v350_v53 = vsel %vm349_vm8, %v447_v46, %v202_v16 }
 0x435   :  { %v207_v19 = vsel %vm205_vm0, -inf, %v159_v48 }
 0x436   :  { %vm203_vm1 = vcmp.lt.s32.totalorder %v200_v17, 15  ;;  %v209_v20 = vsel %vm112_vm2, %v207_v19, -inf }
 0x437   :  { %v204_v21 = vsel %vm203_vm1, %v200_v17, 15  ;;  %210 = vmax.xlane.f32.xlu0 %v209_v20 }
 0x438   :  { %vm206_vm3 = vcmp.eq.s32.totalorder %v441_v18, %v204_v21  ;;  %v351_v59 = vsel %vm349_vm8, %v452_v50, %v204_v21 }
 0x439   :  { %v208_v22 = vsel %vm206_vm3, -inf, %v160_v51  ;;  %vm355_vm3 = vcmask 23552  }
 0x43a   :  { %v212_v23 = vsel %vm112_vm2, %v208_v22, -inf }
 0x43b   :  { %213 = vmax.xlane.f32.xlu1 %v212_v23 }
 0x4c0   :  { %v211_v24 = vpop.xlane.xlu0 %210 }
 0x4c1   :  { %vm215_vm4 = vcmp.eq.f32.partialorder %v207_v19, %v211_v24 }
 0x4c2   :  { %v217_v25 = vsel %vm215_vm4, %v441_v18, 16 }
 0x4c3   :  { %v219_v26 = vsel %vm112_vm2, %v217_v25, 2147483647 }
 0x4c4   :  { %v214_v27 = vpop.xlane.xlu1 %213  ;;  %v221_v28 = vshra.s32 %v219_v26, 16  ;;  %v220_v34 = vand.u32 65535, %v219_v26 }
 0x4c5   :  { %vm216_vm5 = vcmp.eq.f32.partialorder %v208_v22, %v214_v27 }
 0x4c6   :  { %v218_v29 = vsel %vm216_vm5, %v441_v18, 16  ;;  %v223_v30 = vcvt.s32.f32 %v221_v28  ;;  %v222_v36 = vcvt.s32.f32 %v220_v34 }
 0x4c7   :  { %v234_v31 = vsel %vm112_vm2, %v218_v29, 2147483647 }
 0x4c8   :  { %224 = vmin.xlane.f32.xlu0 %v223_v30  ;;  %v236_v32 = vshra.s32 %v234_v31, 16  ;;  %v235_v37 = vand.u32 65535, %v234_v31 }
 0x4ca   :  { %v238_v33 = vcvt.s32.f32 %v236_v32  ;;  %v237_v40 = vcvt.s32.f32 %v235_v37 }
 0x4cc   :  { %239 = vmin.xlane.f32.xlu1 %v238_v33 }
 0x551   :  { %v225_v35 = vpop.xlane.xlu0 %224 }
 0x552   :  { %vm226_vm6 = vcmp.eq.f32.partialorder %v223_v30, %v225_v35  ;;  %v231_v42 = vcvt.f32.s32 %v225_v35 }
 0x553   :  { %v227_v38 = vsel %vm226_vm6, %v222_v36, inf }
 0x554   :  { %228 = vmin.xlane.f32.xlu0 %v227_v38  ;;  %v232_v44 = vshll.u32 %v231_v42, 16 }
 0x555   :  { %v240_v39 = vpop.xlane.xlu1 %239 }
 0x556   :  { %vm241_vm7 = vcmp.eq.f32.partialorder %v238_v33, %v240_v39  ;;  %v246_v45 = vcvt.f32.s32 %v240_v39 }
 0x557   :  { %v242_v41 = vsel %vm241_vm7, %v237_v40, inf }
 0x558   :  { %243 = vmin.xlane.f32.xlu1 %v242_v41  ;;  %v247_v51 = vshll.u32 %v246_v45, 16 }
 0x5dd   :  { %v229_v43 = vpop.xlane.xlu0 %228 }
 0x5de   :  { %v230_v47 = vcvt.f32.s32 %v229_v43 }
 0x5e0   :  { %v233_v48 = vadd.s32 %v232_v44, %v230_v47 }
 0x5e1   :  { %v244_v49 = vpop.xlane.xlu1 %243 }
 0x5e2   :  { %vm249_vm10 = vcmp.lt.s32.totalorder %v233_v48, 15  ;;  %v245_v52 = vcvt.f32.s32 %v244_v49 }
 0x5e3   :  { %v250_v54 = vsel %vm249_vm10, %v233_v48, 15 }
 0x5e4   :  { %v353_v55 = vsel %vm352_vm9, %v350_v53, %v250_v54  ;;  %v248_v56 = vadd.s32 %v247_v51, %v245_v52  ;;  %vm253_vm11 = vcmp.eq.s32.totalorder %v441_v18, %v250_v54 }
 0x5e5   :  { %v255_v57 = vsel %vm253_vm11, -inf, %v207_v19 }
 0x5e6   :  { %vm251_vm12 = vcmp.lt.s32.totalorder %v248_v56, 15  ;;  %v257_v58 = vsel %vm112_vm2, %v255_v57, -inf }
 0x5e7   :  { %v252_v60 = vsel %vm251_vm12, %v248_v56, 15  ;;  %258 = vmax.xlane.f32.xlu0 %v257_v58  ;;  %vm361_vm12 = vcmask 39936  }
 0x5e8   :  { %v354_v61 = vsel %vm352_vm9, %v351_v59, %v252_v60  ;;  %vm254_vm13 = vcmp.eq.s32.totalorder %v441_v18, %v252_v60 }
 0x5e9   :  { %v256_v62 = vsel %vm254_vm13, -inf, %v208_v22 }
 0x5ea   :  { %v260_v46 = vsel %vm112_vm2, %v256_v62, -inf }
 0x5eb   :  { %261 = vmax.xlane.f32.xlu1 %v260_v46 }
 0x670   :  { %v259_v63 = vpop.xlane.xlu0 %258 }
 0x671   :  { %vm263_vm14 = vcmp.eq.f32.partialorder %v255_v57, %v259_v63 }
 0x672   :  { %v265_v0 = vsel %vm263_vm14, %v441_v18, 16 }
 0x673   :  { %v267_v1 = vsel %vm112_vm2, %v265_v0, 2147483647 }
 0x674   :  { %v262_v2 = vpop.xlane.xlu1 %261  ;;  %v269_v3 = vshra.s32 %v267_v1, 16  ;;  %v268_v8 = vand.u32 65535, %v267_v1 }
 0x675   :  { %vm264_vm15 = vcmp.eq.f32.partialorder %v256_v62, %v262_v2 }
 0x676   :  { %v266_v50 = vsel %vm264_vm15, %v441_v18, 16  ;;  %v271_v4 = vcvt.s32.f32 %v269_v3  ;;  %v270_v10 = vcvt.s32.f32 %v268_v8 }
 0x677   :  { %v282_v5 = vsel %vm112_vm2, %v266_v50, 2147483647 }
 0x678   :  { %272 = vmin.xlane.f32.xlu0 %v271_v4  ;;  %v284_v6 = vshra.s32 %v282_v5, 16  ;;  %v283_v11 = vand.u32 65535, %v282_v5 }
 0x67a   :  { %v286_v7 = vcvt.s32.f32 %v284_v6  ;;  %v285_v14 = vcvt.s32.f32 %v283_v11 }
 0x67c   :  { %287 = vmin.xlane.f32.xlu1 %v286_v7 }
 0x701   :  { %v273_v9 = vpop.xlane.xlu0 %272 }
 0x702   :  { %vm274_vm0 = vcmp.eq.f32.partialorder %v271_v4, %v273_v9  ;;  %v279_v16 = vcvt.f32.s32 %v273_v9 }
 0x703   :  { %v275_v12 = vsel %vm274_vm0, %v270_v10, inf }
 0x704   :  { %276 = vmin.xlane.f32.xlu0 %v275_v12  ;;  %v280_v19 = vshll.u32 %v279_v16, 16 }
 0x705   :  { %v288_v13 = vpop.xlane.xlu1 %287 }
 0x706   :  { %vm289_vm1 = vcmp.eq.f32.partialorder %v286_v7, %v288_v13  ;;  %v294_v20 = vcvt.f32.s32 %v288_v13 }
 0x707   :  { %v290_v15 = vsel %vm289_vm1, %v285_v14, inf }
 0x708   :  { %291 = vmin.xlane.f32.xlu1 %v290_v15  ;;  %v295_v24 = vshll.u32 %v294_v20, 16 }
 0x78d   :  { %v277_v17 = vpop.xlane.xlu0 %276 }
 0x78e   :  { %v278_v21 = vcvt.f32.s32 %v277_v17 }
 0x790   :  { %v281_v22 = vadd.s32 %v280_v19, %v278_v21 }
 0x791   :  { %v292_v23 = vpop.xlane.xlu1 %291 }
 0x792   :  { %v293_v25 = vcvt.f32.s32 %v292_v23  ;;  %vm297_vm4 = vcmp.lt.s32.totalorder %v281_v22, 15 }
 0x793   :  { %v298_v26 = vsel %vm297_vm4, %v281_v22, 15 }
 0x794   :  { %v296_v27 = vadd.s32 %v295_v24, %v293_v25  ;;  %vm301_vm5 = vcmp.eq.s32.totalorder %v441_v18, %v298_v26  ;;  %v356_v28 = vsel %vm355_vm3, %v353_v55, %v298_v26 }
 0x795   :  { %v303_v29 = vsel %vm301_vm5, -inf, %v255_v57 }
 0x796   :  { %v305_v30 = vsel %vm112_vm2, %v303_v29, -inf  ;;  %vm299_vm6 = vcmp.lt.s32.totalorder %v296_v27, 15 }
 0x797   :  { %306 = vmax.xlane.f32.xlu0 %v305_v30  ;;  %v300_v31 = vsel %vm299_vm6, %v296_v27, 15 }
 0x798   :  { %vm302_vm7 = vcmp.eq.s32.totalorder %v441_v18, %v300_v31  ;;  %v357_v32 = vsel %vm355_vm3, %v354_v61, %v300_v31 }
 0x799   :  { %v304_v33 = vsel %vm302_vm7, -inf, %v256_v62 }
 0x79a   :  { %v308_v34 = vsel %vm112_vm2, %v304_v33, -inf }
 0x79b   :  { %309 = vmax.xlane.f32.xlu1 %v308_v34 }
 0x820   :  { %v307_v35 = vpop.xlane.xlu0 %306 }
 0x821   :  { %vm311_vm8 = vcmp.eq.f32.partialorder %v303_v29, %v307_v35 }
 0x822   :  { %v313_v36 = vsel %vm311_vm8, %v441_v18, 16 }
 0x823   :  { %v315_v37 = vsel %vm112_vm2, %v313_v36, 2147483647 }
 0x824   :  { %v310_v38 = vpop.xlane.xlu1 %309  ;;  %v317_v39 = vshra.s32 %v315_v37, 16  ;;  %v316_v45 = vand.u32 65535, %v315_v37 }
 0x825   :  { %vm312_vm9 = vcmp.eq.f32.partialorder %v304_v33, %v310_v38 }
 0x826   :  { %v314_v40 = vsel %vm312_vm9, %v441_v18, 16  ;;  %v319_v41 = vcvt.s32.f32 %v317_v39  ;;  %v318_v48 = vcvt.s32.f32 %v316_v45 }
 0x827   :  { %v330_v42 = vsel %vm112_vm2, %v314_v40, 2147483647  ;;  %vm358_vm2 = vcmask 31744  }
 0x828   :  { %320 = vmin.xlane.f32.xlu0 %v319_v41  ;;  %v332_v43 = vshra.s32 %v330_v42, 16  ;;  %v331_v49 = vand.u32 65535, %v330_v42 }
 0x82a   :  { %v334_v44 = vcvt.s32.f32 %v332_v43  ;;  %v333_v53 = vcvt.s32.f32 %v331_v49 }
 0x82c   :  { %335 = vmin.xlane.f32.xlu1 %v334_v44 }
 0x8b1   :  { %v321_v47 = vpop.xlane.xlu0 %320 }
 0x8b2   :  { %vm322_vm10 = vcmp.eq.f32.partialorder %v319_v41, %v321_v47  ;;  %v327_v18 = vcvt.f32.s32 %v321_v47 }
 0x8b3   :  { %v323_v51 = vsel %vm322_vm10, %v318_v48, inf }
 0x8b4   :  { %324 = vmin.xlane.f32.xlu0 %v323_v51  ;;  %v328_v56 = vshll.u32 %v327_v18, 16 }
 0x8b5   :  { %v336_v52 = vpop.xlane.xlu1 %335 }
 0x8b6   :  { %vm337_vm11 = vcmp.eq.f32.partialorder %v334_v44, %v336_v52  ;;  %v342_v57 = vcvt.f32.s32 %v336_v52 }
 0x8b7   :  { %v338_v54 = vsel %vm337_vm11, %v333_v53, inf }
 0x8b8   :  { %339 = vmin.xlane.f32.xlu1 %v338_v54  ;;  %v343_v61 = vshll.u32 %v342_v57, 16 }
 0x93d   :  { %v325_v55 = vpop.xlane.xlu0 %324 }
 0x93e   :  { %v326_v58 = vcvt.f32.s32 %v325_v55 }
 0x940   :  { %v329_v59 = vadd.s32 %v328_v56, %v326_v58 }
 0x941   :  { %v340_v60 = vpop.xlane.xlu1 %339 }
 0x942   :  { %vm345_vm13 = vcmp.lt.s32.totalorder %v329_v59, 15  ;;  %v341_v62 = vcvt.f32.s32 %v340_v60 }
 0x943   :  { %v346_v46 = vsel %vm345_vm13, %v329_v59, 15 }
 0x944   :  { %v359_v63 = vsel %vm358_vm2, %v356_v28, %v346_v46  ;;  %v344_v0 = vadd.s32 %v343_v61, %v341_v62 }
 0x945   :  { %362 = vst.msk [vmem:[%s498_s3] sm:$0xff] %vm361_vm12, %v359_v63 }
 0x946   :  { %vm347_vm14 = vcmp.lt.s32.totalorder %v344_v0, 15 }
 0x947   :  { %v348_v1 = vsel %vm347_vm14, %v344_v0, 15 }
 0x948   :  { %v360_v2 = vsel %vm358_vm2, %v357_v32, %v348_v1 }
 0x949   :  { %363 = vst.msk [vmem:[%s498_s3 + $0x8] sm:$0xff] %vm361_vm12, %v360_v2 }

// kernel: _sgnet_forward.9
= control target key start
LH: loop header
LB: loop body
LE: loop exit
PB: predicated region body
PF: predicated region fallthrough
CT: control target
= control target key end

     0   :  { %vm85_vm0 = vcmask 1044480   ;;  %vm373_vm1 = vcmask 1040384   ;;  %vm374_vm2 = vcmask 1041408   ;;  %v764_v0 = vmov 0.0   ;;  %s1146_s4 = inlined_call_operand.vmem [shape: s32[16,5], index: 4, kind: input, shape index: {}, may-alias: {4,5}]   ;;  %s1147_s5 = inlined_call_operand.vmem [shape: s32[16,5], index: 5, kind: input, shape index: {}, may-alias: {4,5}]   ;;  %s1148_s6 = inlined_call_operand.vmem [shape: bf16[10,64], index: 6, kind: input, shape index: {}]   ;;  %s1149_s7 = inlined_call_operand.vmem [shape: bf16[10,64], index: 7, kind: input, shape index: {}]   ;;  %s1150_s9 = inlined_call_operand.vmem [shape: bf16[3,64], index: 9, kind: input, shape index: {}]   ;;  %s1151_s10 = inlined_call_operand.vmem [shape: bf16[3,64], index: 10, kind: input, shape index: {}]   ;;  %s1152_s0 = inlined_call_operand.vmem [shape: bf16[16,10], index: 0, kind: input, shape index: {}]   ;;  %s1153_s1 = inlined_call_operand.vmem [shape: bf16[16,3], index: 1, kind: input, shape index: {}]   ;;  %s1154_s2 = inlined_call_operand.vmem [shape: bf16[5,16,10], index: 2, kind: input, shape index: {}]   ;;  %s1155_s3 = inlined_call_operand.vmem [shape: bf16[5,16,3], index: 3, kind: input, shape index: {}]   ;;  %s1156_s8 = inlined_call_operand.vmem [shape: f32[2,64], index: 8, kind: input, shape index: {}]   ;;  %s1157_s11 = inlined_call_operand.vmem [shape: f32[2,64], index: 11, kind: input, shape index: {}]   ;;  %s1158_s12 = inlined_call_operand.vmem [shape: bf16[16,64], index: 12, kind: output, shape index: {0}]   ;;  %s1159_s13 = inlined_call_operand.vmem [shape: bf16[16,64], index: 13, kind: output, shape index: {1}]  }
   0x1   :  { %701 = vmatprep.subr.bf16.mxu1 %v764_v0  ;;  %729 = vmatprep.subr.bf16.mxu0 %v764_v0  ;;  %v760_v1 = vld [vmem:[%s1149_s7] sm:$0x1f]   ;;  %v765_v7 = vmov 65535   ;;  %vm766_vm3 = vmmov 0   ;;  %vm81_vm4 = vcmask 80896   ;;  %vm369_vm5 = vcmask 23552  }
   0x2   :  { %v761_v2 = vld [vmem:[%s1148_s6] sm:$0x1f]   ;;  %v87_v5 = vsel %vm85_vm0, %v760_v1, 0  ;;  %v375_v8 = vsel %vm373_vm1, 4294967295, %v765_v7  ;;  %703 = vmatprep.mubr.msk.bf16.mxu1 %vm766_vm3, %v764_v0  ;;  %731 = vmatprep.mubr.msk.bf16.mxu0 %vm766_vm3, %v764_v0  ;;  %v46_v27 = vld [vmem:[%s1154_s2 + $0x8] sm:$0xf] }
   0x3   :  { %v361_v3 = vld [vmem:[%s1150_s9] sm:$0x3]  ;;  %v186_v6 = vsel %vm85_vm0, %v761_v2, 0  ;;  %702 = vmatpush3.bf16.msra.mxu1 %v87_v5  ;;  %v376_v10 = vsel %vm374_vm2, %v375_v8, 0  ;;  %v866_v11 = vld [vmem:[%s1152_s0 + $0x4] sm:$0xf]  ;;  %v271_v5 = vlaneseq }
   0x4   :  { %v362_v4 = vld [vmem:[%s1151_s10] sm:$0x3]  ;;  %707 = vmatprep.subr.bf16.mxu1 %v764_v0  ;;  %v879_v15 = vld [vmem:[%s1153_s1 + $0x4] sm:$0xf]  ;;  %v472_v19 = vand.u32 %v376_v10, %v361_v3  ;;  %v47_v28 = vld [vmem:[%s1154_s2 + $0xc] sm:$0xf] }
   0x5   :  { %v860_v9 = vld [vmem:[%s1152_s0] sm:$0xf]  ;;  %v378_v13 = vand.u32 %v376_v10, %v362_v4  ;;  %v45_v17 = vld [vmem:[%s1154_s2 + $0x4] sm:$0xf]  ;;  %v133_v31 = vsub.bf16 %v47_v28, %v866_v11  ;;  %v56_v32 = vld [vmem:[%s1155_s3 + $0x8] sm:$0xf] }
   0x6   :  { %v871_v12 = vld [vmem:[%s1153_s1] sm:$0xf]  ;;  %v651_v14 = vcombine.low %v860_v9, %v866_v11  ;;  %v131_v21 = vsub.bf16 %v45_v17, %v866_v11  ;;  %v55_v23 = vld [vmem:[%s1155_s3 + $0x4] sm:$0xf]  ;;  %v132_v30 = vsub.bf16 %v46_v27, %v860_v9  ;;  %v57_v33 = vld [vmem:[%s1155_s3 + $0xc] sm:$0xf] }
   0x7   :  { %v44_v16 = vld [vmem:[%s1154_s2] sm:$0xf]  ;;  %v667_v18 = vcombine.low %v871_v12, %v879_v15  ;;  %730 = vmatpush3.bf16.msra.mxu0 %v378_v13  ;;  %v422_v25 = vsub.bf16 %v55_v23, %v879_v15  ;;  %v423_v34 = vsub.bf16 %v56_v32, %v871_v12  ;;  %v424_v35 = vsub.bf16 %v57_v33, %v879_v15  ;;  %v48_v37 = vld [vmem:[%s1154_s2 + $0x10] sm:$0xf]  ;;  %v49_v38 = vld [vmem:[%s1154_s2 + $0x14] sm:$0xf] }
   0x8   :  { %704 = vmatmul.mubr.msk.bf16.vlgmr.msra.gmra.mxu1 %vm81_vm4, %v651_v14  ;;  %v130_v20 = vsub.bf16 %v44_v16, %v860_v9  ;;  %v54_v22 = vld [vmem:[%s1155_s3] sm:$0xf]  ;;  %735 = vmatprep.subr.bf16.mxu0 %v764_v0  ;;  %v655_v36 = vcombine.low %v132_v30, %v133_v31  ;;  %v134_v40 = vsub.bf16 %v48_v37, %v860_v9  ;;  %v58_v42 = vld [vmem:[%s1155_s3 + $0x10] sm:$0xf]  ;;  %v59_v43 = vld [vmem:[%s1155_s3 + $0x14] sm:$0xf] }
   0x9   :  { %708 = vmatpush3.bf16.msra.mxu1 %v186_v6  ;;  %709 = vmatprep.mubr.msk.bf16.mxu1 %vm766_vm3, %v764_v0  ;;  %v421_v24 = vsub.bf16 %v54_v22, %v871_v12  ;;  %v670_v39 = vcombine.low %v423_v34, %v424_v35  ;;  %v135_v41 = vsub.bf16 %v49_v38, %v866_v11  ;;  %v50_v47 = vld [vmem:[%s1154_s2 + $0x18] sm:$0xf]  ;;  %v51_v48 = vld [vmem:[%s1154_s2 + $0x1c] sm:$0xf]  ;;  %v52_v57 = vld [vmem:[%s1154_s2 + $0x20] sm:$0xf] }
   0xa   :  { %732 = vmatmul.mubr.msk.bf16.vlgmr.msra.gmra.mxu0 %vm369_vm5, %v667_v18  ;;  %v654_v26 = vcombine.low %v130_v20, %v131_v21  ;;  %v425_v44 = vsub.bf16 %v58_v42, %v871_v12  ;;  %v426_v45 = vsub.bf16 %v59_v43, %v879_v15  ;;  %v136_v50 = vsub.bf16 %v50_v47, %v860_v9  ;;  %v60_v52 = vld [vmem:[%s1155_s3 + $0x18] sm:$0xf]  ;;  %v61_v53 = vld [vmem:[%s1155_s3 + $0x1c] sm:$0xf]  ;;  %v53_v58 = vld [vmem:[%s1154_s2 + $0x24] sm:$0xf] }
   0xb   :  { %736 = vmatpush3.bf16.msra.mxu0 %v472_v19  ;;  %737 = vmatprep.mubr.msk.bf16.mxu0 %vm766_vm3, %v764_v0  ;;  %v669_v29 = vcombine.low %v421_v24, %v422_v25  ;;  %v656_v46 = vcombine.low %v134_v40, %v135_v41  ;;  %v137_v51 = vsub.bf16 %v51_v48, %v866_v11  ;;  %v62_v62 = vld [vmem:[%s1155_s3 + $0x20] sm:$0xf]  ;;  %v63_v63 = vld [vmem:[%s1155_s3 + $0x24] sm:$0xf]  ;;  %vm329_vm9 = vcmask 523264  }
   0xc   :  { %v671_v49 = vcombine.low %v425_v44, %v426_v45  ;;  %v427_v54 = vsub.bf16 %v60_v52, %v871_v12  ;;  %v428_v55 = vsub.bf16 %v61_v53, %v879_v15  ;;  %v138_v60 = vsub.bf16 %v52_v57, %v860_v9  ;;  %v70_v14 = vld [vmem:[%s1156_s8] sm:$0x3] }
   0xd   :  { %v657_v56 = vcombine.low %v136_v50, %v137_v51  ;;  %v139_v61 = vsub.bf16 %v53_v58, %v866_v11  ;;  %v429_v1 = vsub.bf16 %v62_v62, %v871_v12  ;;  %v430_v2 = vsub.bf16 %v63_v63, %v879_v15  ;;  %v363_v16 = vld [vmem:[%s1157_s11] sm:$0x3] }
   0xe   :  { %v672_v59 = vcombine.low %v427_v54, %v428_v55  ;;  %v272_v9 = vshrl.u32 %v271_v5, 7 }
   0xf   :  { %v658_v3 = vcombine.low %v138_v60, %v139_v61  ;;  %v673_v4 = vcombine.low %v429_v1, %v430_v2 }
  0x10   :  { %710 = vmatmul.mubr.msk.bf16.vlgmr.msra.gmra.mxu1 %vm81_vm4, %v654_v26  ;;  %v287_v21 = vsub.s32 1, %v272_v9 }
  0x11   :  { %713 = vmatprep.mubr.msk.bf16.mxu1 %vm766_vm3, %v764_v0 }
  0x12   :  { %738 = vmatmul.mubr.msk.bf16.vlgmr.msra.gmra.mxu0 %vm369_vm5, %v669_v29  ;;  %v1018_v30 = vrot.slane %v70_v14, %v287_v21  ;;  %v1021_v32 = vrot.slane %v363_v16, %v287_v21 }
  0x13   :  { %741 = vmatprep.mubr.msk.bf16.mxu0 %vm766_vm3, %v764_v0 }
  0x18   :  { %714 = vmatmul.mubr.msk.bf16.gmra.mxu1 %vm81_vm4, %v655_v36 }
  0x19   :  { %717 = vmatprep.mubr.msk.bf16.mxu1 %vm766_vm3, %v764_v0 }
  0x1a   :  { %742 = vmatmul.mubr.msk.bf16.gmra.mxu0 %vm369_vm5, %v670_v39 }
  0x1b   :  { %745 = vmatprep.mubr.msk.bf16.mxu0 %vm766_vm3, %v764_v0 }
  0x20   :  { %718 = vmatmul.mubr.msk.bf16.gmra.mxu1 %vm81_vm4, %v656_v46 }
  0x21   :  { %721 = vmatprep.mubr.msk.bf16.mxu1 %vm766_vm3, %v764_v0 }
  0x22   :  { %746 = vmatmul.mubr.msk.bf16.gmra.mxu0 %vm369_vm5, %v671_v49 }
  0x23   :  { %749 = vmatprep.mubr.msk.bf16.mxu0 %vm766_vm3, %v764_v0 }
  0x28   :  { %722 = vmatmul.mubr.msk.bf16.gmra.mxu1 %vm81_vm4, %v657_v56 }
  0x29   :  { %725 = vmatprep.mubr.msk.bf16.mxu1 %vm766_vm3, %v764_v0 }
  0x2a   :  { %750 = vmatmul.mubr.msk.bf16.gmra.mxu0 %vm369_vm5, %v672_v59 }
  0x2b   :  { %753 = vmatprep.mubr.msk.bf16.mxu0 %vm766_vm3, %v764_v0  ;;  %v273_v0 = vsub.s32 0, %v272_v9 }
  0x2d   :  { %v1011_v20 = vrot.slane %v70_v14, %v273_v0  ;;  %v1013_v23 = vrot.slane %v363_v16, %v273_v0 }
  0x30   :  { %726 = vmatmul.mubr.msk.bf16.gmra.mxu1 %vm81_vm4, %v658_v3 }
  0x32   :  { %754 = vmatmul.mubr.msk.bf16.gmra.mxu0 %vm369_vm5, %v673_v4 }
  0xc8   :  { %v996_v6 = vpop.f32.mrf.mxu1 }
  0xca   :  { %v705_v7 = vpop.f32.mrf.mxu1  ;;  %v998_v8 = vpop.f32.mrf.mxu0 }
  0xcc   :  { %v1000_v10 = vpop.f32.mrf.mxu1  ;;  %v733_v11 = vpop.f32.mrf.mxu0 }
  0xce   :  { %v706_v12 = vpop.f32.mrf.mxu1  ;;  %v1002_v13 = vpop.f32.mrf.mxu0 }
  0xd0   :  { %v222_v15 = vpop.f32.mrf.mxu1  ;;  %v734_v17 = vpop.f32.mrf.mxu0 }
  0xd1   :  { %v261_v19 = vadd.f32 %v222_v15, %v996_v6 }
  0xd2   :  { %v711_v18 = vpop.f32.mrf.mxu1  ;;  %v508_v22 = vpop.f32.mrf.mxu0 }
  0xd3   :  { %v547_v24 = vadd.f32 %v508_v22, %v998_v8  ;;  %v275_v29 = vmul.f32 %v1011_v20, %v261_v19 }
  0xd4   :  { %v225_v25 = vpop.f32.mrf.mxu1  ;;  %v739_v26 = vpop.f32.mrf.mxu0 }
  0xd5   :  { %v262_v27 = vadd.f32 %v225_v25, %v1000_v10  ;;  %v561_v31 = vmul.f32 %v1013_v23, %v547_v24  ;;  %v289_v40 = vadd.f32 %v1018_v30, %v275_v29 }
  0xd6   :  { %v712_v28 = vpop.f32.mrf.mxu1  ;;  %v511_v33 = vpop.f32.mrf.mxu0 }
  0xd7   :  { %v276_v34 = vmul.f32 %v1011_v20, %v262_v27  ;;  %v548_v35 = vadd.f32 %v511_v33, %v1002_v13  ;;  %v575_v41 = vadd.f32 %v1021_v32, %v561_v31  ;;  %vm299_vm6 = vcmp.ge.f32.partialorder %v289_v40, 0.0 }
  0xd8   :  { %v230_v36 = vpop.f32.mrf.mxu1  ;;  %v740_v37 = vpop.f32.mrf.mxu0  ;;  %v309_v51 = vmul.f32 0.2, %v289_v40 }
  0xd9   :  { %v263_v38 = vadd.f32 %v230_v36, %v996_v6  ;;  %v290_v43 = vadd.f32 %v1018_v30, %v276_v34  ;;  %v562_v44 = vmul.f32 %v1013_v23, %v548_v35  ;;  %v595_v52 = vmul.f32 0.2, %v575_v41 }
  0xda   :  { %v715_v39 = vpop.f32.mrf.mxu1  ;;  %v516_v42 = vpop.f32.mrf.mxu0  ;;  %vm585_vm7 = vcmp.ge.f32.partialorder %v575_v41, 0.0  ;;  %v319_v1 = vsel %vm299_vm6, %v289_v40, %v309_v51  ;;  %vm356_vm6 = vcmask 519168  }
  0xdb   :  { %v277_v45 = vmul.f32 %v1011_v20, %v263_v38  ;;  %v549_v47 = vadd.f32 %v516_v42, %v998_v8  ;;  %v310_v54 = vmul.f32 0.2, %v290_v43  ;;  %v576_v55 = vadd.f32 %v1021_v32, %v562_v44 }
  0xdc   :  { %v233_v46 = vpop.f32.mrf.mxu1  ;;  %v743_v48 = vpop.f32.mrf.mxu0  ;;  %vm300_vm8 = vcmp.ge.f32.partialorder %v290_v43, 0.0  ;;  %v605_v2 = vsel %vm585_vm7, %v575_v41, %v595_v52  ;;  %v1049_v22 = vsel %vm329_vm9, %v319_v1, -inf }
  0xdd   :  { %v264_v49 = vadd.f32 %v233_v46, %v1000_v10  ;;  %v291_v56 = vadd.f32 %v1018_v30, %v277_v45  ;;  %v563_v58 = vmul.f32 %v1013_v23, %v549_v47  ;;  %v320_v5 = vsel %vm300_vm8, %v290_v43, %v310_v54 }
  0xde   :  { %v716_v50 = vpop.f32.mrf.mxu1  ;;  %v519_v53 = vpop.f32.mrf.mxu0  ;;  %v596_v7 = vmul.f32 0.2, %v576_v55  ;;  %vm586_vm10 = vcmp.ge.f32.partialorder %v576_v55, 0.0  ;;  %v1052_v24 = vsel %vm329_vm9, %v605_v2, -inf  ;;  %v1055_v25 = vsel %vm329_vm9, %v320_v5, -inf }
  0xdf   :  { %v278_v61 = vmul.f32 %v1011_v20, %v264_v49  ;;  %v550_v62 = vadd.f32 %v519_v53, %v1002_v13  ;;  %v311_v9 = vmul.f32 0.2, %v291_v56  ;;  %vm301_vm11 = vcmp.ge.f32.partialorder %v291_v56, 0.0 }
  0xe0   :  { %v238_v57 = vpop.f32.mrf.mxu1  ;;  %v744_v59 = vpop.f32.mrf.mxu0  ;;  %v577_v0 = vadd.f32 %v1021_v32, %v563_v58  ;;  %v1058_v28 = vsel %vm586_vm10, %v576_v55, %v596_v7 }
  0xe1   :  { %v265_v60 = vadd.f32 %v238_v57, %v996_v6  ;;  %v292_v16 = vadd.f32 %v1018_v30, %v278_v61  ;;  %v564_v17 = vmul.f32 %v1013_v23, %v550_v62  ;;  %v321_v29 = vsel %vm301_vm11, %v291_v56, %v311_v9 }
  0xe2   :  { %v719_v63 = vpop.f32.mrf.mxu1  ;;  %v524_v4 = vpop.f32.mrf.mxu0  ;;  %vm587_vm12 = vcmp.ge.f32.partialorder %v577_v0, 0.0  ;;  %v597_v35 = vmul.f32 0.2, %v577_v0  ;;  %v1068_v47 = vsel %vm329_vm9, %v321_v29, -inf }
  0xe3   :  { %v279_v3 = vmul.f32 %v1011_v20, %v265_v60  ;;  %v551_v11 = vadd.f32 %v524_v4, %v998_v8  ;;  %vm302_vm13 = vcmp.ge.f32.partialorder %v292_v16, 0.0  ;;  %v312_v39 = vmul.f32 0.2, %v292_v16 }
  0xe4   :  { %v241_v12 = vpop.f32.mrf.mxu1  ;;  %v747_v14 = vpop.f32.mrf.mxu0  ;;  %v578_v40 = vadd.f32 %v1021_v32, %v564_v17  ;;  %v607_v51 = vsel %vm587_vm12, %v577_v0, %v597_v35 }
  0xe5   :  { %v266_v15 = vadd.f32 %v241_v12, %v1000_v10  ;;  %v293_v18 = vadd.f32 %v1018_v30, %v279_v3  ;;  %v565_v19 = vmul.f32 %v1013_v23, %v551_v11  ;;  %v322_v55 = vsel %vm302_vm13, %v292_v16, %v312_v39 }
  0xe6   :  { %v720_v21 = vpop.f32.mrf.mxu1  ;;  %v527_v27 = vpop.f32.mrf.mxu0  ;;  %vm588_vm1 = vcmp.ge.f32.partialorder %v578_v40, 0.0  ;;  %v598_v56 = vmul.f32 0.2, %v578_v40  ;;  %v1081_v5 = vsel %vm329_vm9, %v607_v51, -inf  ;;  %v1084_v7 = vsel %vm329_vm9, %v322_v55, -inf }
  0xe7   :  { %v280_v26 = vmul.f32 %v1011_v20, %v266_v15  ;;  %v579_v31 = vadd.f32 %v1021_v32, %v565_v19  ;;  %v552_v33 = vadd.f32 %v527_v27, %v1002_v13  ;;  %v313_v41 = vmul.f32 0.2, %v293_v18 }
  0xe8   :  { %v246_v34 = vpop.f32.mrf.mxu1  ;;  %v748_v37 = vpop.f32.mrf.mxu0  ;;  %vm303_vm14 = vcmp.ge.f32.partialorder %v293_v18, 0.0  ;;  %v1089_v0 = vsel %vm588_vm1, %v578_v40, %v598_v56 }
  0xe9   :  { %v294_v36 = vadd.f32 %v1018_v30, %v280_v26  ;;  %v267_v38 = vadd.f32 %v246_v34, %v996_v6  ;;  %v599_v43 = vmul.f32 0.2, %v579_v31  ;;  %v566_v44 = vmul.f32 %v1013_v23, %v552_v33 }
  0xea   :  { %v723_v42 = vpop.f32.mrf.mxu1  ;;  %v532_v46 = vpop.f32.mrf.mxu0  ;;  %vm589_vm15 = vcmp.ge.f32.partialorder %v579_v31, 0.0  ;;  %v323_v57 = vsel %vm303_vm14, %v293_v18, %v313_v41 }
  0xeb   :  { %v281_v45 = vmul.f32 %v1011_v20, %v267_v38  ;;  %v314_v48 = vmul.f32 0.2, %v294_v36  ;;  %v553_v49 = vadd.f32 %v532_v46, %v998_v8  ;;  %vm304_vm0 = vcmp.ge.f32.partialorder %v294_v36, 0.0 }
  0xec   :  { %v249_v50 = vpop.f32.mrf.mxu1  ;;  %v751_v53 = vpop.f32.mrf.mxu0  ;;  %v609_v59 = vsel %vm589_vm15, %v579_v31, %v599_v43  ;;  %v580_v60 = vadd.f32 %v1021_v32, %v566_v44  ;;  %v332_v14 = vsel %vm329_vm9, %v323_v57, -inf }
  0xed   :  { %v295_v52 = vadd.f32 %v1018_v30, %v281_v45  ;;  %v268_v54 = vadd.f32 %v249_v50, %v1000_v10  ;;  %v567_v62 = vmul.f32 %v1013_v23, %v553_v49  ;;  %v324_v1 = vsel %vm304_vm0, %v294_v36, %v314_v48 }
  0xee   :  { %v724_v58 = vpop.f32.mrf.mxu1  ;;  %v535_v63 = vpop.f32.mrf.mxu0  ;;  %v617_v18 = vsel %vm329_vm9, %v609_v59, -inf  ;;  %v341_v19 = vsel %vm329_vm9, %v324_v1, -inf  ;;  %vm590_vm3 = vcmp.ge.f32.partialorder %v580_v60, 0.0  ;;  %v333_v38 = vmax.f32 %v1049_v22, %v332_v14 }
  0xef   :  { %v315_v61 = vmul.f32 0.2, %v295_v52  ;;  %vm305_vm2 = vcmp.ge.f32.partialorder %v295_v52, 0.0  ;;  %v282_v2 = vmul.f32 %v1011_v20, %v268_v54  ;;  %v554_v3 = vadd.f32 %v535_v63, %v1002_v13 }
  0xf0   :  { %v254_v4 = vpop.f32.mrf.mxu1  ;;  %v581_v9 = vadd.f32 %v1021_v32, %v567_v62  ;;  %v752_v11 = vpop.f32.mrf.mxu0  ;;  %v618_v42 = vmax.f32 %v1052_v24, %v617_v18 }
  0xf1   :  { %v269_v12 = vadd.f32 %v254_v4, %v996_v6  ;;  %v296_v15 = vadd.f32 %v1018_v30, %v282_v2  ;;  %v568_v16 = vmul.f32 %v1013_v23, %v554_v3  ;;  %v325_v21 = vsel %vm305_vm2, %v295_v52, %v315_v61 }
  0xf2   :  { %v727_v17 = vpop.f32.mrf.mxu1  ;;  %v540_v27 = vpop.f32.mrf.mxu0  ;;  %v600_v6 = vmul.f32 0.2, %v580_v60  ;;  %v601_v29 = vmul.f32 0.2, %v581_v9  ;;  %vm591_vm4 = vcmp.ge.f32.partialorder %v581_v9, 0.0  ;;  %v334_v39 = vsel %vm329_vm9, %v325_v21, -inf }
  0xf3   :  { %v283_v26 = vmul.f32 %v1011_v20, %v269_v12  ;;  %v555_v31 = vadd.f32 %v540_v27, %v998_v8  ;;  %v316_v34 = vmul.f32 0.2, %v296_v15  ;;  %vm306_vm5 = vcmp.ge.f32.partialorder %v296_v15, 0.0 }
  0xf4   :  { %v257_v33 = vpop.f32.mrf.mxu1  ;;  %v755_v36 = vpop.f32.mrf.mxu0  ;;  %v582_v40 = vadd.f32 %v1021_v32, %v568_v16  ;;  %v342_v8 = vmax.f32 %v1055_v25, %v341_v19  ;;  %v610_v45 = vsel %vm590_vm3, %v580_v60, %v600_v6  ;;  %v335_v48 = vmax.f32 %v1068_v47, %v334_v39 }
  0xf5   :  { %v297_v35 = vadd.f32 %v1018_v30, %v283_v26  ;;  %v270_v37 = vadd.f32 %v257_v33, %v1000_v10  ;;  %v611_v10 = vsel %vm591_vm4, %v581_v9, %v601_v29  ;;  %v569_v22 = vmul.f32 %v1013_v23, %v555_v31 }
  0xf6   :  { %v728_v41 = vpop.f32.mrf.mxu1  ;;  %v543_v44 = vpop.f32.mrf.mxu0  ;;  %v326_v49 = vsel %vm306_vm5, %v296_v15, %v316_v34  ;;  %v602_v52 = vmul.f32 0.2, %v582_v40  ;;  %v619_v55 = vsel %vm329_vm9, %v611_v10, -inf  ;;  %vm592_vm8 = vcmp.ge.f32.partialorder %v582_v40, 0.0 }
  0xf7   :  { %vm307_vm7 = vcmp.ge.f32.partialorder %v297_v35, 0.0  ;;  %v317_v43 = vmul.f32 0.2, %v297_v35  ;;  %v284_v46 = vmul.f32 %v1011_v20, %v270_v37  ;;  %v556_v51 = vadd.f32 %v543_v44, %v1002_v13 }
  0xf8   :  { %v756_v24 = vpop.f32.mrf.mxu0  ;;  %v583_v53 = vadd.f32 %v1021_v32, %v569_v22  ;;  %v626_v13 = vsel %vm329_vm9, %v610_v45, -inf  ;;  %v343_v58 = vsel %vm329_vm9, %v326_v49, -inf  ;;  %v620_v61 = vmax.f32 %v1081_v5, %v619_v55 }
  0xf9   :  { %v327_v50 = vsel %vm307_vm7, %v297_v35, %v317_v43  ;;  %v298_v54 = vadd.f32 %v1018_v30, %v284_v46  ;;  %v570_v20 = vmul.f32 %v1013_v23, %v556_v51  ;;  %v612_v30 = vsel %vm592_vm8, %v582_v40, %v602_v52 }
  0xfa   :  { %v336_v25 = vsel %vm329_vm9, %v327_v50, -inf  ;;  %vm593_vm10 = vcmp.ge.f32.partialorder %v583_v53, 0.0  ;;  %v603_v47 = vmul.f32 0.2, %v583_v53  ;;  %v344_v3 = vmax.f32 %v1084_v7, %v343_v58 }
  0xfb   :  { %v337_v56 = vmax.f32 %v333_v38, %v336_v25  ;;  %vm308_vm11 = vcmp.ge.f32.partialorder %v298_v54, 0.0  ;;  %v318_v57 = vmul.f32 0.2, %v298_v54  ;;  %v584_v60 = vadd.f32 %v1021_v32, %v570_v20 }
  0xfc   :  { %v613_v62 = vsel %vm593_vm10, %v583_v53, %v603_v47  ;;  %v624_v12 = vsel %vm329_vm9, %v1058_v28, -inf  ;;  %v628_v32 = vsel %vm329_vm9, %v612_v30, -inf  ;;  %v625_v7 = vsel %vm329_vm9, %v1089_v0, -inf }
  0xfd   :  { %v338_v59 = vmax.f32 %v337_v56, %v335_v48  ;;  %v328_v63 = vsel %vm308_vm11, %v298_v54, %v318_v57  ;;  %v621_v2 = vsel %vm329_vm9, %v613_v62, -inf  ;;  %vm594_vm12 = vcmp.ge.f32.partialorder %v584_v60, 0.0 }
  0xfe   :  { %v345_v23 = vsel %vm329_vm9, %v328_v63, -inf  ;;  %v622_v4 = vmax.f32 %v618_v42, %v621_v2  ;;  %v604_v11 = vmul.f32 0.2, %v584_v60  ;;  %v627_v5 = vmax.f32 %v624_v12, %v626_v13 }
  0xff   :  { %v681_v1 = vpack.c.bf16 %v338_v59, %v338_v59  ;;  %v346_v9 = vmax.f32 %v342_v8, %v345_v23  ;;  %v629_v18 = vmax.f32 %v625_v7, %v628_v32 }
 0x100   :  { %v623_v14 = vmax.f32 %v622_v4, %v620_v61  ;;  %v614_v16 = vsel %vm594_vm12, %v584_v60, %v604_v11 }
 0x101   :  { %357 = vst.msk [vmem:[%s1158_s12] sm:$0xf] %vm356_vm6, %v681_v1  ;;  %v347_v15 = vmax.f32 %v346_v9, %v344_v3  ;;  %v630_v17 = vsel %vm329_vm9, %v614_v16, -inf }
 0x102   :  { %v683_v19 = vpack.c.bf16 %v623_v14, %v623_v14  ;;  %v631_v28 = vmax.f32 %v627_v5, %v630_v17 }
 0x103   :  { %v682_v21 = vpack.c.bf16 %v347_v15, %v347_v15 }
 0x104   :  { %641 = vst.msk [vmem:[%s1159_s13] sm:$0xf] %vm356_vm6, %v683_v19  ;;  %v632_v26 = vmax.f32 %v631_v28, %v629_v18 }
 0x105   :  { %358 = vst.msk [vmem:[%s1158_s12 + $0x4] sm:$0xf] %vm356_vm6, %v682_v21 }
 0x106   :  { %v684_v27 = vpack.c.bf16 %v632_v26, %v632_v26 }
 0x108   :  { %642 = vst.msk [vmem:[%s1159_s13 + $0x4] sm:$0xf] %vm356_vm6, %v684_v27 }

// kernel: _sgnet_forward.12
= control target key start
LH: loop header
LB: loop body
LE: loop exit
PB: predicated region body
PF: predicated region fallthrough
CT: control target
= control target key end

     0   :  { %v920_v0 = vmov 0.0   ;;  %vm921_vm0 = vmmov 0   ;;  %vm112_vm1 = vcmask 523264   ;;  %s1344_s4 = inlined_call_operand.vmem [shape: s32[16,5], index: 4, kind: input, shape index: {}]   ;;  %s1345_s5 = inlined_call_operand.vmem [shape: s32[16,5], index: 5, kind: input, shape index: {}]   ;;  %s1346_s7 = inlined_call_operand.vmem [shape: bf16[64,64], index: 7, kind: input, shape index: {}]   ;;  %s1347_s10 = inlined_call_operand.vmem [shape: bf16[64,64], index: 10, kind: input, shape index: {}]   ;;  %s1348_s0 = inlined_call_operand.vmem [shape: bf16[16,64], index: 0, kind: input, shape index: {}]   ;;  %s1349_s1 = inlined_call_operand.vmem [shape: bf16[16,64], index: 1, kind: input, shape index: {}]   ;;  %s1350_s6 = inlined_call_operand.vmem [shape: bf16[64,64], index: 6, kind: input, shape index: {}]   ;;  %s1351_s9 = inlined_call_operand.vmem [shape: bf16[64,64], index: 9, kind: input, shape index: {}]   ;;  %s1352_s2 = inlined_call_operand.vmem [shape: bf16[5,16,64], index: 2, kind: input, shape index: {}]   ;;  %s1353_s3 = inlined_call_operand.vmem [shape: bf16[5,16,64], index: 3, kind: input, shape index: {}]   ;;  %s1354_s8 = inlined_call_operand.vmem [shape: f32[2,64], index: 8, kind: input, shape index: {}]   ;;  %s1355_s11 = inlined_call_operand.vmem [shape: f32[2,64], index: 11, kind: input, shape index: {}]   ;;  %s1356_s12 = inlined_call_operand.vmem [shape: bf16[16,64], index: 12, kind: output, shape index: {0}]   ;;  %s1357_s13 = inlined_call_operand.vmem [shape: bf16[16,64], index: 13, kind: output, shape index: {1}]  }
   0x1   :  { %820 = vmatprep.subr.bf16.mxu1 %v920_v0  ;;  %860 = vmatprep.subr.bf16.mxu0 %v920_v0  ;;  %v902_v1 = vld [vmem:[%s1346_s7 + $0x18] sm:$0xff]   ;;  %v904_v3 = vld [vmem:[%s1346_s7 + $0x10] sm:$0xff]   ;;  %v906_v5 = vld [vmem:[%s1346_s7 + $0x8] sm:$0xff]  }
   0x2   :  { %v903_v2 = vld [vmem:[%s1347_s10 + $0x18] sm:$0xff]   ;;  %828 = vmatprep.mubr.msk.bf16.mxu1 %vm921_vm0, %v920_v0  ;;  %868 = vmatprep.mubr.msk.bf16.mxu0 %vm921_vm0, %v920_v0  ;;  %v905_v4 = vld [vmem:[%s1347_s10 + $0x10] sm:$0xff]   ;;  %v907_v6 = vld [vmem:[%s1347_s10 + $0x8] sm:$0xff]  }
   0x3   :  { %821 = vmatpush3.bf16.msra.mxu1 %v902_v1  ;;  %861 = vmatpush3.bf16.msra.mxu0 %v903_v2  ;;  %v908_v7 = vld [vmem:[%s1346_s7] sm:$0xff]   ;;  %v912_v15 = vld [vmem:[%s1350_s6 + $0x18] sm:$0xff]   ;;  %v914_v17 = vld [vmem:[%s1350_s6 + $0x10] sm:$0xff]  }
   0x4   :  { %822 = vmatprep.subr.bf16.mxu1 %v920_v0  ;;  %862 = vmatprep.subr.bf16.mxu0 %v920_v0  ;;  %v1026_v8 = vld [vmem:[%s1348_s0] sm:$0xf]  ;;  %v1034_v10 = vld [vmem:[%s1348_s0 + $0x4] sm:$0xf]  ;;  %v913_v16 = vld [vmem:[%s1351_s9 + $0x18] sm:$0xff]  }
   0x5   :  { %v909_v9 = vld [vmem:[%s1347_s10] sm:$0xff]   ;;  %v744_v13 = vcombine.low %v1026_v8, %v1034_v10  ;;  %v915_v18 = vld [vmem:[%s1351_s9 + $0x10] sm:$0xff]   ;;  %v916_v19 = vld [vmem:[%s1350_s6 + $0x8] sm:$0xff]  }
   0x6   :  { %v1039_v11 = vld [vmem:[%s1349_s1] sm:$0xf]  ;;  %v1045_v12 = vld [vmem:[%s1349_s1 + $0x4] sm:$0xf]  ;;  %v917_v22 = vld [vmem:[%s1351_s9 + $0x8] sm:$0xff]  }
   0x7   :  { %823 = vmatpush3.bf16.msra.mxu1 %v904_v3  ;;  %863 = vmatpush3.bf16.msra.mxu0 %v905_v4  ;;  %v766_v14 = vcombine.low %v1039_v11, %v1045_v12  ;;  %v44_v20 = vld [vmem:[%s1352_s2] sm:$0xf]  ;;  %v45_v21 = vld [vmem:[%s1352_s2 + $0x4] sm:$0xf]  ;;  %v46_v33 = vld [vmem:[%s1352_s2 + $0x8] sm:$0xf] }
   0x8   :  { %824 = vmatprep.subr.bf16.mxu1 %v920_v0  ;;  %864 = vmatprep.subr.bf16.mxu0 %v920_v0  ;;  %v54_v23 = vld [vmem:[%s1353_s3] sm:$0xf]  ;;  %v55_v24 = vld [vmem:[%s1353_s3 + $0x4] sm:$0xf]  ;;  %v157_v25 = vsub.bf16 %v44_v20, %v1026_v8  ;;  %v158_v26 = vsub.bf16 %v45_v21, %v1034_v10  ;;  %v47_v34 = vld [vmem:[%s1352_s2 + $0xc] sm:$0xf]  ;;  %v159_v37 = vsub.bf16 %v46_v33, %v1026_v8 }
   0x9   :  { %v918_v27 = vld [vmem:[%s1350_s6] sm:$0xff]   ;;  %v493_v28 = vsub.bf16 %v54_v23, %v1039_v11  ;;  %v494_v29 = vsub.bf16 %v55_v24, %v1045_v12  ;;  %v56_v35 = vld [vmem:[%s1353_s3 + $0x8] sm:$0xf]  ;;  %v57_v36 = vld [vmem:[%s1353_s3 + $0xc] sm:$0xf]  ;;  %v160_v38 = vsub.bf16 %v47_v34, %v1034_v10 }
   0xa   :  { %v919_v30 = vld [vmem:[%s1351_s9] sm:$0xff]   ;;  %v750_v31 = vcombine.low %v157_v25, %v158_v26  ;;  %v495_v39 = vsub.bf16 %v56_v35, %v1039_v11  ;;  %v496_v40 = vsub.bf16 %v57_v36, %v1045_v12  ;;  %v48_v43 = vld [vmem:[%s1352_s2 + $0x10] sm:$0xf]  ;;  %v49_v44 = vld [vmem:[%s1352_s2 + $0x14] sm:$0xf] }
   0xb   :  { %825 = vmatpush3.bf16.msra.mxu1 %v906_v5  ;;  %865 = vmatpush3.bf16.msra.mxu0 %v907_v6  ;;  %v772_v32 = vcombine.low %v493_v28, %v494_v29  ;;  %v751_v41 = vcombine.low %v159_v37, %v160_v38  ;;  %v58_v45 = vld [vmem:[%s1353_s3 + $0x10] sm:$0xf]  ;;  %v59_v46 = vld [vmem:[%s1353_s3 + $0x14] sm:$0xf]  ;;  %v161_v47 = vsub.bf16 %v48_v43, %v1026_v8  ;;  %v50_v53 = vld [vmem:[%s1352_s2 + $0x18] sm:$0xf] }
   0xc   :  { %826 = vmatprep.subr.bf16.mxu1 %v920_v0  ;;  %866 = vmatprep.subr.bf16.mxu0 %v920_v0  ;;  %v773_v42 = vcombine.low %v495_v39, %v496_v40  ;;  %v162_v48 = vsub.bf16 %v49_v44, %v1034_v10  ;;  %v497_v49 = vsub.bf16 %v58_v45, %v1039_v11  ;;  %v51_v54 = vld [vmem:[%s1352_s2 + $0x1c] sm:$0xf]  ;;  %v60_v55 = vld [vmem:[%s1353_s3 + $0x18] sm:$0xf]  ;;  %v52_v63 = vld [vmem:[%s1352_s2 + $0x20] sm:$0xf] }
   0xd   :  { %v498_v50 = vsub.bf16 %v59_v46, %v1045_v12  ;;  %v61_v56 = vld [vmem:[%s1353_s3 + $0x1c] sm:$0xf]  ;;  %v163_v57 = vsub.bf16 %v50_v53, %v1026_v8  ;;  %v164_v58 = vsub.bf16 %v51_v54, %v1034_v10  ;;  %v499_v59 = vsub.bf16 %v60_v55, %v1039_v11  ;;  %v53_v1 = vld [vmem:[%s1352_s2 + $0x24] sm:$0xf]  ;;  %v62_v2 = vld [vmem:[%s1353_s3 + $0x20] sm:$0xf] }
   0xe   :  { %v752_v51 = vcombine.low %v161_v47, %v162_v48  ;;  %v500_v60 = vsub.bf16 %v61_v56, %v1045_v12  ;;  %v63_v3 = vld [vmem:[%s1353_s3 + $0x24] sm:$0xf]  ;;  %v165_v4 = vsub.bf16 %v52_v63, %v1026_v8  ;;  %v166_v5 = vsub.bf16 %v53_v1, %v1034_v10  ;;  %v82_v20 = vld [vmem:[%s1354_s8] sm:$0x3] }
   0xf   :  { %827 = vmatpush3.bf16.msra.mxu1 %v908_v7  ;;  %867 = vmatpush3.bf16.msra.mxu0 %v909_v9  ;;  %v774_v52 = vcombine.low %v497_v49, %v498_v50  ;;  %v753_v61 = vcombine.low %v163_v57, %v164_v58  ;;  %v501_v6 = vsub.bf16 %v62_v2, %v1039_v11  ;;  %v314_v11 = vlaneseq  ;;  %v419_v21 = vld [vmem:[%s1355_s11] sm:$0x3] }
  0x10   :  { %832 = vmatprep.subr.bf16.mxu1 %v920_v0  ;;  %872 = vmatprep.subr.bf16.mxu0 %v920_v0  ;;  %v775_v62 = vcombine.low %v499_v59, %v500_v60  ;;  %v502_v7 = vsub.bf16 %v63_v3, %v1045_v12  ;;  %v754_v9 = vcombine.low %v165_v4, %v166_v5 }
  0x12   :  { %829 = vmatmul.mubr.msk.bf16.vlgmr.msra.gmra.mxu1 %vm112_vm1, %v744_v13  ;;  %869 = vmatmul.mubr.msk.bf16.vlgmr.msra.gmra.mxu0 %vm112_vm1, %v766_v14  ;;  %v776_v13 = vcombine.low %v501_v6, %v502_v7 }
  0x13   :  { %833 = vmatpush3.bf16.msra.mxu1 %v912_v15  ;;  %873 = vmatpush3.bf16.msra.mxu0 %v913_v16 }
  0x14   :  { %834 = vmatprep.subr.bf16.mxu1 %v920_v0  ;;  %874 = vmatprep.subr.bf16.mxu0 %v920_v0 }
  0x15   :  { %840 = vmatprep.mubr.msk.bf16.mxu1 %vm921_vm0, %v920_v0  ;;  %880 = vmatprep.mubr.msk.bf16.mxu0 %vm921_vm0, %v920_v0 }
  0x17   :  { %835 = vmatpush3.bf16.msra.mxu1 %v914_v17  ;;  %875 = vmatpush3.bf16.msra.mxu0 %v915_v18 }
  0x18   :  { %836 = vmatprep.subr.bf16.mxu1 %v920_v0  ;;  %876 = vmatprep.subr.bf16.mxu0 %v920_v0 }
  0x1b   :  { %837 = vmatpush3.bf16.msra.mxu1 %v916_v19  ;;  %877 = vmatpush3.bf16.msra.mxu0 %v917_v22 }
  0x1c   :  { %838 = vmatprep.subr.bf16.mxu1 %v920_v0  ;;  %878 = vmatprep.subr.bf16.mxu0 %v920_v0 }
  0x1f   :  { %839 = vmatpush3.bf16.msra.mxu1 %v918_v27  ;;  %879 = vmatpush3.bf16.msra.mxu0 %v919_v30 }
  0x22   :  { %841 = vmatmul.mubr.msk.bf16.vlgmr.msra.gmra.mxu1 %vm112_vm1, %v750_v31  ;;  %881 = vmatmul.mubr.msk.bf16.vlgmr.msra.gmra.mxu0 %vm112_vm1, %v772_v32 }
  0x23   :  { %844 = vmatprep.mubr.msk.bf16.mxu1 %vm921_vm0, %v920_v0  ;;  %884 = vmatprep.mubr.msk.bf16.mxu0 %vm921_vm0, %v920_v0 }
  0x2a   :  { %845 = vmatmul.mubr.msk.bf16.gmra.mxu1 %vm112_vm1, %v751_v41  ;;  %885 = vmatmul.mubr.msk.bf16.gmra.mxu0 %vm112_vm1, %v773_v42 }
  0x2b   :  { %848 = vmatprep.mubr.msk.bf16.mxu1 %vm921_vm0, %v920_v0  ;;  %888 = vmatprep.mubr.msk.bf16.mxu0 %vm921_vm0, %v920_v0 }
  0x32   :  { %849 = vmatmul.mubr.msk.bf16.gmra.mxu1 %vm112_vm1, %v752_v51  ;;  %889 = vmatmul.mubr.msk.bf16.gmra.mxu0 %vm112_vm1, %v774_v52 }
  0x33   :  { %852 = vmatprep.mubr.msk.bf16.mxu1 %vm921_vm0, %v920_v0  ;;  %892 = vmatprep.mubr.msk.bf16.mxu0 %vm921_vm0, %v920_v0 }
  0x3a   :  { %853 = vmatmul.mubr.msk.bf16.gmra.mxu1 %vm112_vm1, %v753_v61  ;;  %893 = vmatmul.mubr.msk.bf16.gmra.mxu0 %vm112_vm1, %v775_v62 }
  0x3b   :  { %856 = vmatprep.mubr.msk.bf16.mxu1 %vm921_vm0, %v920_v0  ;;  %896 = vmatprep.mubr.msk.bf16.mxu0 %vm921_vm0, %v920_v0  ;;  %v315_v0 = vshrl.u32 %v314_v11, 7 }
  0x3d   :  { %v316_v19 = vsub.s32 0, %v315_v0  ;;  %v330_v24 = vsub.s32 1, %v315_v0 }
  0x3f   :  { %v1210_v23 = vrot.slane %v82_v20, %v316_v19  ;;  %v1213_v27 = vrot.slane %v419_v21, %v316_v19  ;;  %v1217_v32 = vrot.slane %v82_v20, %v330_v24  ;;  %v1220_v35 = vrot.slane %v419_v21, %v330_v24 }
  0x42   :  { %857 = vmatmul.mubr.msk.bf16.gmra.mxu1 %vm112_vm1, %v754_v9  ;;  %897 = vmatmul.mubr.msk.bf16.gmra.mxu0 %vm112_vm1, %v776_v13 }
  0xd2   :  { %v1196_v8 = vpop.f32.mrf.mxu1  ;;  %v1198_v10 = vpop.f32.mrf.mxu0 }
  0xd4   :  { %v830_v14 = vpop.f32.mrf.mxu1  ;;  %v870_v15 = vpop.f32.mrf.mxu0 }
  0xd6   :  { %v1200_v16 = vpop.f32.mrf.mxu1  ;;  %v1202_v17 = vpop.f32.mrf.mxu0 }
  0xd8   :  { %v831_v12 = vpop.f32.mrf.mxu1  ;;  %v871_v18 = vpop.f32.mrf.mxu0 }
  0xe2   :  { %v265_v22 = vpop.f32.mrf.mxu1  ;;  %v601_v26 = vpop.f32.mrf.mxu0 }
  0xe3   :  { %v304_v25 = vadd.f32 %v265_v22, %v1196_v8  ;;  %v640_v28 = vadd.f32 %v601_v26, %v1198_v10 }
  0xe4   :  { %v842_v29 = vpop.f32.mrf.mxu1  ;;  %v882_v30 = vpop.f32.mrf.mxu0 }
  0xe5   :  { %v318_v31 = vmul.f32 %v1210_v23, %v304_v25  ;;  %v654_v34 = vmul.f32 %v1213_v27, %v640_v28 }
  0xe6   :  { %v268_v33 = vpop.f32.mrf.mxu1  ;;  %v604_v37 = vpop.f32.mrf.mxu0 }
  0xe7   :  { %v305_v36 = vadd.f32 %v268_v33, %v1200_v16  ;;  %v641_v38 = vadd.f32 %v604_v37, %v1202_v17  ;;  %v332_v41 = vadd.f32 %v1217_v32, %v318_v31  ;;  %v668_v43 = vadd.f32 %v1220_v35, %v654_v34 }
  0xe8   :  { %v843_v39 = vpop.f32.mrf.mxu1  ;;  %v883_v40 = vpop.f32.mrf.mxu0 }
  0xe9   :  { %v319_v44 = vmul.f32 %v1210_v23, %v305_v36  ;;  %v655_v47 = vmul.f32 %v1213_v27, %v641_v38  ;;  %v352_v52 = vmul.f32 0.2, %v332_v41  ;;  %vm342_vm2 = vcmp.ge.f32.partialorder %v332_v41, 0.0 }
  0xea   :  { %v273_v42 = vpop.f32.mrf.mxu1  ;;  %v609_v46 = vpop.f32.mrf.mxu0  ;;  %v688_v54 = vmul.f32 0.2, %v668_v43  ;;  %vm678_vm3 = vcmp.ge.f32.partialorder %v668_v43, 0.0 }
  0xeb   :  { %v306_v45 = vadd.f32 %v273_v42, %v1196_v8  ;;  %v642_v48 = vadd.f32 %v609_v46, %v1198_v10  ;;  %v333_v55 = vadd.f32 %v1217_v32, %v319_v44  ;;  %v669_v58 = vadd.f32 %v1220_v35, %v655_v47 }
  0xec   :  { %v846_v49 = vpop.f32.mrf.mxu1  ;;  %v886_v51 = vpop.f32.mrf.mxu0  ;;  %v362_v63 = vsel %vm342_vm2, %v332_v41, %v352_v52  ;;  %v698_v3 = vsel %vm678_vm3, %v668_v43, %v688_v54  ;;  %vm398_vm3 = vcmask 519168  }
  0xed   :  { %v320_v50 = vmul.f32 %v1210_v23, %v306_v45  ;;  %v656_v59 = vmul.f32 %v1213_v27, %v642_v48  ;;  %v353_v4 = vmul.f32 0.2, %v333_v55  ;;  %vm343_vm4 = vcmp.ge.f32.partialorder %v333_v55, 0.0 }
  0xee   :  { %v276_v53 = vpop.f32.mrf.mxu1  ;;  %v612_v57 = vpop.f32.mrf.mxu0  ;;  %v689_v9 = vmul.f32 0.2, %v669_v58  ;;  %v1242_v11 = vsel %vm112_vm1, %v362_v63, -inf  ;;  %vm679_vm5 = vcmp.ge.f32.partialorder %v669_v58, 0.0  ;;  %v1246_v19 = vsel %vm112_vm1, %v698_v3, -inf }
  0xef   :  { %v307_v56 = vadd.f32 %v276_v53, %v1200_v16  ;;  %v334_v61 = vadd.f32 %v1217_v32, %v320_v50  ;;  %v643_v1 = vadd.f32 %v612_v57, %v1202_v17  ;;  %v670_v13 = vadd.f32 %v1220_v35, %v656_v59 }
  0xf0   :  { %v847_v60 = vpop.f32.mrf.mxu1  ;;  %v887_v62 = vpop.f32.mrf.mxu0  ;;  %v363_v24 = vsel %vm343_vm4, %v333_v55, %v353_v4  ;;  %v699_v30 = vsel %vm679_vm5, %v669_v58, %v689_v9 }
  0xf1   :  { %v321_v5 = vmul.f32 %v1210_v23, %v307_v56  ;;  %v354_v12 = vmul.f32 0.2, %v334_v61  ;;  %vm344_vm6 = vcmp.ge.f32.partialorder %v334_v61, 0.0  ;;  %v657_v20 = vmul.f32 %v1213_v27, %v643_v1 }
  0xf2   :  { %v281_v2 = vpop.f32.mrf.mxu1  ;;  %v617_v7 = vpop.f32.mrf.mxu0  ;;  %v690_v31 = vmul.f32 0.2, %v670_v13  ;;  %v1259_v45 = vsel %vm112_vm1, %v363_v24, -inf  ;;  %vm680_vm9 = vcmp.ge.f32.partialorder %v670_v13, 0.0  ;;  %v1265_v53 = vsel %vm112_vm1, %v699_v30, -inf }
  0xf3   :  { %v308_v6 = vadd.f32 %v281_v2, %v1196_v8  ;;  %v644_v14 = vadd.f32 %v617_v7, %v1198_v10  ;;  %v335_v25 = vadd.f32 %v1217_v32, %v321_v5  ;;  %v364_v37 = vsel %vm344_vm6, %v334_v61, %v354_v12 }
  0xf4   :  { %v850_v15 = vpop.f32.mrf.mxu1  ;;  %v890_v0 = vpop.f32.mrf.mxu0  ;;  %v671_v41 = vadd.f32 %v1220_v35, %v657_v20  ;;  %v1268_v54 = vsel %vm112_vm1, %v364_v37, -inf  ;;  %v700_v58 = vsel %vm680_vm9, %v670_v13, %v690_v31 }
  0xf5   :  { %v322_v18 = vmul.f32 %v1210_v23, %v308_v6  ;;  %v658_v21 = vmul.f32 %v1213_v27, %v644_v14  ;;  %v355_v46 = vmul.f32 0.2, %v335_v25  ;;  %vm345_vm10 = vcmp.ge.f32.partialorder %v335_v25, 0.0 }
  0xf6   :  { %v284_v22 = vpop.f32.mrf.mxu1  ;;  %v620_v29 = vpop.f32.mrf.mxu0  ;;  %vm681_vm11 = vcmp.ge.f32.partialorder %v671_v41, 0.0  ;;  %v691_v59 = vmul.f32 0.2, %v671_v41 }
  0xf7   :  { %v336_v26 = vadd.f32 %v1217_v32, %v322_v18  ;;  %v309_v28 = vadd.f32 %v284_v22, %v1200_v16  ;;  %v672_v33 = vadd.f32 %v1220_v35, %v658_v21  ;;  %v645_v34 = vadd.f32 %v620_v29, %v1202_v17 }
  0xf8   :  { %v851_v36 = vpop.f32.mrf.mxu1  ;;  %v891_v40 = vpop.f32.mrf.mxu0  ;;  %v365_v62 = vsel %vm345_vm10, %v335_v25, %v355_v46 }
  0xf9   :  { %vm346_vm7 = vcmp.ge.f32.partialorder %v336_v26, 0.0  ;;  %v356_v38 = vmul.f32 0.2, %v336_v26  ;;  %v323_v39 = vmul.f32 %v1210_v23, %v309_v28  ;;  %vm682_vm8 = vcmp.ge.f32.partialorder %v672_v33, 0.0 }
  0xfa   :  { %v692_v42 = vmul.f32 0.2, %v672_v33  ;;  %v659_v43 = vmul.f32 %v1213_v27, %v645_v34  ;;  %v289_v44 = vpop.f32.mrf.mxu1  ;;  %v625_v48 = vpop.f32.mrf.mxu0  ;;  %v1290_v28 = vsel %vm112_vm1, %v365_v62, -inf }
  0xfb   :  { %v310_v47 = vadd.f32 %v289_v44, %v1196_v8  ;;  %v366_v49 = vsel %vm346_vm7, %v336_v26, %v356_v38  ;;  %v337_v50 = vadd.f32 %v1217_v32, %v323_v39  ;;  %v646_v51 = vadd.f32 %v625_v48, %v1198_v10 }
  0xfc   :  { %v854_v52 = vpop.f32.mrf.mxu1  ;;  %v702_v55 = vsel %vm682_vm8, %v672_v33, %v692_v42  ;;  %v673_v56 = vadd.f32 %v1220_v35, %v659_v43  ;;  %v894_v57 = vpop.f32.mrf.mxu0  ;;  %v1274_v63 = vsel %vm112_vm1, %v366_v49, -inf  ;;  %v709_v26 = vsel %vm112_vm1, %v700_v58, -inf }
  0xfd   :  { %v324_v60 = vmul.f32 %v1210_v23, %v310_v47  ;;  %v660_v1 = vmul.f32 %v1213_v27, %v646_v51  ;;  %v1279_v4 = vsel %vm112_vm1, %v702_v55, -inf  ;;  %v357_v5 = vmul.f32 0.2, %v337_v50 }
  0xfe   :  { %v292_v61 = vpop.f32.mrf.mxu1  ;;  %v628_v3 = vpop.f32.mrf.mxu0  ;;  %vm347_vm12 = vcmp.ge.f32.partialorder %v337_v50, 0.0  ;;  %v693_v13 = vmul.f32 0.2, %v673_v56  ;;  %vm683_vm13 = vcmp.ge.f32.partialorder %v673_v56, 0.0  ;;  %v701_v33 = vsel %vm681_vm11, %v671_v41, %v691_v59 }
  0xff   :  { %v311_v2 = vadd.f32 %v292_v61, %v1200_v16  ;;  %v338_v6 = vadd.f32 %v1217_v32, %v324_v60  ;;  %v647_v7 = vadd.f32 %v628_v3, %v1202_v17  ;;  %v674_v14 = vadd.f32 %v1220_v35, %v660_v1 }
 0x100   :  { %v855_v9 = vpop.f32.mrf.mxu1  ;;  %v895_v12 = vpop.f32.mrf.mxu0  ;;  %v367_v29 = vsel %vm347_vm12, %v337_v50, %v357_v5  ;;  %v703_v34 = vsel %vm683_vm13, %v673_v56, %v693_v13  ;;  %v375_v38 = vmax.f32 %v1242_v11, %v1274_v63  ;;  %v711_v39 = vmax.f32 %v1246_v19, %v1279_v4 }
 0x101   :  { %v325_v15 = vmul.f32 %v1210_v23, %v311_v2  ;;  %vm348_vm14 = vcmp.ge.f32.partialorder %v338_v6, 0.0  ;;  %v358_v18 = vmul.f32 0.2, %v338_v6  ;;  %v661_v0 = vmul.f32 %v1213_v27, %v647_v7 }
 0x102   :  { %v297_v20 = vpop.f32.mrf.mxu1  ;;  %vm684_vm15 = vcmp.ge.f32.partialorder %v674_v14, 0.0  ;;  %v694_v21 = vmul.f32 0.2, %v674_v14  ;;  %v633_v25 = vpop.f32.mrf.mxu0  ;;  %v383_v43 = vsel %vm112_vm1, %v367_v29, -inf  ;;  %v719_v47 = vsel %vm112_vm1, %v703_v34, -inf }
 0x103   :  { %v339_v22 = vadd.f32 %v1217_v32, %v325_v15  ;;  %v312_v24 = vadd.f32 %v297_v20, %v1196_v8  ;;  %v648_v30 = vadd.f32 %v633_v25, %v1198_v10  ;;  %v368_v36 = vsel %vm348_vm14, %v338_v6, %v358_v18 }
 0x104   :  { %v858_v31 = vpop.f32.mrf.mxu1  ;;  %v675_v37 = vadd.f32 %v1220_v35, %v661_v0  ;;  %v898_v8 = vpop.f32.mrf.mxu0  ;;  %v704_v40 = vsel %vm684_vm15, %v674_v14, %v694_v21  ;;  %v376_v48 = vsel %vm112_vm1, %v368_v36, -inf  ;;  %v384_v9 = vmax.f32 %v1259_v45, %v383_v43 }
 0x105   :  { %v359_v42 = vmul.f32 0.2, %v339_v22  ;;  %vm349_vm0 = vcmp.ge.f32.partialorder %v339_v22, 0.0  ;;  %v326_v41 = vmul.f32 %v1210_v23, %v312_v24  ;;  %v662_v44 = vmul.f32 %v1213_v27, %v648_v30 }
 0x106   :  { %v300_v10 = vpop.f32.mrf.mxu1  ;;  %v636_v46 = vpop.f32.mrf.mxu0  ;;  %v712_v50 = vsel %vm112_vm1, %v704_v40, -inf  ;;  %v695_v51 = vmul.f32 0.2, %v675_v37  ;;  %vm685_vm2 = vcmp.ge.f32.partialorder %v675_v37, 0.0  ;;  %v377_v60 = vmax.f32 %v1268_v54, %v376_v48 }
 0x107   :  { %v313_v11 = vadd.f32 %v300_v10, %v1200_v16  ;;  %v649_v19 = vadd.f32 %v636_v46, %v1202_v17  ;;  %v340_v52 = vadd.f32 %v1217_v32, %v326_v41  ;;  %v676_v55 = vadd.f32 %v1220_v35, %v662_v44 }
 0x108   :  { %v859_v49 = vpop.f32.mrf.mxu1  ;;  %v899_v56 = vpop.f32.mrf.mxu0  ;;  %v369_v57 = vsel %vm349_vm0, %v339_v22, %v359_v42  ;;  %v713_v61 = vmax.f32 %v709_v26, %v712_v50  ;;  %v705_v2 = vsel %vm685_vm2, %v675_v37, %v695_v51  ;;  %v718_v0 = vsel %vm112_vm1, %v701_v33, -inf }
 0x109   :  { %v327_v58 = vmul.f32 %v1210_v23, %v313_v11  ;;  %v663_v59 = vmul.f32 %v1213_v27, %v649_v19  ;;  %vm350_vm4 = vcmp.ge.f32.partialorder %v340_v52, 0.0  ;;  %v360_v16 = vmul.f32 0.2, %v340_v52 }
 0x10a   :  { %vm686_vm5 = vcmp.ge.f32.partialorder %v676_v55, 0.0  ;;  %v696_v17 = vmul.f32 0.2, %v676_v55  ;;  %v385_v1 = vsel %vm112_vm1, %v369_v57, -inf }
 0x10b   :  { %v341_v62 = vadd.f32 %v1217_v32, %v327_v58  ;;  %v677_v63 = vadd.f32 %v1220_v35, %v663_v59  ;;  %v370_v3 = vsel %vm350_vm4, %v340_v52, %v360_v16  ;;  %v720_v32 = vmax.f32 %v1265_v53, %v719_v47 }
 0x10c   :  { %v706_v4 = vsel %vm686_vm5, %v676_v55, %v696_v17  ;;  %v378_v23 = vsel %vm112_vm1, %v370_v3, -inf  ;;  %v721_v35 = vsel %vm112_vm1, %v705_v2, -inf  ;;  %v386_v20 = vmax.f32 %v1290_v28, %v385_v1 }
 0x10d   :  { %v714_v27 = vsel %vm112_vm1, %v706_v4, -inf  ;;  %vm351_vm6 = vcmp.ge.f32.partialorder %v341_v62, 0.0  ;;  %v361_v5 = vmul.f32 0.2, %v341_v62  ;;  %v379_v6 = vmax.f32 %v375_v38, %v378_v23 }
 0x10e   :  { %v715_v7 = vmax.f32 %v711_v39, %v714_v27  ;;  %vm687_vm7 = vcmp.ge.f32.partialorder %v677_v63, 0.0  ;;  %v697_v54 = vmul.f32 0.2, %v677_v63  ;;  %v722_v24 = vmax.f32 %v718_v0, %v721_v35 }
 0x10f   :  { %v371_v13 = vsel %vm351_vm6, %v341_v62, %v361_v5  ;;  %v380_v14 = vmax.f32 %v379_v6, %v377_v60 }
 0x110   :  { %v716_v15 = vmax.f32 %v715_v7, %v713_v61  ;;  %v387_v12 = vsel %vm112_vm1, %v371_v13, -inf  ;;  %v707_v18 = vsel %vm687_vm7, %v677_v63, %v697_v54 }
 0x111   :  { %v388_v21 = vmax.f32 %v384_v9, %v387_v12  ;;  %v723_v22 = vsel %vm112_vm1, %v707_v18, -inf  ;;  %v788_v25 = vpack.c.bf16 %v380_v14, %v380_v14 }
 0x112   :  { %v790_v45 = vpack.c.bf16 %v716_v15, %v716_v15  ;;  %v724_v26 = vmax.f32 %v720_v32, %v723_v22 }
 0x113   :  { %v389_v53 = vmax.f32 %v388_v21, %v386_v20  ;;  %399 = vst.msk [vmem:[%s1356_s12] sm:$0xf] %vm398_vm3, %v788_v25 }
 0x114   :  { %734 = vst.msk [vmem:[%s1357_s13] sm:$0xf] %vm398_vm3, %v790_v45  ;;  %v725_v29 = vmax.f32 %v724_v26, %v722_v24 }
 0x115   :  { %v789_v28 = vpack.c.bf16 %v389_v53, %v389_v53 }
 0x116   :  { %v791_v30 = vpack.c.bf16 %v725_v29, %v725_v29 }
 0x117   :  { %400 = vst.msk [vmem:[%s1356_s12 + $0x4] sm:$0xf] %vm398_vm3, %v789_v28 }
 0x118   :  { %735 = vst.msk [vmem:[%s1357_s13 + $0x4] sm:$0xf] %vm398_vm3, %v791_v30 }

// kernel: _sgnet_forward.15
= control target key start
LH: loop header
LB: loop body
LE: loop exit
PB: predicated region body
PF: predicated region fallthrough
CT: control target
= control target key end

     0   :  { %s2774_s0 = inlined_call_operand.vmem [shape: bf16[16,64], index: 0, kind: input, shape index: {}]   ;;  %s2775_s1 = inlined_call_operand.vmem [shape: bf16[16,64], index: 1, kind: input, shape index: {}]   ;;  %s2776_s2 = inlined_call_operand.vmem [shape: bf16[16,64], index: 2, kind: input, shape index: {}]   ;;  %s2777_s3 = inlined_call_operand.vmem [shape: bf16[16,64], index: 3, kind: input, shape index: {}]   ;;  %s2778_s4 = inlined_call_operand.vmem [shape: bf16[5,16,64], index: 4, kind: input, shape index: {}]   ;;  %s2779_s5 = inlined_call_operand.vmem [shape: bf16[5,16,64], index: 5, kind: input, shape index: {}]   ;;  %s2780_s6 = inlined_call_operand.vmem [shape: s32[16,5], index: 6, kind: input, shape index: {}]   ;;  %s2781_s7 = inlined_call_operand.vmem [shape: s32[16,5], index: 7, kind: input, shape index: {}]   ;;  %s2782_s8 = inlined_call_operand.vmem [shape: bf16[64,128], index: 8, kind: input, shape index: {}]   ;;  %s2783_s9 = inlined_call_operand.vmem [shape: bf16[64,128], index: 9, kind: input, shape index: {}]   ;;  %s2784_s10 = inlined_call_operand.vmem [shape: f32[2,128], index: 10, kind: input, shape index: {}]   ;;  %s2785_s11 = inlined_call_operand.vmem [shape: bf16[64,128], index: 11, kind: input, shape index: {}]   ;;  %s2786_s12 = inlined_call_operand.vmem [shape: bf16[64,128], index: 12, kind: input, shape index: {}]   ;;  %s2787_s13 = inlined_call_operand.vmem [shape: f32[2,128], index: 13, kind: input, shape index: {}]   ;;  %s2788_s14 = inlined_call_operand.vmem [shape: bf16[256,128], index: 14, kind: input, shape index: {}]   ;;  %s2789_s15 = inlined_call_operand.vmem [shape: f32[2,128], index: 15, kind: input, shape index: {}]   ;;  %s2790_s16 = inlined_call_operand.vmem [shape: bf16[256,128], index: 16, kind: input, shape index: {}]   ;;  %s2791_s17 = inlined_call_operand.vmem [shape: f32[2,128], index: 17, kind: input, shape index: {}]   ;;  %s2792_s18 = inlined_call_operand.vmem [shape: bf16[256,256], index: 18, kind: input, shape index: {}]   ;;  %s2793_s19 = inlined_call_operand.vmem [shape: f32[2,256], index: 19, kind: input, shape index: {}]   ;;  %s2794_s20 = inlined_call_operand.hbm [shape: f32[16,256], index: 20, kind: output, shape index: {}]  }
   0x1   :  { %2798 = sst [smem:[#allocation5_spill]] %s2774_s0 }
   0x2   :  { %2799 = sst [smem:[#allocation6_spill]] %s2775_s1 }
   0x3   :  { %2800 = sst [smem:[#allocation7_spill]] %s2776_s2 }
   0x4   :  { %2801 = sst [smem:[#allocation8_spill]] %s2777_s3 }
   0x5   :  { %2802 = sst [smem:[#allocation9_spill]] %s2778_s4 }
   0x6   :  { %v1992_v0 = vld [vmem:[%s2783_s9 + $0x18] sm:$0xff]   ;;  %v2114_v1 = vmov 0.0   ;;  %v1994_v3 = vld [vmem:[%s2783_s9 + $0x10] sm:$0xff]   ;;  %vm2115_vm0 = vmmov 0   ;;  %v1996_v5 = vld [vmem:[%s2783_s9 + $0x8] sm:$0xff]   ;;  %s2803_s28 = sld [smem:[#allocation6_spill]] }
   0x7   :  { %1818 = vmatprep.subr.bf16.mxu0 %v2114_v1  ;;  %1830 = vmatprep.subr.bf16.mxu1 %v2114_v1  ;;  %v1993_v2 = vld [vmem:[%s2782_s8 + $0x18] sm:$0xff]   ;;  %v1995_v4 = vld [vmem:[%s2782_s8 + $0x10] sm:$0xff]   ;;  %v1997_v6 = vld [vmem:[%s2782_s8 + $0x8] sm:$0xff]   ;;  %s2804_s1 = sld [smem:[#allocation9_spill]]  ;;  %vm141_vm1 = vcmask 523264  }
   0x8   :  { %1819 = vmatpush3.bf16.msra.mxu0 %v1992_v0  ;;  %1826 = vmatprep.mubr.msk.bf16.mxu0 %vm2115_vm0, %v2114_v1  ;;  %v1998_v11 = vld [vmem:[%s2783_s9] sm:$0xff]   ;;  %v2001_v17 = vld [vmem:[%s2786_s12 + $0x18] sm:$0xff]   ;;  %v2002_v20 = vld [vmem:[%s2786_s12 + $0x10] sm:$0xff]   ;;  %s2805_s25 = sld [smem:[#allocation8_spill]] }
   0x9   :  { %1831 = vmatpush3.bf16.msra.mxu1 %v1993_v2  ;;  %1820 = vmatprep.subr.bf16.mxu0 %v2114_v1  ;;  %v1999_v14 = vld [vmem:[%s2782_s8] sm:$0xff]   ;;  %v2003_v24 = vld [vmem:[%s2786_s12 + $0x8] sm:$0xff]   ;;  %v2010_v28 = vld [vmem:[%s2788_s14 + $0x38] sm:$0xff]  }
   0xa   :  { %1832 = vmatprep.subr.bf16.mxu1 %v2114_v1  ;;  %1838 = vmatprep.mubr.msk.bf16.mxu1 %vm2115_vm0, %v2114_v1  ;;  %v2004_v27 = vld [vmem:[%s2786_s12] sm:$0xff]   ;;  %v2011_v33 = vld [vmem:[%s2788_s14 + $0x30] sm:$0xff]   ;;  %v2006_v34 = vld [vmem:[%s2785_s11 + $0x18] sm:$0xff]  }
   0xb   :  { %v2012_v39 = vld [vmem:[%s2788_s14 + $0x28] sm:$0xff]   ;;  %v2007_v40 = vld [vmem:[%s2785_s11 + $0x10] sm:$0xff]   ;;  %v2013_v43 = vld [vmem:[%s2788_s14 + $0x20] sm:$0xff]  }
   0xc   :  { %1821 = vmatpush3.bf16.msra.mxu0 %v1994_v3  ;;  %v2256_v7 = vld [vmem:[%s2803_s28] sm:$0xf]  ;;  %v2261_v8 = vld [vmem:[%s2803_s28 + $0x4] sm:$0xf]  ;;  %v2008_v44 = vld [vmem:[%s2785_s11 + $0x8] sm:$0xff]  }
   0xd   :  { %1833 = vmatpush3.bf16.msra.mxu1 %v1995_v4  ;;  %1822 = vmatprep.subr.bf16.mxu0 %v2114_v1  ;;  %v75_v9 = vld [vmem:[%s2804_s1] sm:$0xf]  ;;  %v76_v10 = vld [vmem:[%s2804_s1 + $0x4] sm:$0xf]  ;;  %v2281_v15 = vcombine.low %v2256_v7, %v2261_v8  ;;  %v77_v18 = vld [vmem:[%s2804_s1 + $0x8] sm:$0xf] }
   0xe   :  { %1834 = vmatprep.subr.bf16.mxu1 %v2114_v1  ;;  %v186_v12 = vsub.bf16 %v75_v9, %v2256_v7  ;;  %v187_v13 = vsub.bf16 %v76_v10, %v2261_v8  ;;  %v78_v19 = vld [vmem:[%s2804_s1 + $0xc] sm:$0xf]  ;;  %v188_v21 = vsub.bf16 %v77_v18, %v2256_v7  ;;  %v79_v25 = vld [vmem:[%s2804_s1 + $0x10] sm:$0xf]  ;;  %v80_v26 = vld [vmem:[%s2804_s1 + $0x14] sm:$0xf] }
   0xf   :  { %v189_v22 = vsub.bf16 %v78_v19, %v2261_v8  ;;  %v2326_v29 = vld [vmem:[%s2805_s25] sm:$0xf]  ;;  %v190_v30 = vsub.bf16 %v79_v25, %v2256_v7  ;;  %v191_v31 = vsub.bf16 %v80_v26, %v2261_v8  ;;  %v2334_v32 = vld [vmem:[%s2805_s25 + $0x4] sm:$0xf]  ;;  %v81_v36 = vld [vmem:[%s2804_s1 + $0x18] sm:$0xf] }
  0x10   :  { %1823 = vmatpush3.bf16.msra.mxu0 %v1996_v5  ;;  %v1648_v16 = vcombine.low %v186_v12, %v187_v13  ;;  %v2347_v35 = vcombine.low %v2326_v29, %v2334_v32  ;;  %v82_v37 = vld [vmem:[%s2804_s1 + $0x1c] sm:$0xf]  ;;  %v192_v41 = vsub.bf16 %v81_v36, %v2256_v7  ;;  %v85_v45 = vld [vmem:[%s2779_s5] sm:$0xf]  ;;  %v86_v46 = vld [vmem:[%s2779_s5 + $0x4] sm:$0xf] }
  0x11   :  { %1835 = vmatpush3.bf16.msra.mxu1 %v1997_v6  ;;  %1824 = vmatprep.subr.bf16.mxu0 %v2114_v1  ;;  %v1649_v23 = vcombine.low %v188_v21, %v189_v22  ;;  %v1650_v38 = vcombine.low %v190_v30, %v191_v31  ;;  %v193_v42 = vsub.bf16 %v82_v37, %v2261_v8  ;;  %v83_v47 = vld [vmem:[%s2804_s1 + $0x20] sm:$0xf]  ;;  %v84_v48 = vld [vmem:[%s2804_s1 + $0x24] sm:$0xf]  ;;  %v87_v55 = vld [vmem:[%s2779_s5 + $0x8] sm:$0xf] }
  0x12   :  { %1836 = vmatprep.subr.bf16.mxu1 %v2114_v1  ;;  %v2009_v50 = vld [vmem:[%s2785_s11] sm:$0xff]   ;;  %v499_v51 = vsub.bf16 %v85_v45, %v2326_v29  ;;  %v500_v52 = vsub.bf16 %v86_v46, %v2334_v32  ;;  %v194_v53 = vsub.bf16 %v83_v47, %v2256_v7  ;;  %v195_v54 = vsub.bf16 %v84_v48, %v2261_v8  ;;  %v88_v56 = vld [vmem:[%s2779_s5 + $0xc] sm:$0xf]  ;;  %v89_v61 = vld [vmem:[%s2779_s5 + $0x10] sm:$0xf] }
  0x13   :  { %v1651_v49 = vcombine.low %v192_v41, %v193_v42  ;;  %v501_v59 = vsub.bf16 %v87_v55, %v2326_v29  ;;  %v502_v60 = vsub.bf16 %v88_v56, %v2334_v32  ;;  %v90_v62 = vld [vmem:[%s2779_s5 + $0x14] sm:$0xf]  ;;  %v503_v0 = vsub.bf16 %v89_v61, %v2326_v29 }
  0x14   :  { %1825 = vmatpush3.bf16.msra.mxu0 %v1998_v11  ;;  %v1668_v57 = vcombine.low %v499_v51, %v500_v52  ;;  %v1652_v58 = vcombine.low %v194_v53, %v195_v54  ;;  %v504_v2 = vsub.bf16 %v90_v62, %v2334_v32 }
  0x15   :  { %1837 = vmatpush3.bf16.msra.mxu1 %v1999_v14  ;;  %1858 = vmatprep.subr.bf16.mxu0 %v2114_v1  ;;  %v1669_v63 = vcombine.low %v501_v59, %v502_v60 }
  0x16   :  { %1898 = vmatprep.subr.bf16.mxu1 %v2114_v1 }
  0x17   :  { %1827 = vmatmul.mubr.msk.bf16.vlgmr.msra.gmra.mxu0 %vm141_vm1, %v2281_v15 }
  0x18   :  { %1839 = vmatmul.mubr.msk.bf16.vlgmr.msra.gmra.mxu1 %vm141_vm1, %v1648_v16  ;;  %1859 = vmatpush3.bf16.msra.mxu0 %v2001_v17 }
  0x19   :  { %1860 = vmatprep.subr.bf16.mxu0 %v2114_v1  ;;  %1842 = vmatprep.mubr.msk.bf16.mxu1 %vm2115_vm0, %v2114_v1 }
  0x1a   :  { %1866 = vmatprep.mubr.msk.bf16.mxu0 %vm2115_vm0, %v2114_v1  ;;  %1899 = vmatpush3.bf16.msra.mxu1 %v2010_v28 }
  0x1b   :  { %1900 = vmatprep.subr.bf16.mxu1 %v2114_v1 }
  0x1c   :  { %1861 = vmatpush3.bf16.msra.mxu0 %v2002_v20 }
  0x1d   :  { %1862 = vmatprep.subr.bf16.mxu0 %v2114_v1 }
  0x1e   :  { %1901 = vmatpush3.bf16.msra.mxu1 %v2011_v33 }
  0x1f   :  { %1902 = vmatprep.subr.bf16.mxu1 %v2114_v1 }
  0x20   :  { %1843 = vmatmul.mubr.msk.bf16.gmra.mxu1 %vm141_vm1, %v1649_v23  ;;  %1863 = vmatpush3.bf16.msra.mxu0 %v2003_v24 }
  0x21   :  { %1864 = vmatprep.subr.bf16.mxu0 %v2114_v1  ;;  %1846 = vmatprep.mubr.msk.bf16.mxu1 %vm2115_vm0, %v2114_v1 }
  0x22   :  { %1903 = vmatpush3.bf16.msra.mxu1 %v2012_v39 }
  0x23   :  { %1904 = vmatprep.subr.bf16.mxu1 %v2114_v1 }
  0x24   :  { %1865 = vmatpush3.bf16.msra.mxu0 %v2004_v27 }
  0x25   :  { %1870 = vmatprep.subr.bf16.mxu0 %v2114_v1 }
  0x26   :  { %1905 = vmatpush3.bf16.msra.mxu1 %v2013_v43 }
  0x27   :  { %1867 = vmatmul.mubr.msk.bf16.vlgmr.msra.gmra.mxu0 %vm141_vm1, %v2347_v35  ;;  %1910 = vmatprep.subr.bf16.mxu1 %v2114_v1 }
  0x28   :  { %1847 = vmatmul.mubr.msk.bf16.gmra.mxu1 %vm141_vm1, %v1650_v38  ;;  %1871 = vmatpush3.bf16.msra.mxu0 %v2006_v34 }
  0x29   :  { %1872 = vmatprep.subr.bf16.mxu0 %v2114_v1  ;;  %1850 = vmatprep.mubr.msk.bf16.mxu1 %vm2115_vm0, %v2114_v1 }
  0x2a   :  { %1878 = vmatprep.mubr.msk.bf16.mxu0 %vm2115_vm0, %v2114_v1 }
  0x2c   :  { %1873 = vmatpush3.bf16.msra.mxu0 %v2007_v40 }
  0x2d   :  { %1874 = vmatprep.subr.bf16.mxu0 %v2114_v1 }
  0x30   :  { %1851 = vmatmul.mubr.msk.bf16.gmra.mxu1 %vm141_vm1, %v1651_v49  ;;  %1875 = vmatpush3.bf16.msra.mxu0 %v2008_v44 }
  0x31   :  { %1876 = vmatprep.subr.bf16.mxu0 %v2114_v1  ;;  %1854 = vmatprep.mubr.msk.bf16.mxu1 %vm2115_vm0, %v2114_v1 }
  0x34   :  { %1877 = vmatpush3.bf16.msra.mxu0 %v2009_v50 }
  0x35   :  { %1922 = vmatprep.subr.bf16.mxu0 %v2114_v1 }
  0x37   :  { %1879 = vmatmul.mubr.msk.bf16.vlgmr.msra.gmra.mxu0 %vm141_vm1, %v1668_v57 }
  0x38   :  { %1855 = vmatmul.mubr.msk.bf16.gmra.mxu1 %vm141_vm1, %v1652_v58  ;;  %1882 = vmatprep.mubr.msk.bf16.mxu0 %vm2115_vm0, %v2114_v1 }
  0x39   :  { %1906 = vmatprep.mubr.msk.bf16.mxu1 %vm2115_vm0, %v2114_v1 }
  0x3f   :  { %1883 = vmatmul.mubr.msk.bf16.gmra.mxu0 %vm141_vm1, %v1669_v63 }
  0x40   :  { %1886 = vmatprep.mubr.msk.bf16.mxu0 %vm2115_vm0, %v2114_v1  ;;  %1907 = vmatmul.mubr.msk.bf16.vlgmr.msra.gmra.mxu1 %vm141_vm1, %v2281_v15 }
  0x41   :  { %25 = vsyncpa [#allocation3], 0  ;;  %1918 = vmatprep.mubr.msk.bf16.mxu1 %vm2115_vm0, %v2114_v1  ;;  %v1670_v3 = vcombine.low %v503_v0, %v504_v2  ;;  %v91_v4 = vld [vmem:[%s2779_s5 + $0x18] sm:$0xf]  ;;  %v92_v5 = vld [vmem:[%s2779_s5 + $0x1c] sm:$0xf]  ;;  %v343_v50 = vlaneseq }
  0x42   :  { %v505_v6 = vsub.bf16 %v91_v4, %v2326_v29  ;;  %v506_v7 = vsub.bf16 %v92_v5, %v2334_v32  ;;  %v93_v9 = vld [vmem:[%s2779_s5 + $0x20] sm:$0xf]  ;;  %v94_v10 = vld [vmem:[%s2779_s5 + $0x24] sm:$0xf]  ;;  %v2014_v14 = vld [vmem:[%s2788_s14 + $0x18] sm:$0xff]   ;;  %s2806_s7 = sld [smem:[#allocation5_spill]] }
  0x43   :  { %v507_v11 = vsub.bf16 %v93_v9, %v2326_v29  ;;  %v508_v12 = vsub.bf16 %v94_v10, %v2334_v32  ;;  %1911 = vmatpush3.bf16.msra.mxu1 %v2014_v14  ;;  %v2015_v15 = vld [vmem:[%s2788_s14 + $0x10] sm:$0xff]   ;;  %v2016_v16 = vld [vmem:[%s2788_s14 + $0x8] sm:$0xff]   ;;  %v2017_v17 = vld [vmem:[%s2788_s14] sm:$0xff]   ;;  %v2573_v54 = vshrl.u32 %v343_v50, 7  ;;  %s2807_s8 = sld [smem:[#allocation7_spill]] }
  0x44   :  { %v1671_v8 = vcombine.low %v505_v6, %v506_v7  ;;  %1912 = vmatprep.subr.bf16.mxu1 %v2114_v1  ;;  %v2019_v19 = vld [vmem:[%s2788_s14 + $0x78] sm:$0xff]   ;;  %v2020_v20 = vld [vmem:[%s2788_s14 + $0x70] sm:$0xff]   ;;  %v2021_v21 = vld [vmem:[%s2788_s14 + $0x68] sm:$0xff]  }
  0x45   :  { %v1672_v13 = vcombine.low %v507_v11, %v508_v12  ;;  %1923 = vmatpush3.bf16.msra.mxu0 %v2019_v19  ;;  %v2022_v22 = vld [vmem:[%s2788_s14 + $0x60] sm:$0xff]   ;;  %v2023_v23 = vld [vmem:[%s2790_s16 + $0x38] sm:$0xff]   ;;  %v2025_v25 = vld [vmem:[%s2790_s16 + $0x30] sm:$0xff]   ;;  %v2578_v59 = vsub.s32 0, %v2573_v54  ;;  %v2585_v4 = vsub.s32 1, %v2573_v54 }
  0x46   :  { %1924 = vmatprep.subr.bf16.mxu0 %v2114_v1  ;;  %v2024_v24 = vld [vmem:[%s2788_s14 + $0x58] sm:$0xff]   ;;  %v2026_v26 = vld [vmem:[%s2788_s14 + $0x50] sm:$0xff]   ;;  %v2027_v27 = vld [vmem:[%s2790_s16 + $0x28] sm:$0xff]  }
  0x47   :  { %1887 = vmatmul.mubr.msk.bf16.gmra.mxu0 %vm141_vm1, %v1670_v3  ;;  %1913 = vmatpush3.bf16.msra.mxu1 %v2015_v15  ;;  %v2028_v28 = vld [vmem:[%s2788_s14 + $0x48] sm:$0xff]   ;;  %v2029_v29 = vld [vmem:[%s2790_s16 + $0x20] sm:$0xff]   ;;  %v2032_v31 = vld [vmem:[%s2790_s16 + $0x78] sm:$0xff]  }
  0x48   :  { %1890 = vmatprep.mubr.msk.bf16.mxu0 %vm2115_vm0, %v2114_v1  ;;  %1914 = vmatprep.subr.bf16.mxu1 %v2114_v1  ;;  %v2018_v18 = vld [vmem:[%s2806_s7] sm:$0xff]   ;;  %v2034_v32 = vld [vmem:[%s2790_s16 + $0x70] sm:$0xff]   ;;  %v2036_v33 = vld [vmem:[%s2790_s16 + $0x68] sm:$0xff]  }
  0x49   :  { %1925 = vmatpush3.bf16.msra.mxu0 %v2020_v20  ;;  %v2030_v30 = vld [vmem:[%s2788_s14 + $0x40] sm:$0xff]   ;;  %v2041_v36 = vld [vmem:[%s2790_s16 + $0x50] sm:$0xff]   ;;  %v2042_v37 = vld [vmem:[%s2790_s16 + $0x48] sm:$0xff]  }
  0x4a   :  { %1926 = vmatprep.subr.bf16.mxu0 %v2114_v1  ;;  %v2038_v34 = vld [vmem:[%s2790_s16 + $0x60] sm:$0xff]   ;;  %v2046_v39 = vld [vmem:[%s2792_s18 + $0x74] ss:$8 sps:$4 sm:$0xff]  }
  0x4b   :  { %1915 = vmatpush3.bf16.msra.mxu1 %v2016_v16  ;;  %v2043_v38 = vld [vmem:[%s2790_s16 + $0x40] sm:$0xff]  }
  0x4c   :  { %1916 = vmatprep.subr.bf16.mxu1 %v2114_v1  ;;  %v111_v61 = vld [vmem:[%s2784_s10] sm:$0x3] }
  0x4d   :  { %1927 = vmatpush3.bf16.msra.mxu0 %v2021_v21  ;;  %v346_v3 = vrot.slane %v111_v61, %v2578_v59  ;;  %v360_v12 = vrot.slane %v111_v61, %v2585_v4 }
  0x4e   :  { %1928 = vmatprep.subr.bf16.mxu0 %v2114_v1 }
  0x4f   :  { %1891 = vmatmul.mubr.msk.bf16.gmra.mxu0 %vm141_vm1, %v1671_v8  ;;  %1917 = vmatpush3.bf16.msra.mxu1 %v2017_v17 }
  0x50   :  { %1894 = vmatprep.mubr.msk.bf16.mxu0 %vm2115_vm0, %v2114_v1  ;;  %1942 = vmatprep.subr.bf16.mxu1 %v2114_v1 }
  0x51   :  { %1929 = vmatpush3.bf16.msra.mxu0 %v2022_v22 }
  0x52   :  { %1919 = vmatmul.mubr.msk.bf16.vlgmr.msra.gmra.mxu1 %vm141_vm1, %v2018_v18  ;;  %1930 = vmatprep.subr.bf16.mxu0 %v2114_v1 }
  0x53   :  { %1950 = vmatprep.mubr.msk.bf16.mxu1 %vm2115_vm0, %v2114_v1  ;;  %1943 = vmatpush3.bf16.msra.mxu1 %v2023_v23 }
  0x54   :  { %1944 = vmatprep.subr.bf16.mxu1 %v2114_v1 }
  0x55   :  { %1931 = vmatpush3.bf16.msra.mxu0 %v2024_v24 }
  0x56   :  { %1932 = vmatprep.subr.bf16.mxu0 %v2114_v1 }
  0x57   :  { %1895 = vmatmul.mubr.msk.bf16.gmra.mxu0 %vm141_vm1, %v1672_v13  ;;  %1945 = vmatpush3.bf16.msra.mxu1 %v2025_v25 }
  0x58   :  { %1938 = vmatprep.mubr.msk.bf16.mxu0 %vm2115_vm0, %v2114_v1  ;;  %1946 = vmatprep.subr.bf16.mxu1 %v2114_v1 }
  0x59   :  { %1933 = vmatpush3.bf16.msra.mxu0 %v2026_v26 }
  0x5a   :  { %1934 = vmatprep.subr.bf16.mxu0 %v2114_v1 }
  0x5b   :  { %1947 = vmatpush3.bf16.msra.mxu1 %v2027_v27 }
  0x5c   :  { %1948 = vmatprep.subr.bf16.mxu1 %v2114_v1 }
  0x5d   :  { %1935 = vmatpush3.bf16.msra.mxu0 %v2028_v28 }
  0x5e   :  { %1936 = vmatprep.subr.bf16.mxu0 %v2114_v1 }
  0x5f   :  { %1949 = vmatpush3.bf16.msra.mxu1 %v2029_v29 }
  0x60   :  { %1966 = vmatprep.subr.bf16.mxu1 %v2114_v1 }
  0x61   :  { %1937 = vmatpush3.bf16.msra.mxu0 %v2030_v30 }
  0x62   :  { %1951 = vmatmul.mubr.msk.bf16.vlgmr.msra.gmra.mxu1 %vm141_vm1, %v2347_v35  ;;  %1954 = vmatprep.subr.bf16.mxu0 %v2114_v1  ;;  %v2040_v35 = vld [vmem:[%s2790_s16 + $0x58] sm:$0xff]  }
  0x63   :  { %1982 = vmatprep.mubr.msk.bf16.mxu1 %vm2115_vm0, %v2114_v1  ;;  %1967 = vmatpush3.bf16.msra.mxu1 %v2032_v31 }
  0x64   :  { %1968 = vmatprep.subr.bf16.mxu1 %v2114_v1 }
  0x67   :  { %1969 = vmatpush3.bf16.msra.mxu1 %v2034_v32 }
  0x68   :  { %1970 = vmatprep.subr.bf16.mxu1 %v2114_v1 }
  0x6b   :  { %1971 = vmatpush3.bf16.msra.mxu1 %v2036_v33 }
  0x6c   :  { %1972 = vmatprep.subr.bf16.mxu1 %v2114_v1 }
  0x6f   :  { %1973 = vmatpush3.bf16.msra.mxu1 %v2038_v34 }
  0x70   :  { %1974 = vmatprep.subr.bf16.mxu1 %v2114_v1 }
  0x73   :  { %1975 = vmatpush3.bf16.msra.mxu1 %v2040_v35 }
  0x74   :  { %1976 = vmatprep.subr.bf16.mxu1 %v2114_v1 }
  0x77   :  { %1977 = vmatpush3.bf16.msra.mxu1 %v2041_v36 }
  0x78   :  { %1978 = vmatprep.subr.bf16.mxu1 %v2114_v1 }
  0x7b   :  { %1979 = vmatpush3.bf16.msra.mxu1 %v2042_v37 }
  0x7c   :  { %1980 = vmatprep.subr.bf16.mxu1 %v2114_v1 }
  0x7f   :  { %1981 = vmatpush3.bf16.msra.mxu1 %v2043_v38 }
  0x80   :  { %1522 = vmatprep.subr.bf16.mxu1 %v2046_v39 }
  0xd7   :  { %v179_v40 = vpop.f32.mrf.mxu0 }
  0xd8   :  { %v294_v41 = vpop.f32.mrf.mxu1 }
  0xd9   :  { %v1828_v42 = vpop.f32.mrf.mxu0  ;;  %v333_v2 = vadd.f32 %v294_v41, %v179_v40 }
  0xda   :  { %v1840_v43 = vpop.f32.mrf.mxu1 }
  0xdb   :  { %v2569_v44 = vpop.f32.mrf.mxu0  ;;  %v347_v11 = vmul.f32 %v346_v3, %v333_v2 }
  0xdc   :  { %v297_v45 = vpop.f32.mrf.mxu1 }
  0xdd   :  { %v1829_v46 = vpop.f32.mrf.mxu0  ;;  %v334_v5 = vadd.f32 %v297_v45, %v2569_v44  ;;  %v361_v24 = vadd.f32 %v360_v12, %v347_v11 }
  0xde   :  { %v1841_v47 = vpop.f32.mrf.mxu1 }
  0xdf   :  { %v348_v13 = vmul.f32 %v346_v3, %v334_v5  ;;  %vm371_vm3 = vcmp.ge.f32.partialorder %v361_v24, 0.0  ;;  %v381_v38 = vmul.f32 0.2, %v361_v24 }
  0xe0   :  { %v302_v48 = vpop.f32.mrf.mxu1 }
  0xe1   :  { %v335_v14 = vadd.f32 %v302_v48, %v179_v40  ;;  %v362_v25 = vadd.f32 %v360_v12, %v348_v13 }
  0xe2   :  { %v1844_v49 = vpop.f32.mrf.mxu1 }
  0xe3   :  { %v349_v26 = vmul.f32 %v346_v3, %v335_v14  ;;  %vm372_vm4 = vcmp.ge.f32.partialorder %v362_v25, 0.0  ;;  %v382_v47 = vmul.f32 0.2, %v362_v25 }
  0xe4   :  { %v305_v51 = vpop.f32.mrf.mxu1 }
  0xe5   :  { %v336_v16 = vadd.f32 %v305_v51, %v2569_v44  ;;  %v363_v39 = vadd.f32 %v360_v12, %v349_v26  ;;  %v392_v5 = vsel %vm372_vm4, %v362_v25, %v382_v47 }
  0xe6   :  { %v1845_v52 = vpop.f32.mrf.mxu1 }
  0xe7   :  { %v2571_v53 = vpop.f32.mrf.mxu0  ;;  %v350_v28 = vmul.f32 %v346_v3, %v336_v16  ;;  %vm373_vm9 = vcmp.ge.f32.partialorder %v363_v39, 0.0 }
  0xe8   :  { %v310_v55 = vpop.f32.mrf.mxu1 }
  0xe9   :  { %v1868_v56 = vpop.f32.mrf.mxu0  ;;  %v337_v63 = vadd.f32 %v310_v55, %v179_v40  ;;  %v364_v42 = vadd.f32 %v360_v12, %v350_v28 }
  0xea   :  { %v1848_v57 = vpop.f32.mrf.mxu1 }
  0xeb   :  { %v2575_v58 = vpop.f32.mrf.mxu0  ;;  %v351_v8 = vmul.f32 %v346_v3, %v337_v63  ;;  %v391_v57 = vsel %vm371_vm3, %v361_v24, %v381_v38  ;;  %vm374_vm10 = vcmp.ge.f32.partialorder %v364_v42, 0.0 }
  0xec   :  { %v313_v60 = vpop.f32.mrf.mxu1 }
  0xed   :  { %v1869_v62 = vpop.f32.mrf.mxu0  ;;  %v338_v7 = vadd.f32 %v313_v60, %v2569_v44  ;;  %v365_v19 = vadd.f32 %v360_v12, %v351_v8  ;;  %v383_v60 = vmul.f32 0.2, %v363_v39 }
  0xee   :  { %v1849_v0 = vpop.f32.mrf.mxu1  ;;  %v384_v62 = vmul.f32 0.2, %v364_v42 }
  0xef   :  { %v352_v17 = vmul.f32 %v346_v3, %v338_v7  ;;  %v385_v32 = vmul.f32 0.2, %v365_v19  ;;  %vm375_vm2 = vcmp.ge.f32.partialorder %v365_v19, 0.0 }
  0xf0   :  { %v318_v6 = vpop.f32.mrf.mxu1  ;;  %v394_v16 = vsel %vm374_vm10, %v364_v42, %v384_v62 }
  0xf1   :  { %v339_v9 = vadd.f32 %v318_v6, %v179_v40  ;;  %v366_v29 = vadd.f32 %v360_v12, %v352_v17  ;;  %v395_v48 = vsel %vm375_vm2, %v365_v19, %v385_v32 }
  0xf2   :  { %v1852_v10 = vpop.f32.mrf.mxu1  ;;  %v401_v6 = vmax.f32 %v391_v57, %v395_v48  ;;  %v2037_v57 = vld [vmem:[%s2790_s16] sm:$0xff]  }
  0xf3   :  { %v353_v20 = vmul.f32 %v346_v3, %v339_v9  ;;  %v386_v43 = vmul.f32 0.2, %v366_v29  ;;  %vm376_vm5 = vcmp.ge.f32.partialorder %v366_v29, 0.0 }
  0xf4   :  { %v321_v15 = vpop.f32.mrf.mxu1 }
  0xf5   :  { %v340_v18 = vadd.f32 %v321_v15, %v2569_v44  ;;  %v367_v33 = vadd.f32 %v360_v12, %v353_v20  ;;  %v393_v15 = vsel %vm373_vm9, %v363_v39, %v383_v60 }
  0xf6   :  { %v1853_v21 = vpop.f32.mrf.mxu1 }
  0xf7   :  { %v354_v22 = vmul.f32 %v346_v3, %v340_v18  ;;  %v2592_v23 = vpop.f32.mrf.mxu0  ;;  %v387_v49 = vmul.f32 0.2, %v367_v33  ;;  %vm377_vm7 = vcmp.ge.f32.partialorder %v367_v33, 0.0 }
  0xf8   :  { %v326_v27 = vpop.f32.mrf.mxu1 }
  0xf9   :  { %v341_v30 = vadd.f32 %v326_v27, %v179_v40  ;;  %v1880_v31 = vpop.f32.mrf.mxu0  ;;  %v368_v35 = vadd.f32 %v360_v12, %v354_v22  ;;  %v2031_v27 = vld [vmem:[%s2790_s16 + $0x18] sm:$0xff]  }
  0xfa   :  { %v1856_v34 = vpop.f32.mrf.mxu1 }
  0xfb   :  { %v355_v36 = vmul.f32 %v346_v3, %v341_v30  ;;  %v2594_v37 = vpop.f32.mrf.mxu0  ;;  %v388_v51 = vmul.f32 0.2, %v368_v35  ;;  %vm378_vm8 = vcmp.ge.f32.partialorder %v368_v35, 0.0  ;;  %v425_v30 = vld [vmem:[%s2787_s13] sm:$0x3]  ;;  %v646_v34 = vadd.f32 %v2592_v23, %v2571_v53 }
  0xfc   :  { %v329_v41 = vpop.f32.mrf.mxu1 }
  0xfd   :  { %v369_v45 = vadd.f32 %v360_v12, %v355_v36  ;;  %v342_v46 = vadd.f32 %v329_v41, %v2569_v44  ;;  %v1881_v40 = vpop.f32.mrf.mxu0  ;;  %v396_v44 = vsel %vm376_vm5, %v366_v29, %v386_v43  ;;  %v398_v8 = vsel %vm378_vm8, %v368_v35, %v388_v51 }
  0xfe   :  { %v1857_v50 = vpop.f32.mrf.mxu1  ;;  %v405_v11 = vmax.f32 %v392_v5, %v396_v44  ;;  %v406_v19 = vmax.f32 %v394_v16, %v398_v8  ;;  %v659_v35 = vrot.slane %v425_v30, %v2578_v59  ;;  %v647_v36 = vadd.f32 %v2594_v37, %v2575_v58 }
  0xff   :  { %vm379_vm6 = vcmp.ge.f32.partialorder %v369_v45, 0.0  ;;  %v389_v52 = vmul.f32 0.2, %v369_v45  ;;  %v356_v55 = vmul.f32 %v346_v3, %v342_v46  ;;  %v615_v56 = vpop.f32.mrf.mxu0  ;;  %v397_v3 = vsel %vm377_vm7, %v367_v33, %v387_v49  ;;  %v2033_v33 = vld [vmem:[%s2790_s16 + $0x10] sm:$0xff]  }
 0x100   :  { %v2598_v61 = vpop.f32.mrf.mxu1  ;;  %v402_v18 = vmax.f32 %v393_v15, %v397_v3  ;;  %v660_v23 = vmul.f32 %v659_v35, %v646_v34  ;;  %v673_v46 = vrot.slane %v425_v30, %v2585_v4  ;;  %v661_v40 = vmul.f32 %v659_v35, %v647_v36 }
 0x101   :  { %v399_v63 = vsel %vm379_vm6, %v369_v45, %v389_v52  ;;  %v370_v0 = vadd.f32 %v360_v12, %v356_v55  ;;  %v1884_v2 = vpop.f32.mrf.mxu0  ;;  %v2035_v45 = vld [vmem:[%s2790_s16 + $0x8] sm:$0xff]   ;;  %v648_v37 = vadd.f32 %v615_v56, %v2571_v53 }
 0x102   :  { %v1908_v7 = vpop.f32.mrf.mxu1  ;;  %v403_v13 = vmax.f32 %v401_v6, %v399_v63  ;;  %v674_v62 = vadd.f32 %v673_v46, %v660_v23  ;;  %v675_v44 = vadd.f32 %v673_v46, %v661_v40  ;;  %v2039_v6 = vld [vmem:[%s2807_s8] sm:$0xff]  }
 0x103   :  { %vm380_vm11 = vcmp.ge.f32.partialorder %v370_v0, 0.0  ;;  %v390_v9 = vmul.f32 0.2, %v370_v0  ;;  %v618_v10 = vpop.f32.mrf.mxu0  ;;  %v662_v56 = vmul.f32 %v659_v35, %v648_v37 }
 0x104   :  { %v2601_v14 = vpop.f32.mrf.mxu1  ;;  %v404_v24 = vmax.f32 %v403_v13, %v402_v18  ;;  %v649_v48 = vadd.f32 %v618_v10, %v2575_v58  ;;  %vm684_vm13 = vcmp.ge.f32.partialorder %v674_v62, 0.0  ;;  %vm685_vm14 = vcmp.ge.f32.partialorder %v675_v44, 0.0 }
 0x105   :  { %v400_v17 = vsel %vm380_vm11, %v370_v0, %v390_v9  ;;  %v1885_v12 = vpop.f32.mrf.mxu0 }
 0x106   :  { %v407_v20 = vmax.f32 %v405_v11, %v400_v17  ;;  %v1909_v21 = vpop.f32.mrf.mxu1  ;;  %v663_v0 = vmul.f32 %v659_v35, %v649_v48  ;;  %v676_v11 = vadd.f32 %v673_v46, %v662_v56  ;;  %v695_v12 = vmul.f32 0.2, %v675_v44  ;;  %v2049_v48 = vld [vmem:[%s2792_s18 + $0x64] ss:$8 sps:$4 sm:$0xff]  }
 0x107   :  { %v623_v22 = vpop.f32.mrf.mxu0 }
 0x108   :  { %v408_v25 = vmax.f32 %v407_v20, %v406_v19  ;;  %v650_v31 = vadd.f32 %v623_v22, %v2571_v53  ;;  %v677_v15 = vadd.f32 %v673_v46, %v663_v0  ;;  %v2058_v0 = vld [vmem:[%s2792_s18 + $0x34] ss:$8 sps:$4 sm:$0xff]  }
 0x109   :  { %v1888_v26 = vpop.f32.mrf.mxu0 }
 0x10a   :  { %v786_v28 = vpack.c.bf16 %v408_v25, %v404_v24  ;;  %v664_v41 = vmul.f32 %v659_v35, %v650_v31  ;;  %v696_v26 = vmul.f32 0.2, %v676_v11  ;;  %vm687_vm4 = vcmp.ge.f32.partialorder %v677_v15, 0.0 }
 0x10b   :  { %v626_v29 = vpop.f32.mrf.mxu0 }
 0x10c   :  { %1939 = vmatmul.mubr.bf16.vlgmr.msra.gmra.mxu0 %v786_v28  ;;  %v651_v39 = vadd.f32 %v626_v29, %v2575_v58  ;;  %v678_v51 = vadd.f32 %v673_v46, %v664_v41 }
 0x10d   :  { %1955 = vmatpush3.bf16.msra.mxu0 %v2031_v27  ;;  %v1889_v32 = vpop.f32.mrf.mxu0  ;;  %1962 = vmatprep.mubr.msk.bf16.mxu0 %vm2115_vm0, %v2114_v1  ;;  %v697_v27 = vmul.f32 0.2, %v677_v15 }
 0x10e   :  { %1956 = vmatprep.subr.bf16.mxu0 %v2114_v1  ;;  %v665_v49 = vmul.f32 %v659_v35, %v651_v39  ;;  %v698_v7 = vmul.f32 0.2, %v678_v51  ;;  %vm688_vm12 = vcmp.ge.f32.partialorder %v678_v51, 0.0 }
 0x10f   :  { %v631_v38 = vpop.f32.mrf.mxu0  ;;  %v707_v39 = vsel %vm687_vm4, %v677_v15, %v697_v27  ;;  %v2073_v15 = vld [vmem:[%s2792_s18 + $0xe4] ss:$8 sps:$4 sm:$0xff]  }
 0x110   :  { %v652_v42 = vadd.f32 %v631_v38, %v2571_v53  ;;  %v679_v2 = vadd.f32 %v673_v46, %v665_v49  ;;  %v708_v18 = vsel %vm688_vm12, %v678_v51, %v698_v7  ;;  %v2047_v51 = vld [vmem:[%s2792_s18 + $0x60] ss:$8 sps:$4 sm:$0xff]   ;;  %v2091_v27 = vld [vmem:[%s2792_s18 + $0x84] ss:$8 sps:$4 sm:$0xff]  }
 0x111   :  { %1957 = vmatpush3.bf16.msra.mxu0 %v2033_v33  ;;  %v1892_v43 = vpop.f32.mrf.mxu0  ;;  %v2059_v7 = vld [vmem:[%s2792_s18 + $0x20] ss:$8 sps:$4 sm:$0xff]  }
 0x112   :  { %1958 = vmatprep.subr.bf16.mxu0 %v2114_v1  ;;  %v666_v52 = vmul.f32 %v659_v35, %v652_v42  ;;  %v699_v16 = vmul.f32 0.2, %v679_v2  ;;  %vm689_vm15 = vcmp.ge.f32.partialorder %v679_v2, 0.0 }
 0x113   :  { %v634_v47 = vpop.f32.mrf.mxu0 }
 0x114   :  { %v653_v50 = vadd.f32 %v634_v47, %v2575_v58  ;;  %v680_v3 = vadd.f32 %v673_v46, %v666_v52  ;;  %v709_v28 = vsel %vm689_vm15, %v679_v2, %v699_v16  ;;  %v919_v47 = vpop.f32.mrf.mxu1  ;;  %v2056_v2 = vld [vmem:[%s2792_s18 + $0x30] ss:$8 sps:$4 sm:$0xff]   ;;  %v2071_v16 = vld [vmem:[%s2792_s18 + $0xe0] ss:$8 sps:$4 sm:$0xff]  }
 0x115   :  { %1959 = vmatpush3.bf16.msra.mxu0 %v2035_v45  ;;  %v1893_v55 = vpop.f32.mrf.mxu0  ;;  %v2650_v49 = vadd.f32 %v919_v47, %v2598_v61  ;;  %v2050_v61 = vld [vmem:[%s2792_s18 + $0x50] ss:$8 sps:$4 sm:$0xff]  }
 0x116   :  { %v667_v60 = vmul.f32 %v659_v35, %v653_v50  ;;  %1960 = vmatprep.subr.bf16.mxu0 %v2114_v1  ;;  %v694_v1 = vmul.f32 0.2, %v674_v62  ;;  %v700_v19 = vmul.f32 0.2, %v680_v3  ;;  %vm690_vm2 = vcmp.ge.f32.partialorder %v680_v3, 0.0  ;;  %v1920_v50 = vpop.f32.mrf.mxu1 }
 0x117   :  { %v639_v63 = vpop.f32.mrf.mxu0  ;;  %v2052_v55 = vld [vmem:[%s2792_s18 + $0x54] ss:$8 sps:$4 sm:$0xff]  }
 0x118   :  { %v654_v5 = vadd.f32 %v639_v63, %v2571_v53  ;;  %v681_v9 = vadd.f32 %v673_v46, %v667_v60  ;;  %v704_v25 = vsel %vm684_vm13, %v674_v62, %v694_v1  ;;  %v710_v32 = vsel %vm690_vm2, %v680_v3, %v700_v19  ;;  %v922_v52 = vpop.f32.mrf.mxu1  ;;  %v2055_v62 = vld [vmem:[%s2792_s18 + $0x44] ss:$8 sps:$4 sm:$0xff]   ;;  %v2064_v3 = vld [vmem:[%s2792_s18 + $0x14] ss:$8 sps:$4 sm:$0xff]  }
 0x119   :  { %1961 = vmatpush3.bf16.msra.mxu0 %v2037_v57  ;;  %v1896_v8 = vpop.f32.mrf.mxu0  ;;  %v714_v31 = vmax.f32 %v704_v25, %v708_v18  ;;  %v2659_v57 = vadd.f32 %v922_v52, %v2601_v14  ;;  %v2070_v1 = vld [vmem:[%s2792_s18 + $0xf4] ss:$8 sps:$4 sm:$0xff]   ;;  %v2077_v18 = vld [vmem:[%s2792_s18 + $0xc0] ss:$8 sps:$4 sm:$0xff]   ;;  %v2086_v25 = vld [vmem:[%s2792_s18 + $0x90] ss:$8 sps:$4 sm:$0xff]  }
 0x11a   :  { %v668_v10 = vmul.f32 %v659_v35, %v654_v5  ;;  %v701_v21 = vmul.f32 0.2, %v681_v9  ;;  %vm691_vm3 = vcmp.ge.f32.partialorder %v681_v9, 0.0  ;;  %v1921_v60 = vpop.f32.mrf.mxu1  ;;  %v2062_v8 = vld [vmem:[%s2792_s18 + $0x10] ss:$8 sps:$4 sm:$0xff]   ;;  %1399 = vmatprep.subr.bf16.mxu0 %v2070_v1 }
 0x11b   :  { %v642_v13 = vpop.f32.mrf.mxu0  ;;  %v2082_v19 = vld [vmem:[%s2792_s18 + $0xb4] ss:$8 sps:$4 sm:$0xff]  }
 0x11c   :  { %v682_v17 = vadd.f32 %v673_v46, %v668_v10  ;;  %1963 = vmatmul.mubr.msk.bf16.vlgmr.msra.gmra.mxu0 %vm141_vm1, %v2039_v6  ;;  %v655_v53 = vadd.f32 %v642_v13, %v2575_v58  ;;  %v705_v58 = vsel %vm685_vm14, %v675_v44, %v695_v12  ;;  %vm686_vm1 = vcmp.ge.f32.partialorder %v676_v11, 0.0  ;;  %v2053_v44 = vld [vmem:[%s2792_s18 + $0x40] ss:$8 sps:$4 sm:$0xff]   ;;  %v2061_v6 = vld [vmem:[%s2792_s18 + $0x24] ss:$8 sps:$4 sm:$0xff]  }
 0x11d   :  { %v1897_v20 = vpop.f32.mrf.mxu0  ;;  %v711_v33 = vsel %vm691_vm3, %v681_v9, %v701_v21  ;;  %v718_v36 = vmax.f32 %v705_v58, %v709_v28  ;;  %v706_v38 = vsel %vm686_vm1, %v676_v11, %v696_v26  ;;  %v2065_v9 = vld [vmem:[%s2792_s18] ss:$8 sps:$4 sm:$0xff]   ;;  %v2067_v10 = vld [vmem:[%s2792_s18 + $0x4] ss:$8 sps:$4 sm:$0xff]   ;;  %v2116_v11 = vmov 0  }
 0x11e   :  { %vm692_vm0 = vcmp.ge.f32.partialorder %v682_v17, 0.0  ;;  %v702_v22 = vmul.f32 0.2, %v682_v17  ;;  %v669_v24 = vmul.f32 %v659_v35, %v655_v53  ;;  %v715_v42 = vmax.f32 %v706_v38, %v710_v32  ;;  %v2068_v13 = vld [vmem:[%s2792_s18 + $0xf0] ss:$8 sps:$4 sm:$0xff]   ;;  %1431 = vmatprep.mubr.bf16.mxu0 %v2116_v11 }
 0x11f   :  { %v719_v43 = vmax.f32 %v707_v39, %v711_v33  ;;  %1400 = vmatpush1.bf16.msra.mxu0 %v2068_v13  ;;  %v2074_v53 = vld [vmem:[%s2792_s18 + $0xd0] ss:$8 sps:$4 sm:$0xff]   ;;  %v2079_v12 = vld [vmem:[%s2792_s18 + $0xc4] ss:$8 sps:$4 sm:$0xff]   ;;  %v2089_v26 = vld [vmem:[%s2792_s18 + $0x80] ss:$8 sps:$4 sm:$0xff]  }
 0x120   :  { %v712_v29 = vsel %vm692_vm0, %v682_v17, %v702_v22  ;;  %v683_v30 = vadd.f32 %v673_v46, %v669_v24  ;;  %v2044_v46 = vld [vmem:[%s2792_s18 + $0x70] ss:$8 sps:$4 sm:$0xff]   ;;  %1401 = vmatprep.subr.bf16.mxu0 %v2073_v15  ;;  %v2076_v17 = vld [vmem:[%s2792_s18 + $0xd4] ss:$8 sps:$4 sm:$0xff]   ;;  %v2085_v21 = vld [vmem:[%s2792_s18 + $0xa4] ss:$8 sps:$4 sm:$0xff]  }
 0x121   :  { %v716_v35 = vmax.f32 %v714_v31, %v712_v29  ;;  %v2080_v20 = vld [vmem:[%s2792_s18 + $0xb0] ss:$8 sps:$4 sm:$0xff]   ;;  %v2083_v22 = vld [vmem:[%s2792_s18 + $0xa0] ss:$8 sps:$4 sm:$0xff]   ;;  %v2088_v24 = vld [vmem:[%s2792_s18 + $0x94] ss:$8 sps:$4 sm:$0xff]  }
 0x122   :  { %vm693_vm5 = vcmp.ge.f32.partialorder %v683_v30, 0.0  ;;  %v703_v34 = vmul.f32 0.2, %v683_v30  ;;  %v2670_v14 = vpop.f32.mrf.mxu1  ;;  %v787_v28 = vld [vmem:[%s2789_s15] sm:$0x3]  ;;  %v1594_v13 = vsub.s32 3, %v2573_v54 }
 0x123   :  { %v717_v23 = vmax.f32 %v716_v35, %v715_v42  ;;  %1402 = vmatpush1.bf16.msra.mxu0 %v2071_v16  ;;  %v1020_v29 = vrot.slane %v787_v28, %v2578_v59  ;;  %v1026_v31 = vrot.slane %v787_v28, %v2585_v4 }
 0x124   :  { %v713_v41 = vsel %vm693_vm5, %v683_v30, %v703_v34  ;;  %v1952_v56 = vpop.f32.mrf.mxu1  ;;  %1403 = vmatprep.subr.bf16.mxu0 %v2076_v17 }
 0x125   :  { %v720_v45 = vmax.f32 %v718_v36, %v713_v41 }
 0x126   :  { %v2672_v63 = vpop.f32.mrf.mxu1 }
 0x127   :  { %v721_v40 = vmax.f32 %v720_v45, %v719_v43  ;;  %1404 = vmatpush1.bf16.msra.mxu0 %v2074_v53 }
 0x128   :  { %v1953_v5 = vpop.f32.mrf.mxu1  ;;  %1405 = vmatprep.subr.bf16.mxu0 %v2079_v12 }
 0x129   :  { %v1035_v37 = vpack.c.bf16 %v721_v40, %v717_v23 }
 0x12b   :  { %1983 = vmatmul.mubr.bf16.vlgmr.msra.gmra.mxu1 %v1035_v37  ;;  %1406 = vmatpush1.bf16.msra.mxu0 %v2077_v18 }
 0x12c   :  { %1523 = vmatpush1.bf16.msra.mxu1 %v2044_v46  ;;  %1554 = vmatprep.mubr.bf16.mxu1 %v2116_v11 }
 0x12d   :  { %1524 = vmatprep.subr.bf16.mxu1 %v2049_v48  ;;  %1407 = vmatprep.subr.bf16.mxu0 %v2082_v19 }
 0x12f   :  { %1408 = vmatpush1.bf16.msra.mxu0 %v2080_v20 }
 0x130   :  { %1525 = vmatpush1.bf16.msra.mxu1 %v2047_v51  ;;  %1409 = vmatprep.subr.bf16.mxu0 %v2085_v21 }
 0x131   :  { %1526 = vmatprep.subr.bf16.mxu1 %v2052_v55 }
 0x133   :  { %1410 = vmatpush1.bf16.msra.mxu0 %v2083_v22 }
 0x134   :  { %1527 = vmatpush1.bf16.msra.mxu1 %v2050_v61  ;;  %1411 = vmatprep.subr.bf16.mxu0 %v2088_v24 }
 0x135   :  { %1528 = vmatprep.subr.bf16.mxu1 %v2055_v62 }
 0x137   :  { %1412 = vmatpush1.bf16.msra.mxu0 %v2086_v25 }
 0x138   :  { %1529 = vmatpush1.bf16.msra.mxu1 %v2053_v44  ;;  %1413 = vmatprep.subr.bf16.mxu0 %v2091_v27 }
 0x139   :  { %1530 = vmatprep.subr.bf16.mxu1 %v2058_v0 }
 0x13b   :  { %1414 = vmatpush1.bf16.msra.mxu0 %v2089_v26 }
 0x13c   :  { %1531 = vmatpush1.bf16.msra.mxu1 %v2056_v2 }
 0x13d   :  { %1532 = vmatprep.subr.bf16.mxu1 %v2061_v6 }
 0x140   :  { %1533 = vmatpush1.bf16.msra.mxu1 %v2059_v7 }
 0x141   :  { %1534 = vmatprep.subr.bf16.mxu1 %v2064_v3 }
 0x144   :  { %1535 = vmatpush1.bf16.msra.mxu1 %v2062_v8 }
 0x145   :  { %1536 = vmatprep.subr.bf16.mxu1 %v2067_v10  ;;  %v1318_v10 = vld [vmem:[%s2793_s19] sm:$0xf]  ;;  %s2117_s19 = smov [#allocation2]  }
 0x146   :  { %v1569_v11 = vrot.slane %v1318_v10, %v2578_v59  ;;  %v1591_v15 = vrot.slane %v1318_v10, %v2585_v4  ;;  %v1595_v12 = vrot.slane %v1318_v10, %v1594_v13  ;;  %s1631_s10 = sshll.u32 %s2117_s19, 4  ;;  %s1632_s10 = int_to_ptr.vmem [resolvable:$true] %s1631_s10 }
 0x147   :  { %s2092_s7 = scalar_lea.vmem %s1632_s10, 512  ;;  %p2097_p1 = scmp.lt.s32.totalorder %s1632_s10, %s1632_s10 }
 0x148   :  { %1537 = vmatpush1.bf16.msra.mxu1 %v2065_v9  ;;  %v1579_v53 = vrot.slane %v1569_v11, %v2578_v59  ;;  %v1601_v20 = vrot.slane %v1591_v15, %v2585_v4  ;;  %v1605_v27 = vrot.slane %v1595_v12, %v2585_v4  ;;  %p2093_p0 = scmp.ne.s32.totalorder %s1632_s10, %s2092_s7  ;;  %p2098_p2 = scmp.lt.s32.totalorder %s2092_s7, %s2092_s7 }
 0x14a   :  { %p2099_p3 = por %p2098_p2, %p2097_p1 }
 0x14c   :  { %p2100_p4 = pnand %p2099_p3, %p2093_p0 }
 0x1cc   :  { %v1008_v30 = vpop.f32.mrf.mxu0 }
 0x1cd   :  { %v1015_v58 = vadd.f32 %v1008_v30, %v2650_v49  ;;  %v1036_v49 = vld [vmem:[%s2791_s17] sm:$0x3] }
 0x1ce   :  { %v1940_v32 = vpop.f32.mrf.mxu0  ;;  %v1269_v51 = vrot.slane %v1036_v49, %v2578_v59 }
 0x1cf   :  { %v1021_v33 = vmul.f32 %v1020_v29, %v1015_v58 }
 0x1d0   :  { %v1011_v34 = vpop.f32.mrf.mxu0 }
 0x1d1   :  { %v1027_v36 = vadd.f32 %v1026_v31, %v1021_v33  ;;  %v1016_v35 = vadd.f32 %v1011_v34, %v2659_v57  ;;  %v1275_v57 = vrot.slane %v1036_v49, %v2585_v4 }
 0x1d2   :  { %v1941_v38 = vpop.f32.mrf.mxu0 }
 0x1d3   :  { %v1022_v39 = vmul.f32 %v1020_v29, %v1016_v35  ;;  %v1031_v41 = vmul.f32 0.2, %v1027_v36  ;;  %vm1029_vm6 = vcmp.ge.f32.partialorder %v1027_v36, 0.0 }
 0x1d5   :  { %v1028_v42 = vadd.f32 %v1026_v31, %v1022_v39  ;;  %v1033_v45 = vsel %vm1029_vm6, %v1027_v36, %v1031_v41 }
 0x1d7   :  { %vm1030_vm7 = vcmp.ge.f32.partialorder %v1028_v42, 0.0  ;;  %v1032_v43 = vmul.f32 0.2, %v1028_v42 }
 0x1d9   :  { %v1034_v23 = vsel %vm1030_vm7, %v1028_v42, %v1032_v43 }
 0x1da   :  { %v1316_v40 = vpack.c.bf16 %v1034_v23, %v1033_v45 }
 0x1dc   :  { %v1168_v46 = vpop.f32.mrf.mxu0  ;;  %1555 = vmatmul.mubr.bf16.vlgmr.msra.gmra.mxu1 %v1316_v40 }
 0x1dd   :  { %v1169_v50 = vadd.f32 %v1168_v46, %v2670_v14 }
 0x1de   :  { %v1964_v37 = vpop.f32.mrf.mxu0 }
 0x1e0   :  { %v1171_v47 = vpop.f32.mrf.mxu0 }
 0x1e1   :  { %v1172_v61 = vadd.f32 %v1171_v47, %v2672_v63  ;;  %v1572_v63 = vsub.s32 2, %v2573_v54 }
 0x1e2   :  { %v1965_v48 = vpop.f32.mrf.mxu0 }
 0x1e3   :  { %v1573_v16 = vrot.slane %v1318_v10, %v1572_v63 }
 0x1e5   :  { %v1583_v21 = vrot.slane %v1573_v16, %v2578_v59 }
 0x1eb   :  { %v1257_v52 = vpop.f32.mrf.mxu1 }
 0x1ec   :  { %v1264_v55 = vadd.f32 %v1257_v52, %v1169_v50 }
 0x1ed   :  { %v1984_v60 = vpop.f32.mrf.mxu1 }
 0x1ee   :  { %v1270_v62 = vmul.f32 %v1269_v51, %v1264_v55 }
 0x1ef   :  { %v1260_v44 = vpop.f32.mrf.mxu1 }
 0x1f0   :  { %v1276_v56 = vadd.f32 %v1275_v57, %v1270_v62  ;;  %v1265_v0 = vadd.f32 %v1260_v44, %v1172_v61 }
 0x1f1   :  { %v1985_v2 = vpop.f32.mrf.mxu1 }
 0x1f2   :  { %v1271_v5 = vmul.f32 %v1269_v51, %v1265_v0  ;;  %v1280_v6 = vmul.f32 0.2, %v1276_v56  ;;  %vm1278_vm8 = vcmp.ge.f32.partialorder %v1276_v56, 0.0 }
 0x1f4   :  { %v1277_v7 = vadd.f32 %v1275_v57, %v1271_v5  ;;  %v1282_v3 = vsel %vm1278_vm8, %v1276_v56, %v1280_v6 }
 0x1f6   :  { %vm1279_vm9 = vcmp.ge.f32.partialorder %v1277_v7, 0.0  ;;  %v1281_v14 = vmul.f32 0.2, %v1277_v7 }
 0x1f8   :  { %v1283_v8 = vsel %vm1279_vm9, %v1277_v7, %v1281_v14 }
 0x1f9   :  { %v1317_v9 = vpack.c.bf16 %v1283_v8, %v1282_v3 }
 0x1fb   :  { %1432 = vmatmul.mubr.bf16.vlgmr.msra.gmra.mxu0 %v1317_v9 }
 0x29c   :  { %v1556_v1 = vpop.f32.mrf.mxu1 }
 0x29e   :  { %v1558_v17 = vpop.f32.mrf.mxu1 }
 0x2a0   :  { %v1560_v24 = vpop.f32.mrf.mxu1 }
 0x2a2   :  { %v1562_v31 = vpop.f32.mrf.mxu1 }
 0x2bb   :  { %v1433_v18 = vpop.f32.mrf.mxu0 }
 0x2bc   :  { %v1557_v19 = vadd.f32 %v1556_v1, %v1433_v18 }
 0x2bd   :  { %v1435_v22 = vpop.f32.mrf.mxu0 }
 0x2be   :  { %v1584_v25 = vmul.f32 %v1579_v53, %v1557_v19  ;;  %v1559_v26 = vadd.f32 %v1558_v17, %v1435_v22 }
 0x2bf   :  { %v1437_v54 = vpop.f32.mrf.mxu0 }
 0x2c0   :  { %v1606_v28 = vadd.f32 %v1601_v20, %v1584_v25  ;;  %v1585_v29 = vmul.f32 %v1583_v21, %v1559_v26  ;;  %v1561_v30 = vadd.f32 %v1560_v24, %v1437_v54 }
 0x2c1   :  { %v1439_v58 = vpop.f32.mrf.mxu0 }
 0x2c2   :  { %vm1610_vm10 = vcmp.ge.f32.partialorder %v1606_v28, 0.0  ;;  %v1614_v32 = vmul.f32 0.2, %v1606_v28  ;;  %v1607_v33 = vadd.f32 %v1605_v27, %v1585_v29  ;;  %v1586_v34 = vmul.f32 %v1579_v53, %v1561_v30 }
 0x2c3   :  { %v1563_v36 = vadd.f32 %v1562_v31, %v1439_v58 }
 0x2c4   :  { %v1618_v35 = vsel %vm1610_vm10, %v1606_v28, %v1614_v32  ;;  %vm1611_vm11 = vcmp.ge.f32.partialorder %v1607_v33, 0.0  ;;  %v1615_v59 = vmul.f32 0.2, %v1607_v33  ;;  %v1608_v38 = vadd.f32 %v1601_v20, %v1586_v34 }
 0x2c5   :  { %1622 = vst [vmem:[#allocation2] sm:$0xff] %v1618_v35  ;;  %v1587_v39 = vmul.f32 %v1583_v21, %v1563_v36 }
 0x2c6   :  { %v1619_v41 = vsel %vm1611_vm11, %v1607_v33, %v1615_v59  ;;  %vm1612_vm12 = vcmp.ge.f32.partialorder %v1608_v38, 0.0  ;;  %v1616_v4 = vmul.f32 0.2, %v1608_v38 }
 0x2c7   :  { %1623 = vst [vmem:[#allocation2 + $0x8] sm:$0xff] %v1619_v41  ;;  %v1609_v42 = vadd.f32 %v1605_v27, %v1587_v39 }
 0x2c8   :  { %v1620_v43 = vsel %vm1612_vm12, %v1608_v38, %v1616_v4 }
 0x2c9   :  { %1624 = vst [vmem:[#allocation2 + $0x10] sm:$0xff] %v1620_v43  ;;  %vm1613_vm13 = vcmp.ge.f32.partialorder %v1609_v42, 0.0  ;;  %v1617_v45 = vmul.f32 0.2, %v1609_v42 }
 0x2cb   :  { %v1621_v23 = vsel %vm1613_vm13, %v1609_v42, %v1617_v45 }
 0x2cc   :  { %1625 = vst [vmem:[#allocation2 + $0x18] sm:$0xff] %v1621_v23 }
 0x2cd   :  { %2103 = shalt.err (!%p2100_p4)
}
 0x2ce   :  { %s2118_s22 = smov 256   ;;  %s2119_s2 = smov 16  }
 0x2cf   :  { %1637 = dma.vmem_to_hbm [thread:$0]  %s1632_s10, 512, %s2794_s20, [#allocation3], %s2118_s22, %s2118_s22, %s2119_s2  }
 0x2d0   :  { %2112 = dma.done.wait [#allocation3], 512  }
 0x2d1   :  { %2113 = vsyncadd [#allocation3], 4294966784 }
 0x2d2   :  { %1641 = vsyncpa [#allocation3], 1 }

</bundles_post_ra>
